<compile_context>
chip_gen: v7x
topology: tpu7x:2x2x1
jax: 0.10.0
libtpu: 0.0.40
codegen_flags: <defaults>
</compile_context>

<pallas_src>
import jax
import jax.numpy as jnp
import numpy as np
from jax.experimental import pallas as pl
from jax.experimental.pallas import tpu as pltpu


def rnn_kernel(xproj_ref, whh0_ref, wih1_ref, whh1_ref, b1_ref, wfc_ref,
               bfc_ref, y_ref, state_ref, h2seq_sc):
    T, B, H = xproj_ref.shape
    V = wfc_ref.shape[1]
    CHUNK = min(4, T)  # timesteps per interleaved head matmul

    # Hoist broadcasts out of the time loop (JAX does not CSE broadcast_in_dim).
    b1 = jnp.broadcast_to(b1_ref[...], (B, H))
    bfc = bfc_ref[...]                       # (1, V); broadcast in the chunk add

    h1 = jnp.zeros((B, H), jnp.float32)
    h2 = jnp.zeros((B, H), jnp.float32)

    # T is static and small -> fully unrolled recurrence (static slices, full
    # LLO scheduling visibility so layer-0 step t+1 overlaps layer-1 step t).
    for t in range(T):
        # Layer 0: only the truly-sequential h1 @ Whh0 remains on the chain
        # (input projection + bias precomputed as an embedding gather).
        h1 = jnp.tanh(xproj_ref[t]
                      + jnp.dot(h1, whh0_ref[...],
                                preferred_element_type=jnp.float32))
        # Layer 1 (unfused): dot(h2_prev, Whh1) depends only on step t-1 and
        # can issue early; dot(h1_t, Wih1) is the single on-chain link.
        h2 = jnp.tanh(jnp.dot(h1, wih1_ref[...],
                              preferred_element_type=jnp.float32)
                      + jnp.dot(h2, whh1_ref[...],
                                preferred_element_type=jnp.float32)
                      + b1)
        # bf16 history for the head (the MXU rounds to bf16 anyway).
        h2seq_sc[pl.ds(t * B, B), :] = h2.astype(jnp.bfloat16)

        # Interleaved output head: as soon as a chunk of timesteps is done,
        # fire its (chunk*B, H) @ (H, V) matmul.  Nothing on the recurrence
        # chain consumes it, so it hides under the latency-bound recurrence
        # instead of being a serial epilogue.
        if (t + 1) % CHUNK == 0 or t == T - 1:
            start = (t // CHUNK) * CHUNK
            n = t + 1 - start
            hblk = h2seq_sc[pl.ds(start * B, n * B), :]          # (n*B, H) bf16
            logits = jnp.dot(hblk, wfc_ref[...],
                             preferred_element_type=jnp.float32) + bfc
            y_ref[pl.ds(start, n)] = logits.reshape(n, B, V)

    # Final state written exactly once (after the loop).
    state_ref[0] = h1
    state_ref[1] = h2


def simple_rnn_forward(x_idx, params, vocab_size, hidden_size):
    T, B = x_idx.shape
    V, H = vocab_size, hidden_size
    emb0, whh0, b0, wih1, whh1, b1, wfc, bfc = params

    # Embedding gather replaces one_hot(x) @ W_ih0^T; fold layer-0 bias here.
    xproj = jnp.take(emb0, x_idx, axis=0) + b0           # (T, B, H) plain-JAX glue
    wfc_bf16 = wfc.astype(jnp.bfloat16)                  # head is bf16 on the MXU anyway

    spec = lambda shape: pl.BlockSpec(shape, lambda i: (0,) * len(shape))

    y, state = pl.pallas_call(
        rnn_kernel,
        out_shape=(jax.ShapeDtypeStruct((T, B, V), jnp.float32),
                   jax.ShapeDtypeStruct((2, B, H), jnp.float32)),
        grid_spec=pltpu.PrefetchScalarGridSpec(
            num_scalar_prefetch=0,
            grid=(1,),                                   # whole sequence in one step
            in_specs=[
                spec((T, B, H)),    # xproj  (embedding + b0)
                spec((H, H)),       # W_hh0^T
                spec((H, H)),       # W_ih1^T
                spec((H, H)),       # W_hh1^T
                spec((1, H)),       # b_ih1 + b_hh1
                spec((H, V)),       # W_fc^T (bf16)
                spec((1, V)),       # b_fc
            ],
            out_specs=[
                spec((T, B, V)),    # logits (lane-dense last dim)
                spec((2, B, H)),    # final state
            ],
            scratch_shapes=[pltpu.VMEM((T * B, H), jnp.bfloat16)],  # h2 history
        ),
        compiler_params=pltpu.CompilerParams(
            dimension_semantics=("arbitrary",)),
    )(xproj, whh0, wih1, whh1, b1, wfc_bf16, bfc)
    return y, state


def init_params(key, vocab_size, hidden_size):
    """PyTorch-shaped init (uniform(-1/sqrt(H), 1/sqrt(H))), re-laid-out for
    the kernel: pre-transposed weights, embedding table for layer 0, combined
    per-layer biases."""
    V, H = vocab_size, hidden_size
    k = 1.0 / np.sqrt(H)
    keys = jax.random.split(key, 10)
    u = lambda kk, shape: jax.random.uniform(kk, shape, jnp.float32, -k, k)
    w_ih0 = u(keys[0], (H, V))
    w_hh0 = u(keys[1], (H, H))
    b0 = u(keys[2], (H,)) + u(keys[3], (H,))          # b_ih0 + b_hh0
    w_ih1 = u(keys[4], (H, H))
    w_hh1 = u(keys[5], (H, H))
    b1 = u(keys[6], (H,)) + u(keys[7], (H,))          # b_ih1 + b_hh1
    w_fc = u(keys[8], (V, H))
    b_fc = u(keys[9], (V,))
    return (w_ih0.T,                                   # (V, H) embedding table
            w_hh0.T,                                   # (H, H)
            b0.reshape(1, H),
            w_ih1.T, w_hh1.T,                          # (H, H), (H, H)
            b1.reshape(1, H),
            w_fc.T,                                    # (H, V)
            b_fc.reshape(1, V))


def reference_forward(x_idx, params, vocab_size, hidden_size):
    """float64 numpy reference mirroring PyTorch nn.RNN + Linear semantics."""
    emb0, whh0, b0, wih1, whh1, b1, wfc, bfc = [
        np.asarray(p, np.float64) for p in params]
    x = np.asarray(x_idx)
    T, B = x.shape
    H = hidden_size
    h1 = np.zeros((B, H))
    h2 = np.zeros((B, H))
    ys = []
    for t in range(T):
        h1 = np.tanh(emb0[x[t]] + b0 + h1 @ whh0)
        h2 = np.tanh(h1 @ wih1 + h2 @ whh1 + b1)
        ys.append(h2 @ wfc + bfc)
    return np.stack(ys, axis=0), np.stack([h1, h2], axis=0)


if __name__ == "__main__":
    # Small but (8,128)-aligned shapes: B fills the sublanes, H=V fill lanes.
    vocab_size = 128
    hidden_size = 128
    T, B = 16, 8

    key = jax.random.PRNGKey(0)
    k_params, k_x = jax.random.split(key)
    params = init_params(k_params, vocab_size, hidden_size)
    x_idx = jax.random.randint(k_x, (T, B), 0, vocab_size, dtype=jnp.int32)

    fwd = jax.jit(simple_rnn_forward, static_argnums=(2, 3))
    y, state = fwd(x_idx, params, vocab_size, hidden_size)
    jax.block_until_ready((y, state))

    y_ref, state_ref = reference_forward(x_idx, params, vocab_size, hidden_size)
    # Default MXU precision (bf16 multiply, f32 accumulate) through a T-step
    # tanh chain -> 2e-2 tolerance (h2 history is bf16 = same rounding the MXU
    # applies anyway, so this is unchanged vs the previous version).
    np.testing.assert_allclose(np.asarray(y), y_ref, rtol=2e-2, atol=2e-2)
    np.testing.assert_allclose(np.asarray(state), state_ref, rtol=2e-2, atol=2e-2)

    print("KERNEL_OK")
</pallas_src>

<mosaic_0001>
module attributes {stable_mosaic.version = 11 : i64} {
  func.func @rnn_kernel(%arg0: i32, %arg1: memref<16x8x128xf32, #tpu.memory_space<vmem>>, %arg2: memref<128x128xf32, #tpu.memory_space<vmem>>, %arg3: memref<128x128xf32, #tpu.memory_space<vmem>>, %arg4: memref<128x128xf32, #tpu.memory_space<vmem>>, %arg5: memref<1x128xf32, #tpu.memory_space<vmem>>, %arg6: memref<128x128xbf16, #tpu.memory_space<vmem>>, %arg7: memref<1x128xf32, #tpu.memory_space<vmem>>, %arg8: memref<16x8x128xf32, #tpu.memory_space<vmem>>, %arg9: memref<2x8x128xf32, #tpu.memory_space<vmem>>, %arg10: memref<128x128xbf16, #tpu.memory_space<vmem>>) attributes {dimension_semantics = [#tpu.dimension_semantics<arbitrary>], iteration_bounds = array<i64: 1>, scalar_prefetch = 0 : i64, scratch_operands = 1 : i64, tpu.core_type = #tpu.core_type<tc>, window_params = [{pipeline_mode = #tpu.pipeline_mode<synchronous>, transform_indices = @transform_0, window_bounds = array<i64: 16, 8, 128>}, {pipeline_mode = #tpu.pipeline_mode<synchronous>, transform_indices = @transform_1, window_bounds = array<i64: 128, 128>}, {pipeline_mode = #tpu.pipeline_mode<synchronous>, transform_indices = @transform_2, window_bounds = array<i64: 128, 128>}, {pipeline_mode = #tpu.pipeline_mode<synchronous>, transform_indices = @transform_3, window_bounds = array<i64: 128, 128>}, {pipeline_mode = #tpu.pipeline_mode<synchronous>, transform_indices = @transform_4, window_bounds = array<i64: 1, 128>}, {pipeline_mode = #tpu.pipeline_mode<synchronous>, transform_indices = @transform_5, window_bounds = array<i64: 128, 128>}, {pipeline_mode = #tpu.pipeline_mode<synchronous>, transform_indices = @transform_6, window_bounds = array<i64: 1, 128>}, {pipeline_mode = #tpu.pipeline_mode<synchronous>, transform_indices = @transform_7, window_bounds = array<i64: 16, 8, 128>}, {pipeline_mode = #tpu.pipeline_mode<synchronous>, transform_indices = @transform_8, window_bounds = array<i64: 2, 8, 128>}]} {
    %c0 = arith.constant 0 : index
    %c0_0 = arith.constant 0 : index
    %0 = vector.load %arg5[%c0, %c0_0] : memref<1x128xf32, #tpu.memory_space<vmem>>, vector<1x128xf32>
    %1 = vector.shape_cast %0 : vector<1x128xf32> to vector<1x128xf32>
    %2 = vector.broadcast %1 : vector<1x128xf32> to vector<8x128xf32>
    %c0_1 = arith.constant 0 : index
    %c0_2 = arith.constant 0 : index
    %3 = vector.load %arg7[%c0_1, %c0_2] : memref<1x128xf32, #tpu.memory_space<vmem>>, vector<1x128xf32>
    %cst = arith.constant 0.000000e+00 : f32
    %4 = vector.broadcast %cst : f32 to vector<8x128xf32>
    %cst_3 = arith.constant 0.000000e+00 : f32
    %5 = vector.broadcast %cst_3 : f32 to vector<8x128xf32>
    %c0_4 = arith.constant 0 : index
    %c0_5 = arith.constant 0 : index
    %c0_6 = arith.constant 0 : index
    %6 = vector.load %arg1[%c0_4, %c0_5, %c0_6] : memref<16x8x128xf32, #tpu.memory_space<vmem>>, vector<1x8x128xf32>
    %7 = vector.shape_cast %6 : vector<1x8x128xf32> to vector<8x128xf32>
    %c0_7 = arith.constant 0 : index
    %c0_8 = arith.constant 0 : index
    %8 = vector.load %arg2[%c0_7, %c0_8] : memref<128x128xf32, #tpu.memory_space<vmem>>, vector<128x128xf32>
    %cst_9 = arith.constant dense<0.000000e+00> : vector<8x128xf32>
    %9 = tpu.matmul %4, %8, %cst_9 {dimension_numbers = #tpu.dot_dimension_numbers<[1], [0], [0], [1], [0, 0, 1, 1], [], []>} : vector<8x128xf32>, vector<128x128xf32>, vector<8x128xf32> -> vector<8x128xf32>
    %10 = arith.addf %7, %9 : vector<8x128xf32>
    %11 = math.tanh %10 : vector<8x128xf32>
    %c0_10 = arith.constant 0 : index
    %c0_11 = arith.constant 0 : index
    %12 = vector.load %arg3[%c0_10, %c0_11] : memref<128x128xf32, #tpu.memory_space<vmem>>, vector<128x128xf32>
    %cst_12 = arith.constant dense<0.000000e+00> : vector<8x128xf32>
    %13 = tpu.matmul %11, %12, %cst_12 {dimension_numbers = #tpu.dot_dimension_numbers<[1], [0], [0], [1], [0, 0, 1, 1], [], []>} : vector<8x128xf32>, vector<128x128xf32>, vector<8x128xf32> -> vector<8x128xf32>
    %c0_13 = arith.constant 0 : index
    %c0_14 = arith.constant 0 : index
    %14 = vector.load %arg4[%c0_13, %c0_14] : memref<128x128xf32, #tpu.memory_space<vmem>>, vector<128x128xf32>
    %cst_15 = arith.constant dense<0.000000e+00> : vector<8x128xf32>
    %15 = tpu.matmul %5, %14, %cst_15 {dimension_numbers = #tpu.dot_dimension_numbers<[1], [0], [0], [1], [0, 0, 1, 1], [], []>} : vector<8x128xf32>, vector<128x128xf32>, vector<8x128xf32> -> vector<8x128xf32>
    %16 = arith.addf %13, %15 : vector<8x128xf32>
    %17 = arith.addf %16, %2 : vector<8x128xf32>
    %18 = math.tanh %17 : vector<8x128xf32>
    %19 = arith.truncf %18 : vector<8x128xf32> to vector<8x128xbf16>
    %c0_16 = arith.constant 0 : index
    %c0_17 = arith.constant 0 : index
    %20 = vector.load %arg10[%c0_16, %c0_17] : memref<128x128xbf16, #tpu.memory_space<vmem>>, vector<8x128xbf16>
    tpu.vector_store %arg10[%c0_16, %c0_17], %19 {strides = array<i32>} : memref<128x128xbf16, #tpu.memory_space<vmem>>, vector<8x128xbf16>,
    %c1 = arith.constant 1 : index
    %c0_18 = arith.constant 0 : index
    %c0_19 = arith.constant 0 : index
    %21 = vector.load %arg1[%c1, %c0_18, %c0_19] : memref<16x8x128xf32, #tpu.memory_space<vmem>>, vector<1x8x128xf32>
    %22 = vector.shape_cast %21 : vector<1x8x128xf32> to vector<8x128xf32>
    %c0_20 = arith.constant 0 : index
    %c0_21 = arith.constant 0 : index
    %23 = vector.load %arg2[%c0_20, %c0_21] : memref<128x128xf32, #tpu.memory_space<vmem>>, vector<128x128xf32>
    %cst_22 = arith.constant dense<0.000000e+00> : vector<8x128xf32>
    %24 = tpu.matmul %11, %23, %cst_22 {dimension_numbers = #tpu.dot_dimension_numbers<[1], [0], [0], [1], [0, 0, 1, 1], [], []>} : vector<8x128xf32>, vector<128x128xf32>, vector<8x128xf32> -> vector<8x128xf32>
    %25 = arith.addf %22, %24 : vector<8x128xf32>
    %26 = math.tanh %25 : vector<8x128xf32>
    %c0_23 = arith.constant 0 : index
    %c0_24 = arith.constant 0 : index
    %27 = vector.load %arg3[%c0_23, %c0_24] : memref<128x128xf32, #tpu.memory_space<vmem>>, vector<128x128xf32>
    %cst_25 = arith.constant dense<0.000000e+00> : vector<8x128xf32>
    %28 = tpu.matmul %26, %27, %cst_25 {dimension_numbers = #tpu.dot_dimension_numbers<[1], [0], [0], [1], [0, 0, 1, 1], [], []>} : vector<8x128xf32>, vector<128x128xf32>, vector<8x128xf32> -> vector<8x128xf32>
    %c0_26 = arith.constant 0 : index
    %c0_27 = arith.constant 0 : index
    %29 = vector.load %arg4[%c0_26, %c0_27] : memref<128x128xf32, #tpu.memory_space<vmem>>, vector<128x128xf32>
    %cst_28 = arith.constant dense<0.000000e+00> : vector<8x128xf32>
    %30 = tpu.matmul %18, %29, %cst_28 {dimension_numbers = #tpu.dot_dimension_numbers<[1], [0], [0], [1], [0, 0, 1, 1], [], []>} : vector<8x128xf32>, vector<128x128xf32>, vector<8x128xf32> -> vector<8x128xf32>
    %31 = arith.addf %28, %30 : vector<8x128xf32>
    %32 = arith.addf %31, %2 : vector<8x128xf32>
    %33 = math.tanh %32 : vector<8x128xf32>
    %34 = arith.truncf %33 : vector<8x128xf32> to vector<8x128xbf16>
    %c8 = arith.constant 8 : index
    %c0_29 = arith.constant 0 : index
    %35 = vector.load %arg10[%c8, %c0_29] : memref<128x128xbf16, #tpu.memory_space<vmem>>, vector<8x128xbf16>
    tpu.vector_store %arg10[%c8, %c0_29], %34 {strides = array<i32>} : memref<128x128xbf16, #tpu.memory_space<vmem>>, vector<8x128xbf16>,
    %c2 = arith.constant 2 : index
    %c0_30 = arith.constant 0 : index
    %c0_31 = arith.constant 0 : index
    %36 = vector.load %arg1[%c2, %c0_30, %c0_31] : memref<16x8x128xf32, #tpu.memory_space<vmem>>, vector<1x8x128xf32>
    %37 = vector.shape_cast %36 : vector<1x8x128xf32> to vector<8x128xf32>
    %c0_32 = arith.constant 0 : index
    %c0_33 = arith.constant 0 : index
    %38 = vector.load %arg2[%c0_32, %c0_33] : memref<128x128xf32, #tpu.memory_space<vmem>>, vector<128x128xf32>
    %cst_34 = arith.constant dense<0.000000e+00> : vector<8x128xf32>
    %39 = tpu.matmul %26, %38, %cst_34 {dimension_numbers = #tpu.dot_dimension_numbers<[1], [0], [0], [1], [0, 0, 1, 1], [], []>} : vector<8x128xf32>, vector<128x128xf32>, vector<8x128xf32> -> vector<8x128xf32>
    %40 = arith.addf %37, %39 : vector<8x128xf32>
    %41 = math.tanh %40 : vector<8x128xf32>
    %c0_35 = arith.constant 0 : index
    %c0_36 = arith.constant 0 : index
    %42 = vector.load %arg3[%c0_35, %c0_36] : memref<128x128xf32, #tpu.memory_space<vmem>>, vector<128x128xf32>
    %cst_37 = arith.constant dense<0.000000e+00> : vector<8x128xf32>
    %43 = tpu.matmul %41, %42, %cst_37 {dimension_numbers = #tpu.dot_dimension_numbers<[1], [0], [0], [1], [0, 0, 1, 1], [], []>} : vector<8x128xf32>, vector<128x128xf32>, vector<8x128xf32> -> vector<8x128xf32>
    %c0_38 = arith.constant 0 : index
    %c0_39 = arith.constant 0 : index
    %44 = vector.load %arg4[%c0_38, %c0_39] : memref<128x128xf32, #tpu.memory_space<vmem>>, vector<128x128xf32>
    %cst_40 = arith.constant dense<0.000000e+00> : vector<8x128xf32>
    %45 = tpu.matmul %33, %44, %cst_40 {dimension_numbers = #tpu.dot_dimension_numbers<[1], [0], [0], [1], [0, 0, 1, 1], [], []>} : vector<8x128xf32>, vector<128x128xf32>, vector<8x128xf32> -> vector<8x128xf32>
    %46 = arith.addf %43, %45 : vector<8x128xf32>
    %47 = arith.addf %46, %2 : vector<8x128xf32>
    %48 = math.tanh %47 : vector<8x128xf32>
    %49 = arith.truncf %48 : vector<8x128xf32> to vector<8x128xbf16>
    %c16 = arith.constant 16 : index
    %c0_41 = arith.constant 0 : index
    %50 = vector.load %arg10[%c16, %c0_41] : memref<128x128xbf16, #tpu.memory_space<vmem>>, vector<8x128xbf16>
    tpu.vector_store %arg10[%c16, %c0_41], %49 {strides = array<i32>} : memref<128x128xbf16, #tpu.memory_space<vmem>>, vector<8x128xbf16>,
    %c3 = arith.constant 3 : index
    %c0_42 = arith.constant 0 : index
    %c0_43 = arith.constant 0 : index
    %51 = vector.load %arg1[%c3, %c0_42, %c0_43] : memref<16x8x128xf32, #tpu.memory_space<vmem>>, vector<1x8x128xf32>
    %52 = vector.shape_cast %51 : vector<1x8x128xf32> to vector<8x128xf32>
    %c0_44 = arith.constant 0 : index
    %c0_45 = arith.constant 0 : index
    %53 = vector.load %arg2[%c0_44, %c0_45] : memref<128x128xf32, #tpu.memory_space<vmem>>, vector<128x128xf32>
    %cst_46 = arith.constant dense<0.000000e+00> : vector<8x128xf32>
    %54 = tpu.matmul %41, %53, %cst_46 {dimension_numbers = #tpu.dot_dimension_numbers<[1], [0], [0], [1], [0, 0, 1, 1], [], []>} : vector<8x128xf32>, vector<128x128xf32>, vector<8x128xf32> -> vector<8x128xf32>
    %55 = arith.addf %52, %54 : vector<8x128xf32>
    %56 = math.tanh %55 : vector<8x128xf32>
    %c0_47 = arith.constant 0 : index
    %c0_48 = arith.constant 0 : index
    %57 = vector.load %arg3[%c0_47, %c0_48] : memref<128x128xf32, #tpu.memory_space<vmem>>, vector<128x128xf32>
    %cst_49 = arith.constant dense<0.000000e+00> : vector<8x128xf32>
    %58 = tpu.matmul %56, %57, %cst_49 {dimension_numbers = #tpu.dot_dimension_numbers<[1], [0], [0], [1], [0, 0, 1, 1], [], []>} : vector<8x128xf32>, vector<128x128xf32>, vector<8x128xf32> -> vector<8x128xf32>
    %c0_50 = arith.constant 0 : index
    %c0_51 = arith.constant 0 : index
    %59 = vector.load %arg4[%c0_50, %c0_51] : memref<128x128xf32, #tpu.memory_space<vmem>>, vector<128x128xf32>
    %cst_52 = arith.constant dense<0.000000e+00> : vector<8x128xf32>
    %60 = tpu.matmul %48, %59, %cst_52 {dimension_numbers = #tpu.dot_dimension_numbers<[1], [0], [0], [1], [0, 0, 1, 1], [], []>} : vector<8x128xf32>, vector<128x128xf32>, vector<8x128xf32> -> vector<8x128xf32>
    %61 = arith.addf %58, %60 : vector<8x128xf32>
    %62 = arith.addf %61, %2 : vector<8x128xf32>
    %63 = math.tanh %62 : vector<8x128xf32>
    %64 = arith.truncf %63 : vector<8x128xf32> to vector<8x128xbf16>
    %c24 = arith.constant 24 : index
    %c0_53 = arith.constant 0 : index
    %65 = vector.load %arg10[%c24, %c0_53] : memref<128x128xbf16, #tpu.memory_space<vmem>>, vector<8x128xbf16>
    tpu.vector_store %arg10[%c24, %c0_53], %64 {strides = array<i32>} : memref<128x128xbf16, #tpu.memory_space<vmem>>, vector<8x128xbf16>,
    %c0_54 = arith.constant 0 : index
    %c0_55 = arith.constant 0 : index
    %66 = vector.load %arg10[%c0_54, %c0_55] : memref<128x128xbf16, #tpu.memory_space<vmem>>, vector<32x128xbf16>
    %c0_56 = arith.constant 0 : index
    %c0_57 = arith.constant 0 : index
    %67 = vector.load %arg6[%c0_56, %c0_57] : memref<128x128xbf16, #tpu.memory_space<vmem>>, vector<128x128xbf16>
    %cst_58 = arith.constant dense<0.000000e+00> : vector<32x128xf32>
    %68 = tpu.matmul %66, %67, %cst_58 {dimension_numbers = #tpu.dot_dimension_numbers<[1], [0], [0], [1], [0, 0, 1, 1], [], []>} : vector<32x128xbf16>, vector<128x128xbf16>, vector<32x128xf32> -> vector<32x128xf32>
    %69 = vector.broadcast %3 : vector<1x128xf32> to vector<32x128xf32>
    %70 = arith.addf %68, %69 : vector<32x128xf32>
    %71 = vector.shape_cast %70 : vector<32x128xf32> to vector<4x8x128xf32>
    %c0_59 = arith.constant 0 : index
    %c0_60 = arith.constant 0 : index
    %c0_61 = arith.constant 0 : index
    %72 = vector.load %arg8[%c0_59, %c0_60, %c0_61] : memref<16x8x128xf32, #tpu.memory_space<vmem>>, vector<4x8x128xf32>
    tpu.vector_store %arg8[%c0_59, %c0_60, %c0_61], %71 {strides = array<i32>} : memref<16x8x128xf32, #tpu.memory_space<vmem>>, vector<4x8x128xf32>,
    %c4 = arith.constant 4 : index
    %c0_62 = arith.constant 0 : index
    %c0_63 = arith.constant 0 : index
    %73 = vector.load %arg1[%c4, %c0_62, %c0_63] : memref<16x8x128xf32, #tpu.memory_space<vmem>>, vector<1x8x128xf32>
    %74 = vector.shape_cast %73 : vector<1x8x128xf32> to vector<8x128xf32>
    %c0_64 = arith.constant 0 : index
    %c0_65 = arith.constant 0 : index
    %75 = vector.load %arg2[%c0_64, %c0_65] : memref<128x128xf32, #tpu.memory_space<vmem>>, vector<128x128xf32>
    %cst_66 = arith.constant dense<0.000000e+00> : vector<8x128xf32>
    %76 = tpu.matmul %56, %75, %cst_66 {dimension_numbers = #tpu.dot_dimension_numbers<[1], [0], [0], [1], [0, 0, 1, 1], [], []>} : vector<8x128xf32>, vector<128x128xf32>, vector<8x128xf32> -> vector<8x128xf32>
    %77 = arith.addf %74, %76 : vector<8x128xf32>
    %78 = math.tanh %77 : vector<8x128xf32>
    %c0_67 = arith.constant 0 : index
    %c0_68 = arith.constant 0 : index
    %79 = vector.load %arg3[%c0_67, %c0_68] : memref<128x128xf32, #tpu.memory_space<vmem>>, vector<128x128xf32>
    %cst_69 = arith.constant dense<0.000000e+00> : vector<8x128xf32>
    %80 = tpu.matmul %78, %79, %cst_69 {dimension_numbers = #tpu.dot_dimension_numbers<[1], [0], [0], [1], [0, 0, 1, 1], [], []>} : vector<8x128xf32>, vector<128x128xf32>, vector<8x128xf32> -> vector<8x128xf32>
    %c0_70 = arith.constant 0 : index
    %c0_71 = arith.constant 0 : index
    %81 = vector.load %arg4[%c0_70, %c0_71] : memref<128x128xf32, #tpu.memory_space<vmem>>, vector<128x128xf32>
    %cst_72 = arith.constant dense<0.000000e+00> : vector<8x128xf32>
    %82 = tpu.matmul %63, %81, %cst_72 {dimension_numbers = #tpu.dot_dimension_numbers<[1], [0], [0], [1], [0, 0, 1, 1], [], []>} : vector<8x128xf32>, vector<128x128xf32>, vector<8x128xf32> -> vector<8x128xf32>
    %83 = arith.addf %80, %82 : vector<8x128xf32>
    %84 = arith.addf %83, %2 : vector<8x128xf32>
    %85 = math.tanh %84 : vector<8x128xf32>
    %86 = arith.truncf %85 : vector<8x128xf32> to vector<8x128xbf16>
    %c32 = arith.constant 32 : index
    %c0_73 = arith.constant 0 : index
    %87 = vector.load %arg10[%c32, %c0_73] : memref<128x128xbf16, #tpu.memory_space<vmem>>, vector<8x128xbf16>
    tpu.vector_store %arg10[%c32, %c0_73], %86 {strides = array<i32>} : memref<128x128xbf16, #tpu.memory_space<vmem>>, vector<8x128xbf16>,
    %c5 = arith.constant 5 : index
    %c0_74 = arith.constant 0 : index
    %c0_75 = arith.constant 0 : index
    %88 = vector.load %arg1[%c5, %c0_74, %c0_75] : memref<16x8x128xf32, #tpu.memory_space<vmem>>, vector<1x8x128xf32>
    %89 = vector.shape_cast %88 : vector<1x8x128xf32> to vector<8x128xf32>
    %c0_76 = arith.constant 0 : index
    %c0_77 = arith.constant 0 : index
    %90 = vector.load %arg2[%c0_76, %c0_77] : memref<128x128xf32, #tpu.memory_space<vmem>>, vector<128x128xf32>
    %cst_78 = arith.constant dense<0.000000e+00> : vector<8x128xf32>
    %91 = tpu.matmul %78, %90, %cst_78 {dimension_numbers = #tpu.dot_dimension_numbers<[1], [0], [0], [1], [0, 0, 1, 1], [], []>} : vector<8x128xf32>, vector<128x128xf32>, vector<8x128xf32> -> vector<8x128xf32>
    %92 = arith.addf %89, %91 : vector<8x128xf32>
    %93 = math.tanh %92 : vector<8x128xf32>
    %c0_79 = arith.constant 0 : index
    %c0_80 = arith.constant 0 : index
    %94 = vector.load %arg3[%c0_79, %c0_80] : memref<128x128xf32, #tpu.memory_space<vmem>>, vector<128x128xf32>
    %cst_81 = arith.constant dense<0.000000e+00> : vector<8x128xf32>
    %95 = tpu.matmul %93, %94, %cst_81 {dimension_numbers = #tpu.dot_dimension_numbers<[1], [0], [0], [1], [0, 0, 1, 1], [], []>} : vector<8x128xf32>, vector<128x128xf32>, vector<8x128xf32> -> vector<8x128xf32>
    %c0_82 = arith.constant 0 : index
    %c0_83 = arith.constant 0 : index
    %96 = vector.load %arg4[%c0_82, %c0_83] : memref<128x128xf32, #tpu.memory_space<vmem>>, vector<128x128xf32>
    %cst_84 = arith.constant dense<0.000000e+00> : vector<8x128xf32>
    %97 = tpu.matmul %85, %96, %cst_84 {dimension_numbers = #tpu.dot_dimension_numbers<[1], [0], [0], [1], [0, 0, 1, 1], [], []>} : vector<8x128xf32>, vector<128x128xf32>, vector<8x128xf32> -> vector<8x128xf32>
    %98 = arith.addf %95, %97 : vector<8x128xf32>
    %99 = arith.addf %98, %2 : vector<8x128xf32>
    %100 = math.tanh %99 : vector<8x128xf32>
    %101 = arith.truncf %100 : vector<8x128xf32> to vector<8x128xbf16>
    %c40 = arith.constant 40 : index
    %c0_85 = arith.constant 0 : index
    %102 = vector.load %arg10[%c40, %c0_85] : memref<128x128xbf16, #tpu.memory_space<vmem>>, vector<8x128xbf16>
    tpu.vector_store %arg10[%c40, %c0_85], %101 {strides = array<i32>} : memref<128x128xbf16, #tpu.memory_space<vmem>>, vector<8x128xbf16>,
    %c6 = arith.constant 6 : index
    %c0_86 = arith.constant 0 : index
    %c0_87 = arith.constant 0 : index
    %103 = vector.load %arg1[%c6, %c0_86, %c0_87] : memref<16x8x128xf32, #tpu.memory_space<vmem>>, vector<1x8x128xf32>
    %104 = vector.shape_cast %103 : vector<1x8x128xf32> to vector<8x128xf32>
    %c0_88 = arith.constant 0 : index
    %c0_89 = arith.constant 0 : index
    %105 = vector.load %arg2[%c0_88, %c0_89] : memref<128x128xf32, #tpu.memory_space<vmem>>, vector<128x128xf32>
    %cst_90 = arith.constant dense<0.000000e+00> : vector<8x128xf32>
    %106 = tpu.matmul %93, %105, %cst_90 {dimension_numbers = #tpu.dot_dimension_numbers<[1], [0], [0], [1], [0, 0, 1, 1], [], []>} : vector<8x128xf32>, vector<128x128xf32>, vector<8x128xf32> -> vector<8x128xf32>
    %107 = arith.addf %104, %106 : vector<8x128xf32>
    %108 = math.tanh %107 : vector<8x128xf32>
    %c0_91 = arith.constant 0 : index
    %c0_92 = arith.constant 0 : index
    %109 = vector.load %arg3[%c0_91, %c0_92] : memref<128x128xf32, #tpu.memory_space<vmem>>, vector<128x128xf32>
    %cst_93 = arith.constant dense<0.000000e+00> : vector<8x128xf32>
    %110 = tpu.matmul %108, %109, %cst_93 {dimension_numbers = #tpu.dot_dimension_numbers<[1], [0], [0], [1], [0, 0, 1, 1], [], []>} : vector<8x128xf32>, vector<128x128xf32>, vector<8x128xf32> -> vector<8x128xf32>
    %c0_94 = arith.constant 0 : index
    %c0_95 = arith.constant 0 : index
    %111 = vector.load %arg4[%c0_94, %c0_95] : memref<128x128xf32, #tpu.memory_space<vmem>>, vector<128x128xf32>
    %cst_96 = arith.constant dense<0.000000e+00> : vector<8x128xf32>
    %112 = tpu.matmul %100, %111, %cst_96 {dimension_numbers = #tpu.dot_dimension_numbers<[1], [0], [0], [1], [0, 0, 1, 1], [], []>} : vector<8x128xf32>, vector<128x128xf32>, vector<8x128xf32> -> vector<8x128xf32>
    %113 = arith.addf %110, %112 : vector<8x128xf32>
    %114 = arith.addf %113, %2 : vector<8x128xf32>
    %115 = math.tanh %114 : vector<8x128xf32>
    %116 = arith.truncf %115 : vector<8x128xf32> to vector<8x128xbf16>
    %c48 = arith.constant 48 : index
    %c0_97 = arith.constant 0 : index
    %117 = vector.load %arg10[%c48, %c0_97] : memref<128x128xbf16, #tpu.memory_space<vmem>>, vector<8x128xbf16>
    tpu.vector_store %arg10[%c48, %c0_97], %116 {strides = array<i32>} : memref<128x128xbf16, #tpu.memory_space<vmem>>, vector<8x128xbf16>,
    %c7 = arith.constant 7 : index
    %c0_98 = arith.constant 0 : index
    %c0_99 = arith.constant 0 : index
    %118 = vector.load %arg1[%c7, %c0_98, %c0_99] : memref<16x8x128xf32, #tpu.memory_space<vmem>>, vector<1x8x128xf32>
    %119 = vector.shape_cast %118 : vector<1x8x128xf32> to vector<8x128xf32>
    %c0_100 = arith.constant 0 : index
    %c0_101 = arith.constant 0 : index
    %120 = vector.load %arg2[%c0_100, %c0_101] : memref<128x128xf32, #tpu.memory_space<vmem>>, vector<128x128xf32>
    %cst_102 = arith.constant dense<0.000000e+00> : vector<8x128xf32>
    %121 = tpu.matmul %108, %120, %cst_102 {dimension_numbers = #tpu.dot_dimension_numbers<[1], [0], [0], [1], [0, 0, 1, 1], [], []>} : vector<8x128xf32>, vector<128x128xf32>, vector<8x128xf32> -> vector<8x128xf32>
    %122 = arith.addf %119, %121 : vector<8x128xf32>
    %123 = math.tanh %122 : vector<8x128xf32>
    %c0_103 = arith.constant 0 : index
    %c0_104 = arith.constant 0 : index
    %124 = vector.load %arg3[%c0_103, %c0_104] : memref<128x128xf32, #tpu.memory_space<vmem>>, vector<128x128xf32>
    %cst_105 = arith.constant dense<0.000000e+00> : vector<8x128xf32>
    %125 = tpu.matmul %123, %124, %cst_105 {dimension_numbers = #tpu.dot_dimension_numbers<[1], [0], [0], [1], [0, 0, 1, 1], [], []>} : vector<8x128xf32>, vector<128x128xf32>, vector<8x128xf32> -> vector<8x128xf32>
    %c0_106 = arith.constant 0 : index
    %c0_107 = arith.constant 0 : index
    %126 = vector.load %arg4[%c0_106, %c0_107] : memref<128x128xf32, #tpu.memory_space<vmem>>, vector<128x128xf32>
    %cst_108 = arith.constant dense<0.000000e+00> : vector<8x128xf32>
    %127 = tpu.matmul %115, %126, %cst_108 {dimension_numbers = #tpu.dot_dimension_numbers<[1], [0], [0], [1], [0, 0, 1, 1], [], []>} : vector<8x128xf32>, vector<128x128xf32>, vector<8x128xf32> -> vector<8x128xf32>
    %128 = arith.addf %125, %127 : vector<8x128xf32>
    %129 = arith.addf %128, %2 : vector<8x128xf32>
    %130 = math.tanh %129 : vector<8x128xf32>
    %131 = arith.truncf %130 : vector<8x128xf32> to vector<8x128xbf16>
    %c56 = arith.constant 56 : index
    %c0_109 = arith.constant 0 : index
    %132 = vector.load %arg10[%c56, %c0_109] : memref<128x128xbf16, #tpu.memory_space<vmem>>, vector<8x128xbf16>
    tpu.vector_store %arg10[%c56, %c0_109], %131 {strides = array<i32>} : memref<128x128xbf16, #tpu.memory_space<vmem>>, vector<8x128xbf16>,
    %c32_110 = arith.constant 32 : index
    %c0_111 = arith.constant 0 : index
    %133 = vector.load %arg10[%c32_110, %c0_111] : memref<128x128xbf16, #tpu.memory_space<vmem>>, vector<32x128xbf16>
    %c0_112 = arith.constant 0 : index
    %c0_113 = arith.constant 0 : index
    %134 = vector.load %arg6[%c0_112, %c0_113] : memref<128x128xbf16, #tpu.memory_space<vmem>>, vector<128x128xbf16>
    %cst_114 = arith.constant dense<0.000000e+00> : vector<32x128xf32>
    %135 = tpu.matmul %133, %134, %cst_114 {dimension_numbers = #tpu.dot_dimension_numbers<[1], [0], [0], [1], [0, 0, 1, 1], [], []>} : vector<32x128xbf16>, vector<128x128xbf16>, vector<32x128xf32> -> vector<32x128xf32>
    %136 = vector.broadcast %3 : vector<1x128xf32> to vector<32x128xf32>
    %137 = arith.addf %135, %136 : vector<32x128xf32>
    %138 = vector.shape_cast %137 : vector<32x128xf32> to vector<4x8x128xf32>
    %c4_115 = arith.constant 4 : index
    %c0_116 = arith.constant 0 : index
    %c0_117 = arith.constant 0 : index
    %139 = vector.load %arg8[%c4_115, %c0_116, %c0_117] : memref<16x8x128xf32, #tpu.memory_space<vmem>>, vector<4x8x128xf32>
    tpu.vector_store %arg8[%c4_115, %c0_116, %c0_117], %138 {strides = array<i32>} : memref<16x8x128xf32, #tpu.memory_space<vmem>>, vector<4x8x128xf32>,
    %c8_118 = arith.constant 8 : index
    %c0_119 = arith.constant 0 : index
    %c0_120 = arith.constant 0 : index
    %140 = vector.load %arg1[%c8_118, %c0_119, %c0_120] : memref<16x8x128xf32, #tpu.memory_space<vmem>>, vector<1x8x128xf32>
    %141 = vector.shape_cast %140 : vector<1x8x128xf32> to vector<8x128xf32>
    %c0_121 = arith.constant 0 : index
    %c0_122 = arith.constant 0 : index
    %142 = vector.load %arg2[%c0_121, %c0_122] : memref<128x128xf32, #tpu.memory_space<vmem>>, vector<128x128xf32>
    %cst_123 = arith.constant dense<0.000000e+00> : vector<8x128xf32>
    %143 = tpu.matmul %123, %142, %cst_123 {dimension_numbers = #tpu.dot_dimension_numbers<[1], [0], [0], [1], [0, 0, 1, 1], [], []>} : vector<8x128xf32>, vector<128x128xf32>, vector<8x128xf32> -> vector<8x128xf32>
    %144 = arith.addf %141, %143 : vector<8x128xf32>
    %145 = math.tanh %144 : vector<8x128xf32>
    %c0_124 = arith.constant 0 : index
    %c0_125 = arith.constant 0 : index
    %146 = vector.load %arg3[%c0_124, %c0_125] : memref<128x128xf32, #tpu.memory_space<vmem>>, vector<128x128xf32>
    %cst_126 = arith.constant dense<0.000000e+00> : vector<8x128xf32>
    %147 = tpu.matmul %145, %146, %cst_126 {dimension_numbers = #tpu.dot_dimension_numbers<[1], [0], [0], [1], [0, 0, 1, 1], [], []>} : vector<8x128xf32>, vector<128x128xf32>, vector<8x128xf32> -> vector<8x128xf32>
    %c0_127 = arith.constant 0 : index
    %c0_128 = arith.constant 0 : index
    %148 = vector.load %arg4[%c0_127, %c0_128] : memref<128x128xf32, #tpu.memory_space<vmem>>, vector<128x128xf32>
    %cst_129 = arith.constant dense<0.000000e+00> : vector<8x128xf32>
    %149 = tpu.matmul %130, %148, %cst_129 {dimension_numbers = #tpu.dot_dimension_numbers<[1], [0], [0], [1], [0, 0, 1, 1], [], []>} : vector<8x128xf32>, vector<128x128xf32>, vector<8x128xf32> -> vector<8x128xf32>
    %150 = arith.addf %147, %149 : vector<8x128xf32>
    %151 = arith.addf %150, %2 : vector<8x128xf32>
    %152 = math.tanh %151 : vector<8x128xf32>
    %153 = arith.truncf %152 : vector<8x128xf32> to vector<8x128xbf16>
    %c64 = arith.constant 64 : index
    %c0_130 = arith.constant 0 : index
    %154 = vector.load %arg10[%c64, %c0_130] : memref<128x128xbf16, #tpu.memory_space<vmem>>, vector<8x128xbf16>
    tpu.vector_store %arg10[%c64, %c0_130], %153 {strides = array<i32>} : memref<128x128xbf16, #tpu.memory_space<vmem>>, vector<8x128xbf16>,
    %c9 = arith.constant 9 : index
    %c0_131 = arith.constant 0 : index
    %c0_132 = arith.constant 0 : index
    %155 = vector.load %arg1[%c9, %c0_131, %c0_132] : memref<16x8x128xf32, #tpu.memory_space<vmem>>, vector<1x8x128xf32>
    %156 = vector.shape_cast %155 : vector<1x8x128xf32> to vector<8x128xf32>
    %c0_133 = arith.constant 0 : index
    %c0_134 = arith.constant 0 : index
    %157 = vector.load %arg2[%c0_133, %c0_134] : memref<128x128xf32, #tpu.memory_space<vmem>>, vector<128x128xf32>
    %cst_135 = arith.constant dense<0.000000e+00> : vector<8x128xf32>
    %158 = tpu.matmul %145, %157, %cst_135 {dimension_numbers = #tpu.dot_dimension_numbers<[1], [0], [0], [1], [0, 0, 1, 1], [], []>} : vector<8x128xf32>, vector<128x128xf32>, vector<8x128xf32> -> vector<8x128xf32>
    %159 = arith.addf %156, %158 : vector<8x128xf32>
    %160 = math.tanh %159 : vector<8x128xf32>
    %c0_136 = arith.constant 0 : index
    %c0_137 = arith.constant 0 : index
    %161 = vector.load %arg3[%c0_136, %c0_137] : memref<128x128xf32, #tpu.memory_space<vmem>>, vector<128x128xf32>
    %cst_138 = arith.constant dense<0.000000e+00> : vector<8x128xf32>
    %162 = tpu.matmul %160, %161, %cst_138 {dimension_numbers = #tpu.dot_dimension_numbers<[1], [0], [0], [1], [0, 0, 1, 1], [], []>} : vector<8x128xf32>, vector<128x128xf32>, vector<8x128xf32> -> vector<8x128xf32>
    %c0_139 = arith.constant 0 : index
    %c0_140 = arith.constant 0 : index
    %163 = vector.load %arg4[%c0_139, %c0_140] : memref<128x128xf32, #tpu.memory_space<vmem>>, vector<128x128xf32>
    %cst_141 = arith.constant dense<0.000000e+00> : vector<8x128xf32>
    %164 = tpu.matmul %152, %163, %cst_141 {dimension_numbers = #tpu.dot_dimension_numbers<[1], [0], [0], [1], [0, 0, 1, 1], [], []>} : vector<8x128xf32>, vector<128x128xf32>, vector<8x128xf32> -> vector<8x128xf32>
    %165 = arith.addf %162, %164 : vector<8x128xf32>
    %166 = arith.addf %165, %2 : vector<8x128xf32>
    %167 = math.tanh %166 : vector<8x128xf32>
    %168 = arith.truncf %167 : vector<8x128xf32> to vector<8x128xbf16>
    %c72 = arith.constant 72 : index
    %c0_142 = arith.constant 0 : index
    %169 = vector.load %arg10[%c72, %c0_142] : memref<128x128xbf16, #tpu.memory_space<vmem>>, vector<8x128xbf16>
    tpu.vector_store %arg10[%c72, %c0_142], %168 {strides = array<i32>} : memref<128x128xbf16, #tpu.memory_space<vmem>>, vector<8x128xbf16>,
    %c10 = arith.constant 10 : index
    %c0_143 = arith.constant 0 : index
    %c0_144 = arith.constant 0 : index
    %170 = vector.load %arg1[%c10, %c0_143, %c0_144] : memref<16x8x128xf32, #tpu.memory_space<vmem>>, vector<1x8x128xf32>
    %171 = vector.shape_cast %170 : vector<1x8x128xf32> to vector<8x128xf32>
    %c0_145 = arith.constant 0 : index
    %c0_146 = arith.constant 0 : index
    %172 = vector.load %arg2[%c0_145, %c0_146] : memref<128x128xf32, #tpu.memory_space<vmem>>, vector<128x128xf32>
    %cst_147 = arith.constant dense<0.000000e+00> : vector<8x128xf32>
    %173 = tpu.matmul %160, %172, %cst_147 {dimension_numbers = #tpu.dot_dimension_numbers<[1], [0], [0], [1], [0, 0, 1, 1], [], []>} : vector<8x128xf32>, vector<128x128xf32>, vector<8x128xf32> -> vector<8x128xf32>
    %174 = arith.addf %171, %173 : vector<8x128xf32>
    %175 = math.tanh %174 : vector<8x128xf32>
    %c0_148 = arith.constant 0 : index
    %c0_149 = arith.constant 0 : index
    %176 = vector.load %arg3[%c0_148, %c0_149] : memref<128x128xf32, #tpu.memory_space<vmem>>, vector<128x128xf32>
    %cst_150 = arith.constant dense<0.000000e+00> : vector<8x128xf32>
    %177 = tpu.matmul %175, %176, %cst_150 {dimension_numbers = #tpu.dot_dimension_numbers<[1], [0], [0], [1], [0, 0, 1, 1], [], []>} : vector<8x128xf32>, vector<128x128xf32>, vector<8x128xf32> -> vector<8x128xf32>
    %c0_151 = arith.constant 0 : index
    %c0_152 = arith.constant 0 : index
    %178 = vector.load %arg4[%c0_151, %c0_152] : memref<128x128xf32, #tpu.memory_space<vmem>>, vector<128x128xf32>
    %cst_153 = arith.constant dense<0.000000e+00> : vector<8x128xf32>
    %179 = tpu.matmul %167, %178, %cst_153 {dimension_numbers = #tpu.dot_dimension_numbers<[1], [0], [0], [1], [0, 0, 1, 1], [], []>} : vector<8x128xf32>, vector<128x128xf32>, vector<8x128xf32> -> vector<8x128xf32>
    %180 = arith.addf %177, %179 : vector<8x128xf32>
    %181 = arith.addf %180, %2 : vector<8x128xf32>
    %182 = math.tanh %181 : vector<8x128xf32>
    %183 = arith.truncf %182 : vector<8x128xf32> to vector<8x128xbf16>
    %c80 = arith.constant 80 : index
    %c0_154 = arith.constant 0 : index
    %184 = vector.load %arg10[%c80, %c0_154] : memref<128x128xbf16, #tpu.memory_space<vmem>>, vector<8x128xbf16>
    tpu.vector_store %arg10[%c80, %c0_154], %183 {strides = array<i32>} : memref<128x128xbf16, #tpu.memory_space<vmem>>, vector<8x128xbf16>,
    %c11 = arith.constant 11 : index
    %c0_155 = arith.constant 0 : index
    %c0_156 = arith.constant 0 : index
    %185 = vector.load %arg1[%c11, %c0_155, %c0_156] : memref<16x8x128xf32, #tpu.memory_space<vmem>>, vector<1x8x128xf32>
    %186 = vector.shape_cast %185 : vector<1x8x128xf32> to vector<8x128xf32>
    %c0_157 = arith.constant 0 : index
    %c0_158 = arith.constant 0 : index
    %187 = vector.load %arg2[%c0_157, %c0_158] : memref<128x128xf32, #tpu.memory_space<vmem>>, vector<128x128xf32>
    %cst_159 = arith.constant dense<0.000000e+00> : vector<8x128xf32>
    %188 = tpu.matmul %175, %187, %cst_159 {dimension_numbers = #tpu.dot_dimension_numbers<[1], [0], [0], [1], [0, 0, 1, 1], [], []>} : vector<8x128xf32>, vector<128x128xf32>, vector<8x128xf32> -> vector<8x128xf32>
    %189 = arith.addf %186, %188 : vector<8x128xf32>
    %190 = math.tanh %189 : vector<8x128xf32>
    %c0_160 = arith.constant 0 : index
    %c0_161 = arith.constant 0 : index
    %191 = vector.load %arg3[%c0_160, %c0_161] : memref<128x128xf32, #tpu.memory_space<vmem>>, vector<128x128xf32>
    %cst_162 = arith.constant dense<0.000000e+00> : vector<8x128xf32>
    %192 = tpu.matmul %190, %191, %cst_162 {dimension_numbers = #tpu.dot_dimension_numbers<[1], [0], [0], [1], [0, 0, 1, 1], [], []>} : vector<8x128xf32>, vector<128x128xf32>, vector<8x128xf32> -> vector<8x128xf32>
    %c0_163 = arith.constant 0 : index
    %c0_164 = arith.constant 0 : index
    %193 = vector.load %arg4[%c0_163, %c0_164] : memref<128x128xf32, #tpu.memory_space<vmem>>, vector<128x128xf32>
    %cst_165 = arith.constant dense<0.000000e+00> : vector<8x128xf32>
    %194 = tpu.matmul %182, %193, %cst_165 {dimension_numbers = #tpu.dot_dimension_numbers<[1], [0], [0], [1], [0, 0, 1, 1], [], []>} : vector<8x128xf32>, vector<128x128xf32>, vector<8x128xf32> -> vector<8x128xf32>
    %195 = arith.addf %192, %194 : vector<8x128xf32>
    %196 = arith.addf %195, %2 : vector<8x128xf32>
    %197 = math.tanh %196 : vector<8x128xf32>
    %198 = arith.truncf %197 : vector<8x128xf32> to vector<8x128xbf16>
    %c88 = arith.constant 88 : index
    %c0_166 = arith.constant 0 : index
    %199 = vector.load %arg10[%c88, %c0_166] : memref<128x128xbf16, #tpu.memory_space<vmem>>, vector<8x128xbf16>
    tpu.vector_store %arg10[%c88, %c0_166], %198 {strides = array<i32>} : memref<128x128xbf16, #tpu.memory_space<vmem>>, vector<8x128xbf16>,
    %c64_167 = arith.constant 64 : index
    %c0_168 = arith.constant 0 : index
    %200 = vector.load %arg10[%c64_167, %c0_168] : memref<128x128xbf16, #tpu.memory_space<vmem>>, vector<32x128xbf16>
    %c0_169 = arith.constant 0 : index
    %c0_170 = arith.constant 0 : index
    %201 = vector.load %arg6[%c0_169, %c0_170] : memref<128x128xbf16, #tpu.memory_space<vmem>>, vector<128x128xbf16>
    %cst_171 = arith.constant dense<0.000000e+00> : vector<32x128xf32>
    %202 = tpu.matmul %200, %201, %cst_171 {dimension_numbers = #tpu.dot_dimension_numbers<[1], [0], [0], [1], [0, 0, 1, 1], [], []>} : vector<32x128xbf16>, vector<128x128xbf16>, vector<32x128xf32> -> vector<32x128xf32>
    %203 = vector.broadcast %3 : vector<1x128xf32> to vector<32x128xf32>
    %204 = arith.addf %202, %203 : vector<32x128xf32>
    %205 = vector.shape_cast %204 : vector<32x128xf32> to vector<4x8x128xf32>
    %c8_172 = arith.constant 8 : index
    %c0_173 = arith.constant 0 : index
    %c0_174 = arith.constant 0 : index
    %206 = vector.load %arg8[%c8_172, %c0_173, %c0_174] : memref<16x8x128xf32, #tpu.memory_space<vmem>>, vector<4x8x128xf32>
    tpu.vector_store %arg8[%c8_172, %c0_173, %c0_174], %205 {strides = array<i32>} : memref<16x8x128xf32, #tpu.memory_space<vmem>>, vector<4x8x128xf32>,
    %c12 = arith.constant 12 : index
    %c0_175 = arith.constant 0 : index
    %c0_176 = arith.constant 0 : index
    %207 = vector.load %arg1[%c12, %c0_175, %c0_176] : memref<16x8x128xf32, #tpu.memory_space<vmem>>, vector<1x8x128xf32>
    %208 = vector.shape_cast %207 : vector<1x8x128xf32> to vector<8x128xf32>
    %c0_177 = arith.constant 0 : index
    %c0_178 = arith.constant 0 : index
    %209 = vector.load %arg2[%c0_177, %c0_178] : memref<128x128xf32, #tpu.memory_space<vmem>>, vector<128x128xf32>
    %cst_179 = arith.constant dense<0.000000e+00> : vector<8x128xf32>
    %210 = tpu.matmul %190, %209, %cst_179 {dimension_numbers = #tpu.dot_dimension_numbers<[1], [0], [0], [1], [0, 0, 1, 1], [], []>} : vector<8x128xf32>, vector<128x128xf32>, vector<8x128xf32> -> vector<8x128xf32>
    %211 = arith.addf %208, %210 : vector<8x128xf32>
    %212 = math.tanh %211 : vector<8x128xf32>
    %c0_180 = arith.constant 0 : index
    %c0_181 = arith.constant 0 : index
    %213 = vector.load %arg3[%c0_180, %c0_181] : memref<128x128xf32, #tpu.memory_space<vmem>>, vector<128x128xf32>
    %cst_182 = arith.constant dense<0.000000e+00> : vector<8x128xf32>
    %214 = tpu.matmul %212, %213, %cst_182 {dimension_numbers = #tpu.dot_dimension_numbers<[1], [0], [0], [1], [0, 0, 1, 1], [], []>} : vector<8x128xf32>, vector<128x128xf32>, vector<8x128xf32> -> vector<8x128xf32>
    %c0_183 = arith.constant 0 : index
    %c0_184 = arith.constant 0 : index
    %215 = vector.load %arg4[%c0_183, %c0_184] : memref<128x128xf32, #tpu.memory_space<vmem>>, vector<128x128xf32>
    %cst_185 = arith.constant dense<0.000000e+00> : vector<8x128xf32>
    %216 = tpu.matmul %197, %215, %cst_185 {dimension_numbers = #tpu.dot_dimension_numbers<[1], [0], [0], [1], [0, 0, 1, 1], [], []>} : vector<8x128xf32>, vector<128x128xf32>, vector<8x128xf32> -> vector<8x128xf32>
    %217 = arith.addf %214, %216 : vector<8x128xf32>
    %218 = arith.addf %217, %2 : vector<8x128xf32>
    %219 = math.tanh %218 : vector<8x128xf32>
    %220 = arith.truncf %219 : vector<8x128xf32> to vector<8x128xbf16>
    %c96 = arith.constant 96 : index
    %c0_186 = arith.constant 0 : index
    %221 = vector.load %arg10[%c96, %c0_186] : memref<128x128xbf16, #tpu.memory_space<vmem>>, vector<8x128xbf16>
    tpu.vector_store %arg10[%c96, %c0_186], %220 {strides = array<i32>} : memref<128x128xbf16, #tpu.memory_space<vmem>>, vector<8x128xbf16>,
    %c13 = arith.constant 13 : index
    %c0_187 = arith.constant 0 : index
    %c0_188 = arith.constant 0 : index
    %222 = vector.load %arg1[%c13, %c0_187, %c0_188] : memref<16x8x128xf32, #tpu.memory_space<vmem>>, vector<1x8x128xf32>
    %223 = vector.shape_cast %222 : vector<1x8x128xf32> to vector<8x128xf32>
    %c0_189 = arith.constant 0 : index
    %c0_190 = arith.constant 0 : index
    %224 = vector.load %arg2[%c0_189, %c0_190] : memref<128x128xf32, #tpu.memory_space<vmem>>, vector<128x128xf32>
    %cst_191 = arith.constant dense<0.000000e+00> : vector<8x128xf32>
    %225 = tpu.matmul %212, %224, %cst_191 {dimension_numbers = #tpu.dot_dimension_numbers<[1], [0], [0], [1], [0, 0, 1, 1], [], []>} : vector<8x128xf32>, vector<128x128xf32>, vector<8x128xf32> -> vector<8x128xf32>
    %226 = arith.addf %223, %225 : vector<8x128xf32>
    %227 = math.tanh %226 : vector<8x128xf32>
    %c0_192 = arith.constant 0 : index
    %c0_193 = arith.constant 0 : index
    %228 = vector.load %arg3[%c0_192, %c0_193] : memref<128x128xf32, #tpu.memory_space<vmem>>, vector<128x128xf32>
    %cst_194 = arith.constant dense<0.000000e+00> : vector<8x128xf32>
    %229 = tpu.matmul %227, %228, %cst_194 {dimension_numbers = #tpu.dot_dimension_numbers<[1], [0], [0], [1], [0, 0, 1, 1], [], []>} : vector<8x128xf32>, vector<128x128xf32>, vector<8x128xf32> -> vector<8x128xf32>
    %c0_195 = arith.constant 0 : index
    %c0_196 = arith.constant 0 : index
    %230 = vector.load %arg4[%c0_195, %c0_196] : memref<128x128xf32, #tpu.memory_space<vmem>>, vector<128x128xf32>
    %cst_197 = arith.constant dense<0.000000e+00> : vector<8x128xf32>
    %231 = tpu.matmul %219, %230, %cst_197 {dimension_numbers = #tpu.dot_dimension_numbers<[1], [0], [0], [1], [0, 0, 1, 1], [], []>} : vector<8x128xf32>, vector<128x128xf32>, vector<8x128xf32> -> vector<8x128xf32>
    %232 = arith.addf %229, %231 : vector<8x128xf32>
    %233 = arith.addf %232, %2 : vector<8x128xf32>
    %234 = math.tanh %233 : vector<8x128xf32>
    %235 = arith.truncf %234 : vector<8x128xf32> to vector<8x128xbf16>
    %c104 = arith.constant 104 : index
    %c0_198 = arith.constant 0 : index
    %236 = vector.load %arg10[%c104, %c0_198] : memref<128x128xbf16, #tpu.memory_space<vmem>>, vector<8x128xbf16>
    tpu.vector_store %arg10[%c104, %c0_198], %235 {strides = array<i32>} : memref<128x128xbf16, #tpu.memory_space<vmem>>, vector<8x128xbf16>,
    %c14 = arith.constant 14 : index
    %c0_199 = arith.constant 0 : index
    %c0_200 = arith.constant 0 : index
    %237 = vector.load %arg1[%c14, %c0_199, %c0_200] : memref<16x8x128xf32, #tpu.memory_space<vmem>>, vector<1x8x128xf32>
    %238 = vector.shape_cast %237 : vector<1x8x128xf32> to vector<8x128xf32>
    %c0_201 = arith.constant 0 : index
    %c0_202 = arith.constant 0 : index
    %239 = vector.load %arg2[%c0_201, %c0_202] : memref<128x128xf32, #tpu.memory_space<vmem>>, vector<128x128xf32>
    %cst_203 = arith.constant dense<0.000000e+00> : vector<8x128xf32>
    %240 = tpu.matmul %227, %239, %cst_203 {dimension_numbers = #tpu.dot_dimension_numbers<[1], [0], [0], [1], [0, 0, 1, 1], [], []>} : vector<8x128xf32>, vector<128x128xf32>, vector<8x128xf32> -> vector<8x128xf32>
    %241 = arith.addf %238, %240 : vector<8x128xf32>
    %242 = math.tanh %241 : vector<8x128xf32>
    %c0_204 = arith.constant 0 : index
    %c0_205 = arith.constant 0 : index
    %243 = vector.load %arg3[%c0_204, %c0_205] : memref<128x128xf32, #tpu.memory_space<vmem>>, vector<128x128xf32>
    %cst_206 = arith.constant dense<0.000000e+00> : vector<8x128xf32>
    %244 = tpu.matmul %242, %243, %cst_206 {dimension_numbers = #tpu.dot_dimension_numbers<[1], [0], [0], [1], [0, 0, 1, 1], [], []>} : vector<8x128xf32>, vector<128x128xf32>, vector<8x128xf32> -> vector<8x128xf32>
    %c0_207 = arith.constant 0 : index
    %c0_208 = arith.constant 0 : index
    %245 = vector.load %arg4[%c0_207, %c0_208] : memref<128x128xf32, #tpu.memory_space<vmem>>, vector<128x128xf32>
    %cst_209 = arith.constant dense<0.000000e+00> : vector<8x128xf32>
    %246 = tpu.matmul %234, %245, %cst_209 {dimension_numbers = #tpu.dot_dimension_numbers<[1], [0], [0], [1], [0, 0, 1, 1], [], []>} : vector<8x128xf32>, vector<128x128xf32>, vector<8x128xf32> -> vector<8x128xf32>
    %247 = arith.addf %244, %246 : vector<8x128xf32>
    %248 = arith.addf %247, %2 : vector<8x128xf32>
    %249 = math.tanh %248 : vector<8x128xf32>
    %250 = arith.truncf %249 : vector<8x128xf32> to vector<8x128xbf16>
    %c112 = arith.constant 112 : index
    %c0_210 = arith.constant 0 : index
    %251 = vector.load %arg10[%c112, %c0_210] : memref<128x128xbf16, #tpu.memory_space<vmem>>, vector<8x128xbf16>
    tpu.vector_store %arg10[%c112, %c0_210], %250 {strides = array<i32>} : memref<128x128xbf16, #tpu.memory_space<vmem>>, vector<8x128xbf16>,
    %c15 = arith.constant 15 : index
    %c0_211 = arith.constant 0 : index
    %c0_212 = arith.constant 0 : index
    %252 = vector.load %arg1[%c15, %c0_211, %c0_212] : memref<16x8x128xf32, #tpu.memory_space<vmem>>, vector<1x8x128xf32>
    %253 = vector.shape_cast %252 : vector<1x8x128xf32> to vector<8x128xf32>
    %c0_213 = arith.constant 0 : index
    %c0_214 = arith.constant 0 : index
    %254 = vector.load %arg2[%c0_213, %c0_214] : memref<128x128xf32, #tpu.memory_space<vmem>>, vector<128x128xf32>
    %cst_215 = arith.constant dense<0.000000e+00> : vector<8x128xf32>
    %255 = tpu.matmul %242, %254, %cst_215 {dimension_numbers = #tpu.dot_dimension_numbers<[1], [0], [0], [1], [0, 0, 1, 1], [], []>} : vector<8x128xf32>, vector<128x128xf32>, vector<8x128xf32> -> vector<8x128xf32>
    %256 = arith.addf %253, %255 : vector<8x128xf32>
    %257 = math.tanh %256 : vector<8x128xf32>
    %c0_216 = arith.constant 0 : index
    %c0_217 = arith.constant 0 : index
    %258 = vector.load %arg3[%c0_216, %c0_217] : memref<128x128xf32, #tpu.memory_space<vmem>>, vector<128x128xf32>
    %cst_218 = arith.constant dense<0.000000e+00> : vector<8x128xf32>
    %259 = tpu.matmul %257, %258, %cst_218 {dimension_numbers = #tpu.dot_dimension_numbers<[1], [0], [0], [1], [0, 0, 1, 1], [], []>} : vector<8x128xf32>, vector<128x128xf32>, vector<8x128xf32> -> vector<8x128xf32>
    %c0_219 = arith.constant 0 : index
    %c0_220 = arith.constant 0 : index
    %260 = vector.load %arg4[%c0_219, %c0_220] : memref<128x128xf32, #tpu.memory_space<vmem>>, vector<128x128xf32>
    %cst_221 = arith.constant dense<0.000000e+00> : vector<8x128xf32>
    %261 = tpu.matmul %249, %260, %cst_221 {dimension_numbers = #tpu.dot_dimension_numbers<[1], [0], [0], [1], [0, 0, 1, 1], [], []>} : vector<8x128xf32>, vector<128x128xf32>, vector<8x128xf32> -> vector<8x128xf32>
    %262 = arith.addf %259, %261 : vector<8x128xf32>
    %263 = arith.addf %262, %2 : vector<8x128xf32>
    %264 = math.tanh %263 : vector<8x128xf32>
    %265 = arith.truncf %264 : vector<8x128xf32> to vector<8x128xbf16>
    %c120 = arith.constant 120 : index
    %c0_222 = arith.constant 0 : index
    %266 = vector.load %arg10[%c120, %c0_222] : memref<128x128xbf16, #tpu.memory_space<vmem>>, vector<8x128xbf16>
    tpu.vector_store %arg10[%c120, %c0_222], %265 {strides = array<i32>} : memref<128x128xbf16, #tpu.memory_space<vmem>>, vector<8x128xbf16>,
    %c96_223 = arith.constant 96 : index
    %c0_224 = arith.constant 0 : index
    %267 = vector.load %arg10[%c96_223, %c0_224] : memref<128x128xbf16, #tpu.memory_space<vmem>>, vector<32x128xbf16>
    %c0_225 = arith.constant 0 : index
    %c0_226 = arith.constant 0 : index
    %268 = vector.load %arg6[%c0_225, %c0_226] : memref<128x128xbf16, #tpu.memory_space<vmem>>, vector<128x128xbf16>
    %cst_227 = arith.constant dense<0.000000e+00> : vector<32x128xf32>
    %269 = tpu.matmul %267, %268, %cst_227 {dimension_numbers = #tpu.dot_dimension_numbers<[1], [0], [0], [1], [0, 0, 1, 1], [], []>} : vector<32x128xbf16>, vector<128x128xbf16>, vector<32x128xf32> -> vector<32x128xf32>
    %270 = vector.broadcast %3 : vector<1x128xf32> to vector<32x128xf32>
    %271 = arith.addf %269, %270 : vector<32x128xf32>
    %272 = vector.shape_cast %271 : vector<32x128xf32> to vector<4x8x128xf32>
    %c12_228 = arith.constant 12 : index
    %c0_229 = arith.constant 0 : index
    %c0_230 = arith.constant 0 : index
    %273 = vector.load %arg8[%c12_228, %c0_229, %c0_230] : memref<16x8x128xf32, #tpu.memory_space<vmem>>, vector<4x8x128xf32>
    tpu.vector_store %arg8[%c12_228, %c0_229, %c0_230], %272 {strides = array<i32>} : memref<16x8x128xf32, #tpu.memory_space<vmem>>, vector<4x8x128xf32>,
    %c0_231 = arith.constant 0 : index
    %c0_232 = arith.constant 0 : index
    %c0_233 = arith.constant 0 : index
    %274 = vector.load %arg9[%c0_231, %c0_232, %c0_233] : memref<2x8x128xf32, #tpu.memory_space<vmem>>, vector<1x8x128xf32>
    %275 = vector.shape_cast %274 : vector<1x8x128xf32> to vector<8x128xf32>
    %276 = vector.shape_cast %257 : vector<8x128xf32> to vector<1x8x128xf32>
    tpu.vector_store %arg9[%c0_231, %c0_232, %c0_233], %276 {strides = array<i32>} : memref<2x8x128xf32, #tpu.memory_space<vmem>>, vector<1x8x128xf32>,
    %c1_234 = arith.constant 1 : index
    %c0_235 = arith.constant 0 : index
    %c0_236 = arith.constant 0 : index
    %277 = vector.load %arg9[%c1_234, %c0_235, %c0_236] : memref<2x8x128xf32, #tpu.memory_space<vmem>>, vector<1x8x128xf32>
    %278 = vector.shape_cast %277 : vector<1x8x128xf32> to vector<8x128xf32>
    %279 = vector.shape_cast %264 : vector<8x128xf32> to vector<1x8x128xf32>
    tpu.vector_store %arg9[%c1_234, %c0_235, %c0_236], %279 {strides = array<i32>} : memref<2x8x128xf32, #tpu.memory_space<vmem>>, vector<1x8x128xf32>,
    return
  }
  func.func @transform_0(%arg0: i32) -> (i32, i32, i32) {
    %c0_i32 = arith.constant 0 : i32
    %c0_i32_0 = arith.constant 0 : i32
    %c0_i32_1 = arith.constant 0 : i32
    %c0_i32_2 = arith.constant 0 : i32
    return %c0_i32, %c0_i32_0, %c0_i32_1 : i32, i32, i32
  }
  func.func @transform_1(%arg0: i32) -> (i32, i32) {
    %c0_i32 = arith.constant 0 : i32
    %c0_i32_0 = arith.constant 0 : i32
    %c0_i32_1 = arith.constant 0 : i32
    return %c0_i32, %c0_i32_0 : i32, i32
  }
  func.func @transform_2(%arg0: i32) -> (i32, i32) {
    %c0_i32 = arith.constant 0 : i32
    %c0_i32_0 = arith.constant 0 : i32
    %c0_i32_1 = arith.constant 0 : i32
    return %c0_i32, %c0_i32_0 : i32, i32
  }
  func.func @transform_3(%arg0: i32) -> (i32, i32) {
    %c0_i32 = arith.constant 0 : i32
    %c0_i32_0 = arith.constant 0 : i32
    %c0_i32_1 = arith.constant 0 : i32
    return %c0_i32, %c0_i32_0 : i32, i32
  }
  func.func @transform_4(%arg0: i32) -> (i32, i32) {
    %c0_i32 = arith.constant 0 : i32
    %c0_i32_0 = arith.constant 0 : i32
    %c0_i32_1 = arith.constant 0 : i32
    return %c0_i32, %c0_i32_0 : i32, i32
  }
  func.func @transform_5(%arg0: i32) -> (i32, i32) {
    %c0_i32 = arith.constant 0 : i32
    %c0_i32_0 = arith.constant 0 : i32
    %c0_i32_1 = arith.constant 0 : i32
    return %c0_i32, %c0_i32_0 : i32, i32
  }
  func.func @transform_6(%arg0: i32) -> (i32, i32) {
    %c0_i32 = arith.constant 0 : i32
    %c0_i32_0 = arith.constant 0 : i32
    %c0_i32_1 = arith.constant 0 : i32
    return %c0_i32, %c0_i32_0 : i32, i32
  }
  func.func @transform_7(%arg0: i32) -> (i32, i32, i32) {
    %c0_i32 = arith.constant 0 : i32
    %c0_i32_0 = arith.constant 0 : i32
    %c0_i32_1 = arith.constant 0 : i32
    %c0_i32_2 = arith.constant 0 : i32
    return %c0_i32, %c0_i32_0, %c0_i32_1 : i32, i32, i32
  }
  func.func @transform_8(%arg0: i32) -> (i32, i32, i32) {
    %c0_i32 = arith.constant 0 : i32
    %c0_i32_0 = arith.constant 0 : i32
    %c0_i32_1 = arith.constant 0 : i32
    %c0_i32_2 = arith.constant 0 : i32
    return %c0_i32, %c0_i32_0, %c0_i32_1 : i32, i32, i32
  }
}

</mosaic_0001>

<bundles_post_ra>
// kernel: simple_rnn_forward.1
= control target key start
LH: loop header
LB: loop body
LE: loop exit
PB: predicated region body
PF: predicated region fallthrough
CT: control target
= control target key end

     0   :  { %14 = vsyncpa [#allocation4], 0  ;;  %v8809_v3 = vmov 0.0|0.0   ;;  %vm8810_vm0 = vmmov 0   ;;  %v8811_v6 = vmov 0.0   ;;  %s10726_s0 = inlined_call_operand.vmem [shape: f32[16,8,128], index: 0, kind: input, shape index: {}]   ;;  %s10727_s1 = inlined_call_operand.vmem [shape: f32[128,128], index: 1, kind: input, shape index: {}]   ;;  %s10728_s2 = inlined_call_operand.vmem [shape: f32[128,128], index: 2, kind: input, shape index: {}]   ;;  %s10729_s3 = inlined_call_operand.vmem [shape: f32[128,128], index: 3, kind: input, shape index: {}]   ;;  %s10730_s4 = inlined_call_operand.vmem [shape: f32[1,128], index: 4, kind: input, shape index: {}]   ;;  %s10731_s5 = inlined_call_operand.vmem [shape: bf16[128,128], index: 5, kind: input, shape index: {}]   ;;  %s10732_s6 = inlined_call_operand.vmem [shape: f32[1,128], index: 6, kind: input, shape index: {}]   ;;  %s10733_s7 = inlined_call_operand.hbm [shape: f32[16,8,128], index: 7, kind: output, shape index: {0}]   ;;  %s10734_s8 = inlined_call_operand.hbm [shape: f32[2,8,128], index: 8, kind: output, shape index: {1}]  }
   0x1   :  { %v40_v0 = vld [vmem:[%s10727_s1] sm:$0xff]  ;;  %v41_v1 = vld [vmem:[%s10727_s1 + $0x8] sm:$0xff]  ;;  %v42_v2 = vld [vmem:[%s10727_s1 + $0x10] sm:$0xff]  ;;  %7503 = vmatprep.subr.bf16.mxu0 %v8809_v3  ;;  %5775 = vmatprep.mubr.msk.f32.mxu0 %vm8810_vm0, %v8811_v6 }
   0x2   :  { %v8871_v4 = vpack.c.bf16 %v41_v1, %v40_v0  ;;  %v43_v5 = vld [vmem:[%s10727_s1 + $0x18] sm:$0xff]  ;;  %7527 = vmatprep.subr.bf16.mxu1 %v8809_v3  ;;  %5810 = vmatprep.mubr.msk.f32.mxu1 %vm8810_vm0, %v8811_v6  ;;  %v44_v8 = vld [vmem:[%s10727_s1 + $0x20] sm:$0xff]  ;;  %v45_v9 = vld [vmem:[%s10727_s1 + $0x28] sm:$0xff] }
   0x3   :  { %v8882_v7 = vpack.c.bf16 %v43_v5, %v42_v2  ;;  %v144_v10 = vld [vmem:[%s10729_s3] sm:$0xff]  ;;  %v145_v11 = vld [vmem:[%s10729_s3 + $0x8] sm:$0xff]  ;;  %v146_v13 = vld [vmem:[%s10729_s3 + $0x10] sm:$0xff]  ;;  %v8906_v15 = vpack.c.bf16 %v45_v9, %v44_v8 }
   0x4   :  { %7505 = vmatpush3.bf16.msra.mxu0 %v8871_v4  ;;  %v8897_v12 = vpack.c.bf16 %v145_v11, %v144_v10  ;;  %v147_v14 = vld [vmem:[%s10729_s3 + $0x18] sm:$0xff]  ;;  %v46_v16 = vld [vmem:[%s10727_s1 + $0x30] sm:$0xff]  ;;  %v148_v19 = vld [vmem:[%s10729_s3 + $0x20] sm:$0xff] }
   0x5   :  { %7506 = vmatprep.subr.bf16.mxu0 %v8809_v3  ;;  %v47_v17 = vld [vmem:[%s10727_s1 + $0x38] sm:$0xff]  ;;  %v8916_v18 = vpack.c.bf16 %v147_v14, %v146_v13  ;;  %v149_v20 = vld [vmem:[%s10729_s3 + $0x28] sm:$0xff]  ;;  %v48_v22 = vld [vmem:[%s10727_s1 + $0x40] sm:$0xff] }
   0x6   :  { %7529 = vmatpush3.bf16.msra.mxu1 %v8897_v12  ;;  %v8926_v21 = vpack.c.bf16 %v47_v17, %v46_v16  ;;  %v49_v23 = vld [vmem:[%s10727_s1 + $0x48] sm:$0xff]  ;;  %v8936_v24 = vpack.c.bf16 %v149_v20, %v148_v19  ;;  %v150_v25 = vld [vmem:[%s10729_s3 + $0x30] sm:$0xff]  ;;  %v151_v26 = vld [vmem:[%s10729_s3 + $0x38] sm:$0xff] }
   0x7   :  { %7530 = vmatprep.subr.bf16.mxu1 %v8809_v3  ;;  %v50_v27 = vld [vmem:[%s10727_s1 + $0x50] sm:$0xff]  ;;  %v51_v28 = vld [vmem:[%s10727_s1 + $0x58] sm:$0xff]  ;;  %v8952_v29 = vpack.c.bf16 %v49_v23, %v48_v22  ;;  %v152_v30 = vld [vmem:[%s10729_s3 + $0x40] sm:$0xff]  ;;  %v8962_v32 = vpack.c.bf16 %v151_v26, %v150_v25 }
   0x8   :  { %7508 = vmatpush3.bf16.msra.mxu0 %v8882_v7  ;;  %v153_v31 = vld [vmem:[%s10729_s3 + $0x48] sm:$0xff]  ;;  %v52_v33 = vld [vmem:[%s10727_s1 + $0x60] sm:$0xff]  ;;  %v8972_v35 = vpack.c.bf16 %v51_v28, %v50_v27  ;;  %v154_v36 = vld [vmem:[%s10729_s3 + $0x50] sm:$0xff] }
   0x9   :  { %7509 = vmatprep.subr.bf16.mxu0 %v8809_v3  ;;  %v53_v34 = vld [vmem:[%s10727_s1 + $0x68] sm:$0xff]  ;;  %v155_v37 = vld [vmem:[%s10729_s3 + $0x58] sm:$0xff]  ;;  %v8982_v38 = vpack.c.bf16 %v153_v31, %v152_v30  ;;  %v54_v39 = vld [vmem:[%s10727_s1 + $0x70] sm:$0xff] }
   0xa   :  { %7532 = vmatpush3.bf16.msra.mxu1 %v8916_v18  ;;  %v55_v40 = vld [vmem:[%s10727_s1 + $0x78] sm:$0xff]  ;;  %v8992_v41 = vpack.c.bf16 %v53_v34, %v52_v33  ;;  %v156_v42 = vld [vmem:[%s10729_s3 + $0x60] sm:$0xff]  ;;  %v157_v43 = vld [vmem:[%s10729_s3 + $0x68] sm:$0xff]  ;;  %v9002_v44 = vpack.c.bf16 %v155_v37, %v154_v36 }
   0xb   :  { %7533 = vmatprep.subr.bf16.mxu1 %v8809_v3  ;;  %v128_v45 = vld [vmem:[%s10728_s2] sm:$0xff]  ;;  %v129_v46 = vld [vmem:[%s10728_s2 + $0x8] sm:$0xff]  ;;  %v9012_v47 = vpack.c.bf16 %v55_v40, %v54_v39  ;;  %v158_v48 = vld [vmem:[%s10729_s3 + $0x70] sm:$0xff]  ;;  %v9022_v50 = vpack.c.bf16 %v157_v43, %v156_v42 }
   0xc   :  { %7511 = vmatpush3.bf16.msra.mxu0 %v8906_v15  ;;  %v159_v49 = vld [vmem:[%s10729_s3 + $0x78] sm:$0xff]  ;;  %v130_v51 = vld [vmem:[%s10728_s2 + $0x10] sm:$0xff]  ;;  %v9032_v53 = vpack.c.bf16 %v129_v46, %v128_v45 }
   0xd   :  { %7512 = vmatprep.subr.bf16.mxu0 %v8809_v3  ;;  %v131_v52 = vld [vmem:[%s10728_s2 + $0x18] sm:$0xff]  ;;  %v9035_v54 = vpack.c.bf16 %v159_v49, %v158_v48 }
   0xe   :  { %7535 = vmatpush3.bf16.msra.mxu1 %v8936_v24  ;;  %v9041_v55 = vpack.c.bf16 %v131_v52, %v130_v51 }
   0xf   :  { %7536 = vmatprep.subr.bf16.mxu1 %v8809_v3 }
  0x10   :  { %7514 = vmatpush3.bf16.msra.mxu0 %v8926_v21 }
  0x11   :  { %7515 = vmatprep.subr.bf16.mxu0 %v8809_v3 }
  0x12   :  { %7538 = vmatpush3.bf16.msra.mxu1 %v8962_v32 }
  0x13   :  { %7539 = vmatprep.subr.bf16.mxu1 %v8809_v3 }
  0x14   :  { %7517 = vmatpush3.bf16.msra.mxu0 %v8952_v29 }
  0x15   :  { %7518 = vmatprep.subr.bf16.mxu0 %v8809_v3 }
  0x16   :  { %7541 = vmatpush3.bf16.msra.mxu1 %v8982_v38 }
  0x17   :  { %7542 = vmatprep.subr.bf16.mxu1 %v8809_v3 }
  0x18   :  { %7520 = vmatpush3.bf16.msra.mxu0 %v8972_v35 }
  0x19   :  { %7521 = vmatprep.subr.bf16.mxu0 %v8809_v3 }
  0x1a   :  { %7544 = vmatpush3.bf16.msra.mxu1 %v9002_v44 }
  0x1b   :  { %7545 = vmatprep.subr.bf16.mxu1 %v8809_v3 }
  0x1c   :  { %7523 = vmatpush3.bf16.msra.mxu0 %v8992_v41 }
  0x1d   :  { %7524 = vmatprep.subr.bf16.mxu0 %v8809_v3 }
  0x1e   :  { %7547 = vmatpush3.bf16.msra.mxu1 %v9022_v50 }
  0x1f   :  { %7548 = vmatprep.subr.bf16.mxu1 %v8809_v3 }
  0x20   :  { %7526 = vmatpush3.bf16.msra.mxu0 %v9012_v47 }
  0x21   :  { %7551 = vmatprep.subr.bf16.mxu0 %v8809_v3 }
  0x23   :  { %5776 = vmatmul.mubr.f32.vlgmr.msra.gmra.mrb[0].mxu0 %v8811_v6 }
  0x24   :  { %7553 = vmatpush3.bf16.msra.mxu0 %v9032_v53  ;;  %5845 = vmatprep.mubr.msk.f32.mxu0 %vm8810_vm0, %v8811_v6 }
  0x25   :  { %15 = vsyncpa [#allocation6], 0  ;;  %7550 = vmatpush3.bf16.msra.mxu1 %v9035_v54  ;;  %7554 = vmatprep.subr.bf16.mxu0 %v8809_v3  ;;  %v132_v56 = vld [vmem:[%s10728_s2 + $0x20] sm:$0xff]  ;;  %v133_v57 = vld [vmem:[%s10728_s2 + $0x28] sm:$0xff] }
  0x26   :  { %7575 = vmatprep.subr.bf16.mxu1 %v8809_v3  ;;  %v9056_v58 = vpack.c.bf16 %v133_v57, %v132_v56  ;;  %v134_v59 = vld [vmem:[%s10728_s2 + $0x30] sm:$0xff]  ;;  %v135_v60 = vld [vmem:[%s10728_s2 + $0x38] sm:$0xff]  ;;  %v136_v62 = vld [vmem:[%s10728_s2 + $0x40] sm:$0xff] }
  0x27   :  { %v9070_v61 = vpack.c.bf16 %v135_v60, %v134_v59  ;;  %v137_v63 = vld [vmem:[%s10728_s2 + $0x48] sm:$0xff]  ;;  %v138_v1 = vld [vmem:[%s10728_s2 + $0x50] sm:$0xff]  ;;  %v139_v2 = vld [vmem:[%s10728_s2 + $0x58] sm:$0xff] }
  0x28   :  { %5811 = vmatmul.mubr.f32.vlgmr.msra.gmra.mrb[0].mxu1 %v8811_v6  ;;  %7556 = vmatpush3.bf16.msra.mxu0 %v9041_v55  ;;  %v9082_v0 = vpack.c.bf16 %v137_v63, %v136_v62  ;;  %v9105_v5 = vpack.c.bf16 %v139_v2, %v138_v1  ;;  %v140_v8 = vld [vmem:[%s10728_s2 + $0x60] sm:$0xff]  ;;  %v141_v9 = vld [vmem:[%s10728_s2 + $0x68] sm:$0xff]  ;;  %v142_v11 = vld [vmem:[%s10728_s2 + $0x70] sm:$0xff] }
  0x29   :  { %7577 = vmatpush3.bf16.msra.mxu1 %v8871_v4  ;;  %7557 = vmatprep.subr.bf16.mxu0 %v8809_v3  ;;  %v9115_v10 = vpack.c.bf16 %v141_v9, %v140_v8  ;;  %v143_v13 = vld [vmem:[%s10728_s2 + $0x78] sm:$0xff]  ;;  %v39_v16 = vld [vmem:[%s10726_s0] sm:$0xff]  ;;  %v4839_v26 = vld [vmem:[%s10726_s0 + $0x8] sm:$0xff] }
  0x2a   :  { %7578 = vmatprep.subr.bf16.mxu1 %v8809_v3  ;;  %5880 = vmatprep.mubr.msk.f32.mxu1 %vm8810_vm0, %v8811_v6  ;;  %v9124_v14 = vpack.c.bf16 %v143_v13, %v142_v11  ;;  %v9174_v27 = vld [vmem:[%s10730_s4] ss:$0 sm:$0xff]  ;;  %v8663_v1 = vld [vmem:[%s10731_s5 + $0x8] sm:$0xff]   ;;  %v1242_v11 = vld [vmem:[%s10727_s1 + $0x38] sm:$0xff] }
  0x2b   :  { %v1240_v8 = vld [vmem:[%s10727_s1 + $0x28] sm:$0xff] }
  0x2c   :  { %7559 = vmatpush3.bf16.msra.mxu0 %v9056_v58 }
  0x2d   :  { %7580 = vmatpush3.bf16.msra.mxu1 %v8882_v7  ;;  %7560 = vmatprep.subr.bf16.mxu0 %v8809_v3 }
  0x2e   :  { %7581 = vmatprep.subr.bf16.mxu1 %v8809_v3 }
  0x30   :  { %7562 = vmatpush3.bf16.msra.mxu0 %v9070_v61 }
  0x31   :  { %7583 = vmatpush3.bf16.msra.mxu1 %v8906_v15  ;;  %7563 = vmatprep.subr.bf16.mxu0 %v8809_v3 }
  0x32   :  { %7584 = vmatprep.subr.bf16.mxu1 %v8809_v3 }
  0x34   :  { %7565 = vmatpush3.bf16.msra.mxu0 %v9082_v0 }
  0x35   :  { %7586 = vmatpush3.bf16.msra.mxu1 %v8926_v21  ;;  %7566 = vmatprep.subr.bf16.mxu0 %v8809_v3 }
  0x36   :  { %7587 = vmatprep.subr.bf16.mxu1 %v8809_v3 }
  0x38   :  { %7568 = vmatpush3.bf16.msra.mxu0 %v9105_v5 }
  0x39   :  { %7589 = vmatpush3.bf16.msra.mxu1 %v8952_v29  ;;  %7569 = vmatprep.subr.bf16.mxu0 %v8809_v3 }
  0x3a   :  { %7590 = vmatprep.subr.bf16.mxu1 %v8809_v3 }
  0x3c   :  { %7571 = vmatpush3.bf16.msra.mxu0 %v9115_v10 }
  0x3d   :  { %7592 = vmatpush3.bf16.msra.mxu1 %v8972_v35  ;;  %7572 = vmatprep.subr.bf16.mxu0 %v8809_v3 }
  0x3e   :  { %7593 = vmatprep.subr.bf16.mxu1 %v8809_v3 }
  0x40   :  { %7574 = vmatpush3.bf16.msra.mxu0 %v9124_v14 }
  0x41   :  { %7595 = vmatpush3.bf16.msra.mxu1 %v8992_v41  ;;  %7599 = vmatprep.subr.bf16.mxu0 %v8809_v3 }
  0x42   :  { %7596 = vmatprep.subr.bf16.mxu1 %v8809_v3 }
  0x45   :  { %7598 = vmatpush3.bf16.msra.mxu1 %v9012_v47 }
  0x46   :  { %7623 = vmatprep.subr.bf16.mxu1 %v8809_v3 }
  0xf6   :  { %v122_v17 = vpop.f32.mrb[0].mxu0 }
  0xf7   :  { %v126_v19 = vadd.f32 %v122_v17, %v39_v16  ;;  %v5777_v20 = vpop.f32.mrb[1].mxu0  ;;  %v1244_v16 = vld [vmem:[%s10727_s1 + $0x48] sm:$0xff] }
  0xf8   :  { %v1246_v20 = vld [vmem:[%s10727_s1 + $0x58] sm:$0xff] }
  0xf9   :  { %8694 = vtanh.f32 %v126_v19  ;;  %v1245_v19 = vld [vmem:[%s10727_s1 + $0x50] sm:$0xff] }
  0xfb   :  { %v226_v22 = vpop.f32.mrb[0].mxu1 }
  0xfc   :  { %v5812_v23 = vpop.f32.mrb[1].mxu1 }
  0xfd   :  { %v1247_v23 = vld [vmem:[%s10727_s1 + $0x60] sm:$0xff] }
 0x103   :  { %v8695_v25 = vpop.eup %8694 }
 0x104   :  { %5846 = vmatmul.mubr.f32.vlgmr.msra.gmra.mrb[2].mxu0 %v8695_v25  ;;  %5881 = vmatmul.mubr.f32.vlgmr.msra.gmra.mrb[2].mxu1 %v8695_v25  ;;  %v1248_v25 = vld [vmem:[%s10727_s1 + $0x68] sm:$0xff] }
 0x105   :  { %7625 = vmatpush3.bf16.msra.mxu1 %v9032_v53  ;;  %7601 = vmatpush3.bf16.msra.mxu0 %v8897_v12 }
 0x106   :  { %7626 = vmatprep.subr.bf16.mxu1 %v8809_v3  ;;  %7602 = vmatprep.subr.bf16.mxu0 %v8809_v3 }
 0x107   :  { %5950 = vmatprep.mubr.msk.f32.mxu1 %vm8810_vm0, %v8811_v6  ;;  %5915 = vmatprep.mubr.msk.f32.mxu0 %vm8810_vm0, %v8811_v6 }
 0x109   :  { %7628 = vmatpush3.bf16.msra.mxu1 %v9041_v55  ;;  %7604 = vmatpush3.bf16.msra.mxu0 %v8916_v18 }
 0x10a   :  { %7629 = vmatprep.subr.bf16.mxu1 %v8809_v3  ;;  %7605 = vmatprep.subr.bf16.mxu0 %v8809_v3 }
 0x10d   :  { %7631 = vmatpush3.bf16.msra.mxu1 %v9056_v58  ;;  %7607 = vmatpush3.bf16.msra.mxu0 %v8936_v24 }
 0x10e   :  { %7632 = vmatprep.subr.bf16.mxu1 %v8809_v3  ;;  %7608 = vmatprep.subr.bf16.mxu0 %v8809_v3 }
 0x111   :  { %7634 = vmatpush3.bf16.msra.mxu1 %v9070_v61  ;;  %7610 = vmatpush3.bf16.msra.mxu0 %v8962_v32 }
 0x112   :  { %7635 = vmatprep.subr.bf16.mxu1 %v8809_v3  ;;  %7611 = vmatprep.subr.bf16.mxu0 %v8809_v3 }
 0x115   :  { %7637 = vmatpush3.bf16.msra.mxu1 %v9082_v0  ;;  %7613 = vmatpush3.bf16.msra.mxu0 %v8982_v38 }
 0x116   :  { %7638 = vmatprep.subr.bf16.mxu1 %v8809_v3  ;;  %7614 = vmatprep.subr.bf16.mxu0 %v8809_v3 }
 0x119   :  { %7640 = vmatpush3.bf16.msra.mxu1 %v9105_v5  ;;  %7616 = vmatpush3.bf16.msra.mxu0 %v9002_v44 }
 0x11a   :  { %7641 = vmatprep.subr.bf16.mxu1 %v8809_v3  ;;  %7617 = vmatprep.subr.bf16.mxu0 %v8809_v3 }
 0x11d   :  { %7643 = vmatpush3.bf16.msra.mxu1 %v9115_v10  ;;  %7619 = vmatpush3.bf16.msra.mxu0 %v9022_v50 }
 0x11e   :  { %7644 = vmatprep.subr.bf16.mxu1 %v8809_v3  ;;  %7620 = vmatprep.subr.bf16.mxu0 %v8809_v3 }
 0x121   :  { %7646 = vmatpush3.bf16.msra.mxu1 %v9124_v14  ;;  %7622 = vmatpush3.bf16.msra.mxu0 %v9035_v54 }
 0x122   :  { %7647 = vmatprep.subr.bf16.mxu0 %v8809_v3  ;;  %7671 = vmatprep.subr.bf16.mxu1 %v8809_v3 }
 0x1d7   :  { %v296_v28 = vpop.f32.mrb[2].mxu0  ;;  %v388_v30 = vpop.f32.mrb[2].mxu1 }
 0x1d8   :  { %v297_v31 = vadd.f32 %v296_v28, %v226_v22  ;;  %v392_v33 = vadd.f32 %v4839_v26, %v388_v30  ;;  %v5847_v34 = vpop.f32.mrb[3].mxu0  ;;  %v5882_v36 = vpop.f32.mrb[3].mxu1  ;;  %v9355_v22 = vpack.c.bf16 %v1246_v20, %v1245_v19  ;;  %v9365_v26 = vpack.c.bf16 %v1248_v25, %v1247_v23  ;;  %v1249_v28 = vld [vmem:[%s10727_s1 + $0x70] sm:$0xff]  ;;  %v1250_v30 = vld [vmem:[%s10727_s1 + $0x78] sm:$0xff]  ;;  %v1343_v19 = vld [vmem:[%s10729_s3 + $0x20] sm:$0xff] }
 0x1d9   :  { %v8665_v34 = vld [vmem:[%s10731_s5 + $0x18] sm:$0xff]   ;;  %v8666_v36 = vld [vmem:[%s10731_s5 + $0x20] sm:$0xff]   ;;  %v1344_v20 = vld [vmem:[%s10729_s3 + $0x28] sm:$0xff] }
 0x1da   :  { %v300_v37 = vadd.f32 %v9174_v27, %v297_v31  ;;  %8696 = vtanh.f32 %v392_v33  ;;  %v9375_v31 = vpack.c.bf16 %v1250_v30, %v1249_v28  ;;  %v8664_v33 = vld [vmem:[%s10731_s5 + $0x10] sm:$0xff]   ;;  %v9512_v30 = vpack.c.bf16 %v1344_v20, %v1343_v19 }
 0x1dc   :  { %8698 = vtanh.f32 %v300_v37  ;;  %v1323_v37 = vld [vmem:[%s10728_s2] sm:$0xff] }
 0x1e4   :  { %v8697_v39 = vpop.eup %8696 }
 0x1e5   :  { %5951 = vmatmul.mubr.f32.vlgmr.msra.gmra.mrb[4].mxu1 %v8697_v39 }
 0x1e6   :  { %v8699_v40 = vpop.eup %8698  ;;  %7673 = vmatpush3.bf16.msra.mxu1 %v8897_v12  ;;  %6020 = vmatprep.mubr.msk.f32.mxu1 %vm8810_vm0, %v8811_v6 }
 0x1e7   :  { %v302_v42 = vpack.c.bf16 %v8699_v40, %v8699_v40  ;;  %5916 = vmatmul.mubr.f32.vlgmr.msra.gmra.mrb[4].mxu0 %v8699_v40  ;;  %7674 = vmatprep.subr.bf16.mxu1 %v8809_v3 }
 0x1e8   :  { %7649 = vmatpush3.bf16.msra.mxu0 %v8871_v4  ;;  %5985 = vmatprep.mubr.msk.f32.mxu0 %vm8810_vm0, %v8811_v6 }
 0x1e9   :  { %303 = vst [vmem:[#allocation2] sm:$0xf] %v302_v42  ;;  %7650 = vmatprep.subr.bf16.mxu0 %v8809_v3  ;;  %v8667_v42 = vld [vmem:[%s10731_s5 + $0x28] sm:$0xff]  }
 0x1ea   :  { %7676 = vmatpush3.bf16.msra.mxu1 %v8916_v18 }
 0x1eb   :  { %7677 = vmatprep.subr.bf16.mxu1 %v8809_v3 }
 0x1ec   :  { %7652 = vmatpush3.bf16.msra.mxu0 %v8882_v7 }
 0x1ed   :  { %7653 = vmatprep.subr.bf16.mxu0 %v8809_v3 }
 0x1ee   :  { %7679 = vmatpush3.bf16.msra.mxu1 %v8936_v24 }
 0x1ef   :  { %7680 = vmatprep.subr.bf16.mxu1 %v8809_v3 }
 0x1f0   :  { %7655 = vmatpush3.bf16.msra.mxu0 %v8906_v15 }
 0x1f1   :  { %7656 = vmatprep.subr.bf16.mxu0 %v8809_v3 }
 0x1f2   :  { %7682 = vmatpush3.bf16.msra.mxu1 %v8962_v32 }
 0x1f3   :  { %7683 = vmatprep.subr.bf16.mxu1 %v8809_v3 }
 0x1f4   :  { %7658 = vmatpush3.bf16.msra.mxu0 %v8926_v21 }
 0x1f5   :  { %7659 = vmatprep.subr.bf16.mxu0 %v8809_v3 }
 0x1f6   :  { %7685 = vmatpush3.bf16.msra.mxu1 %v8982_v38 }
 0x1f7   :  { %7686 = vmatprep.subr.bf16.mxu1 %v8809_v3 }
 0x1f8   :  { %7661 = vmatpush3.bf16.msra.mxu0 %v8952_v29 }
 0x1f9   :  { %7662 = vmatprep.subr.bf16.mxu0 %v8809_v3 }
 0x1fa   :  { %7688 = vmatpush3.bf16.msra.mxu1 %v9002_v44 }
 0x1fb   :  { %7689 = vmatprep.subr.bf16.mxu1 %v8809_v3 }
 0x1fc   :  { %7664 = vmatpush3.bf16.msra.mxu0 %v8972_v35 }
 0x1fd   :  { %7665 = vmatprep.subr.bf16.mxu0 %v8809_v3 }
 0x1fe   :  { %7691 = vmatpush3.bf16.msra.mxu1 %v9022_v50 }
 0x1ff   :  { %7692 = vmatprep.subr.bf16.mxu1 %v8809_v3 }
 0x200   :  { %7667 = vmatpush3.bf16.msra.mxu0 %v8992_v41 }
 0x201   :  { %7668 = vmatprep.subr.bf16.mxu0 %v8809_v3 }
 0x202   :  { %7694 = vmatpush3.bf16.msra.mxu1 %v9035_v54 }
 0x203   :  { %7719 = vmatprep.subr.bf16.mxu1 %v8809_v3 }
 0x204   :  { %7670 = vmatpush3.bf16.msra.mxu0 %v9012_v47 }
 0x205   :  { %7695 = vmatprep.subr.bf16.mxu0 %v8809_v3 }
 0x207   :  { %5986 = vmatmul.mubr.f32.vlgmr.msra.gmra.mrb[6].mxu0 %v8697_v39  ;;  %v1324_v39 = vld [vmem:[%s10728_s2 + $0x8] sm:$0xff] }
 0x208   :  { %7697 = vmatpush3.bf16.msra.mxu0 %v9032_v53  ;;  %6055 = vmatprep.mubr.msk.f32.mxu0 %vm8810_vm0, %v8811_v6  ;;  %v9397_v40 = vpack.c.bf16 %v1324_v39, %v1323_v37  ;;  %v1347_v37 = vld [vmem:[%s10729_s3 + $0x40] sm:$0xff]  ;;  %v1348_v39 = vld [vmem:[%s10729_s3 + $0x48] sm:$0xff] }
 0x209   :  { %7698 = vmatprep.subr.bf16.mxu0 %v8809_v3 }
 0x20c   :  { %7700 = vmatpush3.bf16.msra.mxu0 %v9041_v55 }
 0x20d   :  { %7701 = vmatprep.subr.bf16.mxu0 %v8809_v3 }
 0x210   :  { %7703 = vmatpush3.bf16.msra.mxu0 %v9056_v58 }
 0x211   :  { %7704 = vmatprep.subr.bf16.mxu0 %v8809_v3 }
 0x214   :  { %7706 = vmatpush3.bf16.msra.mxu0 %v9070_v61 }
 0x215   :  { %7707 = vmatprep.subr.bf16.mxu0 %v8809_v3 }
 0x218   :  { %7709 = vmatpush3.bf16.msra.mxu0 %v9082_v0 }
 0x219   :  { %7710 = vmatprep.subr.bf16.mxu0 %v8809_v3 }
 0x21c   :  { %7712 = vmatpush3.bf16.msra.mxu0 %v9105_v5 }
 0x21d   :  { %7713 = vmatprep.subr.bf16.mxu0 %v8809_v3 }
 0x220   :  { %7715 = vmatpush3.bf16.msra.mxu0 %v9115_v10 }
 0x221   :  { %7716 = vmatprep.subr.bf16.mxu0 %v8809_v3 }
 0x224   :  { %7718 = vmatpush3.bf16.msra.mxu0 %v9124_v14 }
 0x225   :  { %7743 = vmatprep.subr.bf16.mxu0 %v8809_v3 }
 0x2b8   :  { %v562_v43 = vpop.f32.mrb[4].mxu1 }
 0x2b9   :  { %v5952_v45 = vpop.f32.mrb[5].mxu1 }
 0x2ba   :  { %v492_v46 = vpop.f32.mrb[4].mxu0  ;;  %v1326_v45 = vld [vmem:[%s10728_s2 + $0x18] sm:$0xff] }
 0x2bb   :  { %v563_v48 = vadd.f32 %v562_v43, %v492_v46  ;;  %v5917_v49 = vpop.f32.mrb[5].mxu0  ;;  %v1325_v43 = vld [vmem:[%s10728_s2 + $0x10] sm:$0xff] }
 0x2bc   :  { %v9410_v46 = vpack.c.bf16 %v1326_v45, %v1325_v43  ;;  %v1327_v49 = vld [vmem:[%s10728_s2 + $0x20] sm:$0xff]  ;;  %v1349_v43 = vld [vmem:[%s10729_s3 + $0x50] sm:$0xff]  ;;  %v1350_v45 = vld [vmem:[%s10729_s3 + $0x58] sm:$0xff] }
 0x2bd   :  { %v566_v51 = vadd.f32 %v9174_v27, %v563_v48  ;;  %v8668_v48 = vld [vmem:[%s10731_s5 + $0x30] sm:$0xff]  }
 0x2bf   :  { %8700 = vtanh.f32 %v566_v51  ;;  %v1328_v51 = vld [vmem:[%s10728_s2 + $0x28] sm:$0xff] }
 0x2c9   :  { %v8701_v52 = vpop.eup %8700 }
 0x2ca   :  { %v568_v56 = vpack.c.bf16 %v8701_v52, %v8701_v52  ;;  %6021 = vmatmul.mubr.f32.vlgmr.msra.gmra.mrb[6].mxu1 %v8701_v52  ;;  %v8669_v52 = vld [vmem:[%s10731_s5 + $0x38] sm:$0xff]  }
 0x2cb   :  { %7721 = vmatpush3.bf16.msra.mxu1 %v8871_v4  ;;  %6090 = vmatprep.mubr.msk.f32.mxu1 %vm8810_vm0, %v8811_v6  ;;  %v4840_v4 = vld [vmem:[%s10726_s0 + $0x10] sm:$0xff] }
 0x2cc   :  { %v570_v57 = vrot.slane %v568_v56, 4  ;;  %7722 = vmatprep.subr.bf16.mxu1 %v8809_v3  ;;  %v9426_v56 = vpack.c.bf16 %v1328_v51, %v1327_v49  ;;  %v9542_v49 = vpack.c.bf16 %v1350_v45, %v1349_v43  ;;  %v1351_v51 = vld [vmem:[%s10729_s3 + $0x60] sm:$0xff] }
 0x2ce   :  { %572 = vst [vmem:[#allocation2] sm:$0xf0] %v570_v57  ;;  %v1329_v57 = vld [vmem:[%s10728_s2 + $0x30] sm:$0xff] }
 0x2cf   :  { %7724 = vmatpush3.bf16.msra.mxu1 %v8882_v7 }
 0x2d0   :  { %7725 = vmatprep.subr.bf16.mxu1 %v8809_v3 }
 0x2d3   :  { %7727 = vmatpush3.bf16.msra.mxu1 %v8906_v15 }
 0x2d4   :  { %7728 = vmatprep.subr.bf16.mxu1 %v8809_v3 }
 0x2d7   :  { %7730 = vmatpush3.bf16.msra.mxu1 %v8926_v21 }
 0x2d8   :  { %7731 = vmatprep.subr.bf16.mxu1 %v8809_v3 }
 0x2da   :  { %v657_v59 = vpop.f32.mrb[6].mxu0 }
 0x2db   :  { %v661_v60 = vadd.f32 %v4840_v4, %v657_v59  ;;  %v5987_v62 = vpop.f32.mrb[7].mxu0  ;;  %7733 = vmatpush3.bf16.msra.mxu1 %v8952_v29  ;;  %v1330_v4 = vld [vmem:[%s10728_s2 + $0x38] sm:$0xff] }
 0x2dc   :  { %7734 = vmatprep.subr.bf16.mxu1 %v8809_v3  ;;  %v9435_v59 = vpack.c.bf16 %v1330_v4, %v1329_v57  ;;  %v1332_v62 = vld [vmem:[%s10728_s2 + $0x48] sm:$0xff]  ;;  %v1353_v4 = vld [vmem:[%s10729_s3 + $0x70] sm:$0xff] }
 0x2dd   :  { %8702 = vtanh.f32 %v661_v60  ;;  %v1331_v60 = vld [vmem:[%s10728_s2 + $0x40] sm:$0xff] }
 0x2df   :  { %7736 = vmatpush3.bf16.msra.mxu1 %v8972_v35 }
 0x2e0   :  { %7737 = vmatprep.subr.bf16.mxu1 %v8809_v3 }
 0x2e3   :  { %7739 = vmatpush3.bf16.msra.mxu1 %v8992_v41 }
 0x2e4   :  { %7740 = vmatprep.subr.bf16.mxu1 %v8809_v3 }
 0x2e7   :  { %v8703_v7 = vpop.eup %8702  ;;  %7742 = vmatpush3.bf16.msra.mxu1 %v9012_v47  ;;  %v1235_v47 = vld [vmem:[%s10727_s1] sm:$0xff] }
 0x2e8   :  { %6056 = vmatmul.mubr.f32.vlgmr.msra.gmra.mrb[8].mxu0 %v8703_v7  ;;  %7767 = vmatprep.subr.bf16.mxu1 %v8809_v3 }
 0x2e9   :  { %7745 = vmatpush3.bf16.msra.mxu0 %v8897_v12  ;;  %6125 = vmatprep.mubr.msk.f32.mxu0 %vm8810_vm0, %v8811_v6  ;;  %v8662_v12 = vld [vmem:[%s10731_s5] sm:$0xff]  }
 0x2ea   :  { %6091 = vmatmul.mubr.f32.vlgmr.msra.gmra.mrb[8].mxu1 %v8703_v7  ;;  %7746 = vmatprep.subr.bf16.mxu0 %v8809_v3  ;;  %v9447_v7 = vpack.c.bf16 %v1332_v62, %v1331_v60  ;;  %v1354_v60 = vld [vmem:[%s10729_s3 + $0x78] sm:$0xff] }
 0x2eb   :  { %7769 = vmatpush3.bf16.msra.mxu1 %v9032_v53  ;;  %6160 = vmatprep.mubr.msk.f32.mxu1 %vm8810_vm0, %v8811_v6  ;;  %v9568_v62 = vpack.c.bf16 %v1354_v60, %v1353_v4  ;;  %v2431_v60 = vld [vmem:[%s10727_s1 + $0x30] sm:$0xff] }
 0x2ec   :  { %7770 = vmatprep.subr.bf16.mxu1 %v8809_v3 }
 0x2ed   :  { %7748 = vmatpush3.bf16.msra.mxu0 %v8916_v18 }
 0x2ee   :  { %7749 = vmatprep.subr.bf16.mxu0 %v8809_v3 }
 0x2ef   :  { %7772 = vmatpush3.bf16.msra.mxu1 %v9041_v55  ;;  %v1237_v55 = vld [vmem:[%s10727_s1 + $0x10] sm:$0xff] }
 0x2f0   :  { %7773 = vmatprep.subr.bf16.mxu1 %v8809_v3 }
 0x2f1   :  { %7751 = vmatpush3.bf16.msra.mxu0 %v8936_v24  ;;  %v4841_v24 = vld [vmem:[%s10726_s0 + $0x18] sm:$0xff] }
 0x2f2   :  { %7752 = vmatprep.subr.bf16.mxu0 %v8809_v3 }
 0x2f3   :  { %7775 = vmatpush3.bf16.msra.mxu1 %v9056_v58  ;;  %v1238_v58 = vld [vmem:[%s10727_s1 + $0x18] sm:$0xff] }
 0x2f4   :  { %7776 = vmatprep.subr.bf16.mxu1 %v8809_v3  ;;  %v9313_v2 = vpack.c.bf16 %v1238_v58, %v1237_v55 }
 0x2f5   :  { %7754 = vmatpush3.bf16.msra.mxu0 %v8962_v32 }
 0x2f6   :  { %7755 = vmatprep.subr.bf16.mxu0 %v8809_v3 }
 0x2f7   :  { %7778 = vmatpush3.bf16.msra.mxu1 %v9070_v61 }
 0x2f8   :  { %7779 = vmatprep.subr.bf16.mxu1 %v8809_v3 }
 0x2f9   :  { %7757 = vmatpush3.bf16.msra.mxu0 %v8982_v38 }
 0x2fa   :  { %7758 = vmatprep.subr.bf16.mxu0 %v8809_v3 }
 0x2fb   :  { %7781 = vmatpush3.bf16.msra.mxu1 %v9082_v0  ;;  %v1108_v0 = vld [vmem:[#allocation2] sm:$0xff] }
 0x2fc   :  { %7782 = vmatprep.subr.bf16.mxu1 %v8809_v3 }
 0x2fd   :  { %7760 = vmatpush3.bf16.msra.mxu0 %v9002_v44 }
 0x2fe   :  { %7761 = vmatprep.subr.bf16.mxu0 %v8809_v3 }
 0x2ff   :  { %7784 = vmatpush3.bf16.msra.mxu1 %v9105_v5  ;;  %v1239_v5 = vld [vmem:[%s10727_s1 + $0x20] sm:$0xff] }
 0x300   :  { %7785 = vmatprep.subr.bf16.mxu1 %v8809_v3  ;;  %v9325_v9 = vpack.c.bf16 %v1240_v8, %v1239_v5  ;;  %v1341_v8 = vld [vmem:[%s10729_s3 + $0x10] sm:$0xff] }
 0x301   :  { %7763 = vmatpush3.bf16.msra.mxu0 %v9022_v50  ;;  %v1236_v50 = vld [vmem:[%s10727_s1 + $0x8] sm:$0xff] }
 0x302   :  { %7764 = vmatprep.subr.bf16.mxu0 %v8809_v3  ;;  %v9301_v53 = vpack.c.bf16 %v1236_v50, %v1235_v47 }
 0x303   :  { %7787 = vmatpush3.bf16.msra.mxu1 %v9115_v10  ;;  %v1241_v10 = vld [vmem:[%s10727_s1 + $0x30] sm:$0xff] }
 0x304   :  { %7788 = vmatprep.subr.bf16.mxu1 %v8809_v3  ;;  %v9335_v13 = vpack.c.bf16 %v1242_v11, %v1241_v10  ;;  %v1342_v10 = vld [vmem:[%s10729_s3 + $0x18] sm:$0xff] }
 0x305   :  { %7766 = vmatpush3.bf16.msra.mxu0 %v9035_v54 }
 0x306   :  { %6163 = vmatprep.subr.bf16.mxu0 %v8662_v12 }
 0x307   :  { %7790 = vmatpush3.bf16.msra.mxu1 %v9124_v14  ;;  %v1243_v14 = vld [vmem:[%s10727_s1 + $0x40] sm:$0xff] }
 0x308   :  { %7791 = vmatprep.subr.bf16.mxu1 %v8809_v3  ;;  %v9345_v17 = vpack.c.bf16 %v1244_v16, %v1243_v14  ;;  %v9497_v14 = vpack.c.bf16 %v1342_v10, %v1341_v8  ;;  %v4851_v16 = vld [vmem:[%s10726_s0 + $0x20] sm:$0xff]  ;;  %v4852_v8 = vld [vmem:[%s10726_s0 + $0x28] sm:$0xff] }
 0x39d   :  { %v761_v15 = vpop.f32.mrb[6].mxu1 }
 0x39e   :  { %v6022_v18 = vpop.f32.mrb[7].mxu1 }
 0x3bb   :  { %v831_v21 = vpop.f32.mrb[8].mxu0 }
 0x3bc   :  { %v832_v29 = vadd.f32 %v831_v21, %v761_v15  ;;  %v6057_v32 = vpop.f32.mrb[9].mxu0  ;;  %v1334_v15 = vld [vmem:[%s10728_s2 + $0x58] sm:$0xff]  ;;  %v1335_v21 = vld [vmem:[%s10728_s2 + $0x60] sm:$0xff] }
 0x3bd   :  { %v923_v35 = vpop.f32.mrb[8].mxu1  ;;  %v1337_v32 = vld [vmem:[%s10728_s2 + $0x70] sm:$0xff] }
 0x3be   :  { %v835_v38 = vadd.f32 %v9174_v27, %v832_v29  ;;  %v927_v41 = vadd.f32 %v4841_v24, %v923_v35  ;;  %v6092_v44 = vpop.f32.mrb[9].mxu1  ;;  %v1336_v24 = vld [vmem:[%s10728_s2 + $0x68] sm:$0xff]  ;;  %v1338_v35 = vld [vmem:[%s10728_s2 + $0x78] sm:$0xff] }
 0x3bf   :  { %v9467_v29 = vpack.c.bf16 %v1336_v24, %v1335_v21 }
 0x3c0   :  { %8704 = vtanh.f32 %v835_v38  ;;  %v9477_v38 = vpack.c.bf16 %v1338_v35, %v1337_v32 }
 0x3c1   :  { %8706 = vtanh.f32 %v927_v41 }
 0x3ca   :  { %v8705_v54 = vpop.eup %8704 }
 0x3cb   :  { %v8707_v61 = vpop.eup %8706  ;;  %v837_v63 = vpack.c.bf16 %v8705_v54, %v8705_v54  ;;  %6126 = vmatmul.mubr.f32.vlgmr.msra.gmra.mrb[10].mxu0 %v8705_v54 }
 0x3cc   :  { %6161 = vmatmul.mubr.f32.vlgmr.msra.gmra.mrb[10].mxu1 %v8707_v61  ;;  %6179 = vmatprep.mubr.bf16.mxu0 %v1108_v0  ;;  %v1339_v0 = vld [vmem:[%s10729_s3] sm:$0xff] }
 0x3cd   :  { %838 = vst [vmem:[#allocation2 + $0x8] sm:$0xf] %v837_v63  ;;  %7793 = vmatpush3.bf16.msra.mxu1 %v9301_v53  ;;  %6215 = vmatprep.mubr.msk.f32.mxu1 %vm8810_vm0, %v8811_v6 }
 0x3ce   :  { %7794 = vmatprep.subr.bf16.mxu1 %v8809_v3  ;;  %6164 = vmatpush3.bf16.msra.mxu0 %v8662_v12  ;;  %v1333_v12 = vld [vmem:[%s10728_s2 + $0x50] sm:$0xff] }
 0x3cf   :  { %6165 = vmatprep.subr.bf16.mxu0 %v8663_v1  ;;  %v9457_v18 = vpack.c.bf16 %v1334_v15, %v1333_v12  ;;  %v9624_v12 = vld [vmem:[%s10732_s6] ss:$0 sm:$0xff] }
 0x3d1   :  { %7796 = vmatpush3.bf16.msra.mxu1 %v9313_v2 }
 0x3d2   :  { %7797 = vmatprep.subr.bf16.mxu1 %v8809_v3  ;;  %6166 = vmatpush3.bf16.msra.mxu0 %v8663_v1  ;;  %v1340_v1 = vld [vmem:[%s10729_s3 + $0x8] sm:$0xff] }
 0x3d3   :  { %6167 = vmatprep.subr.bf16.mxu0 %v8664_v33  ;;  %v9488_v5 = vpack.c.bf16 %v1340_v1, %v1339_v0 }
 0x3d5   :  { %7799 = vmatpush3.bf16.msra.mxu1 %v9325_v9 }
 0x3d6   :  { %7800 = vmatprep.subr.bf16.mxu1 %v8809_v3  ;;  %6168 = vmatpush3.bf16.msra.mxu0 %v8664_v33  ;;  %v1345_v33 = vld [vmem:[%s10729_s3 + $0x30] sm:$0xff] }
 0x3d7   :  { %6169 = vmatprep.subr.bf16.mxu0 %v8665_v34 }
 0x3d9   :  { %7802 = vmatpush3.bf16.msra.mxu1 %v9335_v13 }
 0x3da   :  { %7803 = vmatprep.subr.bf16.mxu1 %v8809_v3  ;;  %6170 = vmatpush3.bf16.msra.mxu0 %v8665_v34  ;;  %v1346_v34 = vld [vmem:[%s10729_s3 + $0x38] sm:$0xff] }
 0x3db   :  { %6171 = vmatprep.subr.bf16.mxu0 %v8666_v36 }
 0x3dd   :  { %7805 = vmatpush3.bf16.msra.mxu1 %v9345_v17 }
 0x3de   :  { %7806 = vmatprep.subr.bf16.mxu1 %v8809_v3  ;;  %6172 = vmatpush3.bf16.msra.mxu0 %v8666_v36  ;;  %v9522_v36 = vpack.c.bf16 %v1346_v34, %v1345_v33 }
 0x3df   :  { %6173 = vmatprep.subr.bf16.mxu0 %v8667_v42 }
 0x3e1   :  { %7808 = vmatpush3.bf16.msra.mxu1 %v9355_v22 }
 0x3e2   :  { %7809 = vmatprep.subr.bf16.mxu1 %v8809_v3  ;;  %6174 = vmatpush3.bf16.msra.mxu0 %v8667_v42  ;;  %v9532_v42 = vpack.c.bf16 %v1348_v39, %v1347_v37 }
 0x3e3   :  { %6175 = vmatprep.subr.bf16.mxu0 %v8668_v48 }
 0x3e5   :  { %7811 = vmatpush3.bf16.msra.mxu1 %v9365_v26 }
 0x3e6   :  { %7812 = vmatprep.subr.bf16.mxu1 %v8809_v3  ;;  %6176 = vmatpush3.bf16.msra.mxu0 %v8668_v48 }
 0x3e7   :  { %6177 = vmatprep.subr.bf16.mxu0 %v8669_v52 }
 0x3e9   :  { %7814 = vmatpush3.bf16.msra.mxu1 %v9375_v31 }
 0x3ea   :  { %7839 = vmatprep.subr.bf16.mxu1 %v8809_v3  ;;  %6178 = vmatpush3.bf16.msra.mxu0 %v8669_v52  ;;  %v1352_v52 = vld [vmem:[%s10729_s3 + $0x68] sm:$0xff] }
 0x3eb   :  { %7815 = vmatprep.subr.bf16.mxu0 %v8809_v3  ;;  %v9556_v57 = vpack.c.bf16 %v1352_v52, %v1351_v51 }
 0x3ec   :  { %6216 = vmatmul.mubr.f32.vlgmr.msra.gmra.mrb[12].mxu1 %v8707_v61 }
 0x3ed   :  { %6285 = vmatprep.mubr.msk.f32.mxu1 %vm8810_vm0, %v8811_v6  ;;  %7841 = vmatpush3.bf16.msra.mxu1 %v9397_v40 }
 0x3ee   :  { %7842 = vmatprep.subr.bf16.mxu1 %v8809_v3 }
 0x3f1   :  { %7844 = vmatpush3.bf16.msra.mxu1 %v9410_v46 }
 0x3f2   :  { %7845 = vmatprep.subr.bf16.mxu1 %v8809_v3 }
 0x3f5   :  { %7847 = vmatpush3.bf16.msra.mxu1 %v9426_v56 }
 0x3f6   :  { %7848 = vmatprep.subr.bf16.mxu1 %v8809_v3 }
 0x3f9   :  { %7850 = vmatpush3.bf16.msra.mxu1 %v9435_v59 }
 0x3fa   :  { %7851 = vmatprep.subr.bf16.mxu1 %v8809_v3 }
 0x3fd   :  { %7853 = vmatpush3.bf16.msra.mxu1 %v9447_v7 }
 0x3fe   :  { %7854 = vmatprep.subr.bf16.mxu1 %v8809_v3 }
 0x401   :  { %7856 = vmatpush3.bf16.msra.mxu1 %v9457_v18 }
 0x402   :  { %7857 = vmatprep.subr.bf16.mxu1 %v8809_v3 }
 0x405   :  { %7859 = vmatpush3.bf16.msra.mxu1 %v9467_v29 }
 0x406   :  { %7860 = vmatprep.subr.bf16.mxu1 %v8809_v3 }
 0x409   :  { %7862 = vmatpush3.bf16.msra.mxu1 %v9477_v38 }
 0x40a   :  { %7887 = vmatprep.subr.bf16.mxu1 %v8809_v3 }
 0x49e   :  { %v1027_v41 = vpop.f32.mrb[10].mxu0 }
 0x49f   :  { %v1097_v44 = vpop.f32.mrb[10].mxu1  ;;  %v6127_v47 = vpop.f32.mrb[11].mxu0 }
 0x4a0   :  { %v1098_v50 = vadd.f32 %v1097_v44, %v1027_v41  ;;  %v6162_v54 = vpop.f32.mrb[11].mxu1 }
 0x4a2   :  { %v1101_v55 = vadd.f32 %v9174_v27, %v1098_v50 }
 0x4a4   :  { %8708 = vtanh.f32 %v1101_v55 }
 0x4ae   :  { %v8709_v58 = vpop.eup %8708 }
 0x4af   :  { %v1103_v61 = vpack.c.bf16 %v8709_v58, %v8709_v58 }
 0x4b1   :  { %v1105_v63 = vrot.slane %v1103_v61, 4 }
 0x4b3   :  { %1107 = vst [vmem:[#allocation2 + $0x8] sm:$0xf0] %v1105_v63 }
 0x4ba   :  { %v1109_v11 = vld [vmem:[#allocation2 + $0x8] sm:$0xff] }
 0x4bb   :  { %6180 = vmatmul.mubr.bf16.vlgmr.msra.gmra.mrb[12].mxu0 %v1109_v11 }
 0x4bc   :  { %7817 = vmatpush3.bf16.msra.mxu0 %v9488_v5  ;;  %6250 = vmatprep.mubr.msk.f32.mxu0 %vm8810_vm0, %v8811_v6 }
 0x4bd   :  { %7818 = vmatprep.subr.bf16.mxu0 %v8809_v3 }
 0x4bf   :  { %v1317_v23 = vpop.f32.mrb[12].mxu1 }
 0x4c0   :  { %v1321_v25 = vadd.f32 %v4851_v16, %v1317_v23  ;;  %v6217_v28 = vpop.f32.mrb[13].mxu1  ;;  %7820 = vmatpush3.bf16.msra.mxu0 %v9497_v14 }
 0x4c1   :  { %7821 = vmatprep.subr.bf16.mxu0 %v8809_v3  ;;  %v4853_v28 = vld [vmem:[%s10726_s0 + $0x30] sm:$0xff] }
 0x4c2   :  { %8710 = vtanh.f32 %v1321_v25 }
 0x4c4   :  { %7823 = vmatpush3.bf16.msra.mxu0 %v9512_v30 }
 0x4c5   :  { %7824 = vmatprep.subr.bf16.mxu0 %v8809_v3 }
 0x4c8   :  { %7826 = vmatpush3.bf16.msra.mxu0 %v9522_v36 }
 0x4c9   :  { %7827 = vmatprep.subr.bf16.mxu0 %v8809_v3 }
 0x4cc   :  { %v8711_v48 = vpop.eup %8710  ;;  %7829 = vmatpush3.bf16.msra.mxu0 %v9532_v42 }
 0x4cd   :  { %6286 = vmatmul.mubr.f32.vlgmr.msra.gmra.mrb[14].mxu1 %v8711_v48  ;;  %7830 = vmatprep.subr.bf16.mxu0 %v8809_v3 }
 0x4ce   :  { %7889 = vmatpush3.bf16.msra.mxu1 %v9488_v5  ;;  %6355 = vmatprep.mubr.msk.f32.mxu1 %vm8810_vm0, %v8811_v6 }
 0x4cf   :  { %7890 = vmatprep.subr.bf16.mxu1 %v8809_v3 }
 0x4d0   :  { %7832 = vmatpush3.bf16.msra.mxu0 %v9542_v49 }
 0x4d1   :  { %7833 = vmatprep.subr.bf16.mxu0 %v8809_v3 }
 0x4d2   :  { %7892 = vmatpush3.bf16.msra.mxu1 %v9497_v14 }
 0x4d3   :  { %7893 = vmatprep.subr.bf16.mxu1 %v8809_v3 }
 0x4d4   :  { %7835 = vmatpush3.bf16.msra.mxu0 %v9556_v57 }
 0x4d5   :  { %7836 = vmatprep.subr.bf16.mxu0 %v8809_v3 }
 0x4d6   :  { %7895 = vmatpush3.bf16.msra.mxu1 %v9512_v30 }
 0x4d7   :  { %7896 = vmatprep.subr.bf16.mxu1 %v8809_v3 }
 0x4d8   :  { %7838 = vmatpush3.bf16.msra.mxu0 %v9568_v62 }
 0x4d9   :  { %7863 = vmatprep.subr.bf16.mxu0 %v8809_v3 }
 0x4da   :  { %7898 = vmatpush3.bf16.msra.mxu1 %v9522_v36 }
 0x4db   :  { %6251 = vmatmul.mubr.f32.vlgmr.msra.gmra.mrb[16].mxu0 %v8709_v58  ;;  %7899 = vmatprep.subr.bf16.mxu1 %v8809_v3 }
 0x4dc   :  { %7865 = vmatpush3.bf16.msra.mxu0 %v9301_v53  ;;  %6320 = vmatprep.mubr.msk.f32.mxu0 %vm8810_vm0, %v8811_v6 }
 0x4dd   :  { %7866 = vmatprep.subr.bf16.mxu0 %v8809_v3 }
 0x4de   :  { %7901 = vmatpush3.bf16.msra.mxu1 %v9532_v42 }
 0x4df   :  { %7902 = vmatprep.subr.bf16.mxu1 %v8809_v3 }
 0x4e0   :  { %7868 = vmatpush3.bf16.msra.mxu0 %v9313_v2 }
 0x4e1   :  { %7869 = vmatprep.subr.bf16.mxu0 %v8809_v3 }
 0x4e2   :  { %7904 = vmatpush3.bf16.msra.mxu1 %v9542_v49 }
 0x4e3   :  { %7905 = vmatprep.subr.bf16.mxu1 %v8809_v3 }
 0x4e4   :  { %7871 = vmatpush3.bf16.msra.mxu0 %v9325_v9 }
 0x4e5   :  { %7872 = vmatprep.subr.bf16.mxu0 %v8809_v3 }
 0x4e6   :  { %7907 = vmatpush3.bf16.msra.mxu1 %v9556_v57 }
 0x4e7   :  { %7908 = vmatprep.subr.bf16.mxu1 %v8809_v3 }
 0x4e8   :  { %7874 = vmatpush3.bf16.msra.mxu0 %v9335_v13 }
 0x4e9   :  { %7875 = vmatprep.subr.bf16.mxu0 %v8809_v3 }
 0x4ea   :  { %7910 = vmatpush3.bf16.msra.mxu1 %v9568_v62 }
 0x4eb   :  { %7935 = vmatprep.subr.bf16.mxu1 %v8809_v3 }
 0x4ec   :  { %7877 = vmatpush3.bf16.msra.mxu0 %v9345_v17 }
 0x4ed   :  { %7878 = vmatprep.subr.bf16.mxu0 %v8809_v3 }
 0x4f0   :  { %7880 = vmatpush3.bf16.msra.mxu0 %v9355_v22 }
 0x4f1   :  { %7881 = vmatprep.subr.bf16.mxu0 %v8809_v3 }
 0x4f4   :  { %7883 = vmatpush3.bf16.msra.mxu0 %v9365_v26 }
 0x4f5   :  { %7884 = vmatprep.subr.bf16.mxu0 %v8809_v3 }
 0x4f8   :  { %7886 = vmatpush3.bf16.msra.mxu0 %v9375_v31 }
 0x4f9   :  { %7911 = vmatprep.subr.bf16.mxu0 %v8809_v3 }
 0x4fb   :  { %6321 = vmatmul.mubr.f32.vlgmr.msra.gmra.mrb[18].mxu0 %v8711_v48 }
 0x4fc   :  { %7913 = vmatpush3.bf16.msra.mxu0 %v9397_v40  ;;  %6390 = vmatprep.mubr.msk.f32.mxu0 %vm8810_vm0, %v8811_v6 }
 0x4fd   :  { %7914 = vmatprep.subr.bf16.mxu0 %v8809_v3 }
 0x500   :  { %7916 = vmatpush3.bf16.msra.mxu0 %v9410_v46 }
 0x501   :  { %7917 = vmatprep.subr.bf16.mxu0 %v8809_v3 }
 0x504   :  { %7919 = vmatpush3.bf16.msra.mxu0 %v9426_v56 }
 0x505   :  { %7920 = vmatprep.subr.bf16.mxu0 %v8809_v3 }
 0x508   :  { %7922 = vmatpush3.bf16.msra.mxu0 %v9435_v59 }
 0x509   :  { %7923 = vmatprep.subr.bf16.mxu0 %v8809_v3 }
 0x50c   :  { %7925 = vmatpush3.bf16.msra.mxu0 %v9447_v7 }
 0x50d   :  { %7926 = vmatprep.subr.bf16.mxu0 %v8809_v3 }
 0x510   :  { %7928 = vmatpush3.bf16.msra.mxu0 %v9457_v18 }
 0x511   :  { %7929 = vmatprep.subr.bf16.mxu0 %v8809_v3 }
 0x514   :  { %7931 = vmatpush3.bf16.msra.mxu0 %v9467_v29 }
 0x515   :  { %7932 = vmatprep.subr.bf16.mxu0 %v8809_v3 }
 0x518   :  { %7934 = vmatpush3.bf16.msra.mxu0 %v9477_v38 }
 0x519   :  { %7959 = vmatprep.subr.bf16.mxu0 %v8809_v3 }
 0x58e   :  { %v6181_v15 = vpop.f32.mrb[12].mxu0 }
 0x58f   :  { %v1223_v21 = vadd.f32 %v6181_v15, %v9624_v12  ;;  %v1214_v24 = vpop.f32.mrb[13].mxu0 }
 0x590   :  { %v1215_v32 = vadd.f32 %v9624_v12, %v1214_v24  ;;  %v6182_v35 = vpop.f32.mrb[14].mxu0  ;;  %v2434_v24 = vld [vmem:[%s10727_s1 + $0x48] sm:$0xff] }
 0x591   :  { %1231 = vst [vmem:[#allocation3 + $0x10] sm:$0xff] %v1223_v21  ;;  %v1226_v41 = vadd.f32 %v6182_v35, %v9624_v12  ;;  %v1217_v44 = vpop.f32.mrb[15].mxu0  ;;  %v2433_v21 = vld [vmem:[%s10727_s1 + $0x40] sm:$0xff]  ;;  %v2435_v35 = vld [vmem:[%s10727_s1 + $0x50] sm:$0xff] }
 0x592   :  { %1229 = vst [vmem:[#allocation3] sm:$0xff] %v1215_v32  ;;  %v1218_v47 = vadd.f32 %v9624_v12, %v1217_v44  ;;  %v9801_v32 = vpack.c.bf16 %v2434_v24, %v2433_v21  ;;  %v2531_v21 = vld [vmem:[%s10729_s3 + $0x10] sm:$0xff]  ;;  %v2532_v24 = vld [vmem:[%s10729_s3 + $0x18] sm:$0xff] }
 0x593   :  { %1232 = vst [vmem:[#allocation3 + $0x18] sm:$0xff] %v1226_v41  ;;  %v2436_v41 = vld [vmem:[%s10727_s1 + $0x58] sm:$0xff] }
 0x594   :  { %1230 = vst [vmem:[#allocation3 + $0x8] sm:$0xff] %v1218_v47  ;;  %v9811_v44 = vpack.c.bf16 %v2436_v41, %v2435_v35  ;;  %v2437_v47 = vld [vmem:[%s10727_s1 + $0x60] sm:$0xff]  ;;  %v9959_v41 = vpack.c.bf16 %v2532_v24, %v2531_v21 }
 0x5a0   :  { %v1491_v50 = vpop.f32.mrb[14].mxu1 }
 0x5a1   :  { %v6287_v54 = vpop.f32.mrb[15].mxu1 }
 0x5ae   :  { %v1421_v55 = vpop.f32.mrb[16].mxu0 }
 0x5af   :  { %v1492_v58 = vadd.f32 %v1491_v50, %v1421_v55  ;;  %v6252_v61 = vpop.f32.mrb[17].mxu0  ;;  %v2438_v50 = vld [vmem:[%s10727_s1 + $0x68] sm:$0xff]  ;;  %v2439_v55 = vld [vmem:[%s10727_s1 + $0x70] sm:$0xff] }
 0x5b0   :  { %v9821_v54 = vpack.c.bf16 %v2438_v50, %v2437_v47  ;;  %v4863_v47 = vld [vmem:[%s10726_s0 + $0x40] sm:$0xff] }
 0x5b1   :  { %v1495_v63 = vadd.f32 %v9174_v27, %v1492_v58  ;;  %v2440_v58 = vld [vmem:[%s10727_s1 + $0x78] sm:$0xff]  ;;  %v2533_v50 = vld [vmem:[%s10729_s3 + $0x20] sm:$0xff] }
 0x5b2   :  { %v9831_v61 = vpack.c.bf16 %v2440_v58, %v2439_v55  ;;  %v2534_v55 = vld [vmem:[%s10729_s3 + $0x28] sm:$0xff] }
 0x5b3   :  { %8712 = vtanh.f32 %v1495_v63  ;;  %v8670_v63 = vld [vmem:[%s10731_s5] sm:$0xff]  }
 0x5bd   :  { %v8713_v0 = vpop.eup %8712 }
 0x5be   :  { %v1497_v1 = vpack.c.bf16 %v8713_v0, %v8713_v0  ;;  %6356 = vmatmul.mubr.f32.vlgmr.msra.gmra.mrb[16].mxu1 %v8713_v0  ;;  %v8671_v0 = vld [vmem:[%s10731_s5 + $0x8] sm:$0xff]  }
 0x5bf   :  { %7937 = vmatpush3.bf16.msra.mxu1 %v9301_v53  ;;  %6425 = vmatprep.mubr.msk.f32.mxu1 %vm8810_vm0, %v8811_v6 }
 0x5c0   :  { %1498 = vst [vmem:[#allocation2 + $0x10] sm:$0xf] %v1497_v1  ;;  %7938 = vmatprep.subr.bf16.mxu1 %v8809_v3  ;;  %v8672_v1 = vld [vmem:[%s10731_s5 + $0x10] sm:$0xff]  }
 0x5c3   :  { %7940 = vmatpush3.bf16.msra.mxu1 %v9313_v2 }
 0x5c4   :  { %7941 = vmatprep.subr.bf16.mxu1 %v8809_v3 }
 0x5c7   :  { %7943 = vmatpush3.bf16.msra.mxu1 %v9325_v9 }
 0x5c8   :  { %7944 = vmatprep.subr.bf16.mxu1 %v8809_v3 }
 0x5cb   :  { %7946 = vmatpush3.bf16.msra.mxu1 %v9335_v13 }
 0x5cc   :  { %7947 = vmatprep.subr.bf16.mxu1 %v8809_v3 }
 0x5ce   :  { %v1583_v10 = vpop.f32.mrb[18].mxu0 }
 0x5cf   :  { %v1587_v11 = vadd.f32 %v4852_v8, %v1583_v10  ;;  %7949 = vmatpush3.bf16.msra.mxu1 %v9345_v17  ;;  %v6322_v16 = vpop.f32.mrb[19].mxu0  ;;  %v8673_v8 = vld [vmem:[%s10731_s5 + $0x18] sm:$0xff]   ;;  %v8674_v10 = vld [vmem:[%s10731_s5 + $0x20] sm:$0xff]  }
 0x5d0   :  { %7950 = vmatprep.subr.bf16.mxu1 %v8809_v3  ;;  %v2514_v16 = vld [vmem:[%s10728_s2 + $0x8] sm:$0xff] }
 0x5d1   :  { %8714 = vtanh.f32 %v1587_v11  ;;  %v2513_v11 = vld [vmem:[%s10728_s2] sm:$0xff] }
 0x5d3   :  { %7952 = vmatpush3.bf16.msra.mxu1 %v9355_v22 }
 0x5d4   :  { %7953 = vmatprep.subr.bf16.mxu1 %v8809_v3 }
 0x5d7   :  { %7955 = vmatpush3.bf16.msra.mxu1 %v9365_v26 }
 0x5d8   :  { %7956 = vmatprep.subr.bf16.mxu1 %v8809_v3 }
 0x5db   :  { %v8715_v19 = vpop.eup %8714  ;;  %7958 = vmatpush3.bf16.msra.mxu1 %v9375_v31 }
 0x5dc   :  { %6391 = vmatmul.mubr.f32.vlgmr.msra.gmra.mrb[20].mxu0 %v8715_v19  ;;  %7983 = vmatprep.subr.bf16.mxu1 %v8809_v3 }
 0x5dd   :  { %7961 = vmatpush3.bf16.msra.mxu0 %v9488_v5  ;;  %6460 = vmatprep.mubr.msk.f32.mxu0 %vm8810_vm0, %v8811_v6 }
 0x5de   :  { %6426 = vmatmul.mubr.f32.vlgmr.msra.gmra.mrb[18].mxu1 %v8715_v19  ;;  %7962 = vmatprep.subr.bf16.mxu0 %v8809_v3  ;;  %v9859_v19 = vpack.c.bf16 %v2514_v16, %v2513_v11  ;;  %v2537_v16 = vld [vmem:[%s10729_s3 + $0x40] sm:$0xff] }
 0x5df   :  { %7985 = vmatpush3.bf16.msra.mxu1 %v9397_v40  ;;  %6495 = vmatprep.mubr.msk.f32.mxu1 %vm8810_vm0, %v8811_v6 }
 0x5e0   :  { %7986 = vmatprep.subr.bf16.mxu1 %v8809_v3 }
 0x5e1   :  { %7964 = vmatpush3.bf16.msra.mxu0 %v9497_v14 }
 0x5e2   :  { %7965 = vmatprep.subr.bf16.mxu0 %v8809_v3 }
 0x5e3   :  { %7988 = vmatpush3.bf16.msra.mxu1 %v9410_v46 }
 0x5e4   :  { %7989 = vmatprep.subr.bf16.mxu1 %v8809_v3 }
 0x5e5   :  { %7967 = vmatpush3.bf16.msra.mxu0 %v9512_v30 }
 0x5e6   :  { %7968 = vmatprep.subr.bf16.mxu0 %v8809_v3 }
 0x5e7   :  { %7991 = vmatpush3.bf16.msra.mxu1 %v9426_v56 }
 0x5e8   :  { %7992 = vmatprep.subr.bf16.mxu1 %v8809_v3 }
 0x5e9   :  { %7970 = vmatpush3.bf16.msra.mxu0 %v9522_v36 }
 0x5ea   :  { %7971 = vmatprep.subr.bf16.mxu0 %v8809_v3 }
 0x5eb   :  { %7994 = vmatpush3.bf16.msra.mxu1 %v9435_v59 }
 0x5ec   :  { %7995 = vmatprep.subr.bf16.mxu1 %v8809_v3 }
 0x5ed   :  { %7973 = vmatpush3.bf16.msra.mxu0 %v9532_v42 }
 0x5ee   :  { %7974 = vmatprep.subr.bf16.mxu0 %v8809_v3 }
 0x5ef   :  { %7997 = vmatpush3.bf16.msra.mxu1 %v9447_v7 }
 0x5f0   :  { %7998 = vmatprep.subr.bf16.mxu1 %v8809_v3 }
 0x5f1   :  { %7976 = vmatpush3.bf16.msra.mxu0 %v9542_v49 }
 0x5f2   :  { %7977 = vmatprep.subr.bf16.mxu0 %v8809_v3 }
 0x5f3   :  { %8000 = vmatpush3.bf16.msra.mxu1 %v9457_v18 }
 0x5f4   :  { %8001 = vmatprep.subr.bf16.mxu1 %v8809_v3 }
 0x5f5   :  { %7979 = vmatpush3.bf16.msra.mxu0 %v9556_v57 }
 0x5f6   :  { %7980 = vmatprep.subr.bf16.mxu0 %v8809_v3 }
 0x5f7   :  { %8003 = vmatpush3.bf16.msra.mxu1 %v9467_v29 }
 0x5f8   :  { %8004 = vmatprep.subr.bf16.mxu1 %v8809_v3 }
 0x5f9   :  { %7982 = vmatpush3.bf16.msra.mxu0 %v9568_v62 }
 0x5fa   :  { %8007 = vmatprep.subr.bf16.mxu0 %v8809_v3 }
 0x5fb   :  { %8006 = vmatpush3.bf16.msra.mxu1 %v9477_v38 }
 0x5fc   :  { %8031 = vmatprep.subr.bf16.mxu1 %v8809_v3 }
 0x691   :  { %v1687_v20 = vpop.f32.mrb[16].mxu1 }
 0x692   :  { %v6357_v23 = vpop.f32.mrb[17].mxu1 }
 0x693   :  { %v2515_v23 = vld [vmem:[%s10728_s2 + $0x10] sm:$0xff] }
 0x6af   :  { %v1757_v25 = vpop.f32.mrb[20].mxu0 }
 0x6b0   :  { %v1758_v33 = vadd.f32 %v1757_v25, %v1687_v20  ;;  %v6392_v34 = vpop.f32.mrb[21].mxu0  ;;  %v8675_v20 = vld [vmem:[%s10731_s5 + $0x28] sm:$0xff]   ;;  %v2516_v25 = vld [vmem:[%s10728_s2 + $0x18] sm:$0xff] }
 0x6b1   :  { %v1852_v37 = vpop.f32.mrb[18].mxu1  ;;  %v2517_v34 = vld [vmem:[%s10728_s2 + $0x20] sm:$0xff] }
 0x6b2   :  { %v1761_v39 = vadd.f32 %v9174_v27, %v1758_v33  ;;  %v1856_v43 = vadd.f32 %v4853_v28, %v1852_v37  ;;  %v6427_v45 = vpop.f32.mrb[19].mxu1  ;;  %v9872_v28 = vpack.c.bf16 %v2516_v25, %v2515_v23  ;;  %v8676_v33 = vld [vmem:[%s10731_s5 + $0x30] sm:$0xff]   ;;  %v2518_v37 = vld [vmem:[%s10728_s2 + $0x28] sm:$0xff] }
 0x6b3   :  { %v2519_v45 = vld [vmem:[%s10728_s2 + $0x30] sm:$0xff] }
 0x6b4   :  { %8716 = vtanh.f32 %v1761_v39  ;;  %v8677_v39 = vld [vmem:[%s10731_s5 + $0x38] sm:$0xff]   ;;  %v2539_v25 = vld [vmem:[%s10729_s3 + $0x50] sm:$0xff] }
 0x6b5   :  { %8718 = vtanh.f32 %v1856_v43  ;;  %v9888_v43 = vpack.c.bf16 %v2518_v37, %v2517_v34 }
 0x6be   :  { %v8717_v48 = vpop.eup %8716 }
 0x6bf   :  { %v8719_v51 = vpop.eup %8718  ;;  %v1763_v52 = vpack.c.bf16 %v8717_v48, %v8717_v48  ;;  %6461 = vmatmul.mubr.f32.vlgmr.msra.gmra.mrb[22].mxu0 %v8717_v48  ;;  %v2520_v48 = vld [vmem:[%s10728_s2 + $0x38] sm:$0xff] }
 0x6c0   :  { %6496 = vmatmul.mubr.f32.vlgmr.msra.gmra.mrb[20].mxu1 %v8719_v51  ;;  %8009 = vmatpush3.bf16.msra.mxu0 %v9301_v53 }
 0x6c1   :  { %v1765_v4 = vrot.slane %v1763_v52, 4  ;;  %8010 = vmatprep.subr.bf16.mxu0 %v8809_v3  ;;  %6530 = vmatprep.mubr.msk.f32.mxu0 %vm8810_vm0, %v8811_v6  ;;  %v2521_v52 = vld [vmem:[%s10728_s2 + $0x40] sm:$0xff] }
 0x6c2   :  { %8033 = vmatpush3.bf16.msra.mxu1 %v9488_v5  ;;  %6565 = vmatprep.mubr.msk.f32.mxu1 %vm8810_vm0, %v8811_v6  ;;  %v2427_v5 = vld [vmem:[%s10727_s1 + $0x10] sm:$0xff] }
 0x6c3   :  { %1767 = vst [vmem:[#allocation2 + $0x10] sm:$0xf0] %v1765_v4  ;;  %8034 = vmatprep.subr.bf16.mxu1 %v8809_v3  ;;  %v2522_v4 = vld [vmem:[%s10728_s2 + $0x48] sm:$0xff] }
 0x6c4   :  { %8012 = vmatpush3.bf16.msra.mxu0 %v9313_v2 }
 0x6c5   :  { %8013 = vmatprep.subr.bf16.mxu0 %v8809_v3 }
 0x6c6   :  { %8036 = vmatpush3.bf16.msra.mxu1 %v9497_v14  ;;  %v2428_v14 = vld [vmem:[%s10727_s1 + $0x18] sm:$0xff] }
 0x6c7   :  { %8037 = vmatprep.subr.bf16.mxu1 %v8809_v3 }
 0x6c8   :  { %8015 = vmatpush3.bf16.msra.mxu0 %v9325_v9 }
 0x6c9   :  { %8016 = vmatprep.subr.bf16.mxu0 %v8809_v3 }
 0x6ca   :  { %8039 = vmatpush3.bf16.msra.mxu1 %v9512_v30 }
 0x6cb   :  { %8040 = vmatprep.subr.bf16.mxu1 %v8809_v3 }
 0x6cc   :  { %8018 = vmatpush3.bf16.msra.mxu0 %v9335_v13 }
 0x6cd   :  { %8019 = vmatprep.subr.bf16.mxu0 %v8809_v3 }
 0x6ce   :  { %8042 = vmatpush3.bf16.msra.mxu1 %v9522_v36  ;;  %v9769_v36 = vpack.c.bf16 %v2428_v14, %v2427_v5 }
 0x6cf   :  { %8043 = vmatprep.subr.bf16.mxu1 %v8809_v3 }
 0x6d0   :  { %8021 = vmatpush3.bf16.msra.mxu0 %v9345_v17  ;;  %v9748_v17 = vld [vmem:[%s10730_s4] ss:$0 sm:$0xff] }
 0x6d1   :  { %8022 = vmatprep.subr.bf16.mxu0 %v8809_v3 }
 0x6d2   :  { %8045 = vmatpush3.bf16.msra.mxu1 %v9532_v42  ;;  %v2429_v42 = vld [vmem:[%s10727_s1 + $0x20] sm:$0xff] }
 0x6d3   :  { %8046 = vmatprep.subr.bf16.mxu1 %v8809_v3 }
 0x6d4   :  { %8024 = vmatpush3.bf16.msra.mxu0 %v9355_v22 }
 0x6d5   :  { %8025 = vmatprep.subr.bf16.mxu0 %v8809_v3 }
 0x6d6   :  { %8048 = vmatpush3.bf16.msra.mxu1 %v9542_v49  ;;  %v2430_v49 = vld [vmem:[%s10727_s1 + $0x28] sm:$0xff] }
 0x6d7   :  { %8049 = vmatprep.subr.bf16.mxu1 %v8809_v3 }
 0x6d8   :  { %8027 = vmatpush3.bf16.msra.mxu0 %v9365_v26 }
 0x6d9   :  { %8028 = vmatprep.subr.bf16.mxu0 %v8809_v3 }
 0x6da   :  { %8051 = vmatpush3.bf16.msra.mxu1 %v9556_v57  ;;  %v9781_v57 = vpack.c.bf16 %v2430_v49, %v2429_v42  ;;  %v2529_v49 = vld [vmem:[%s10729_s3] sm:$0xff] }
 0x6db   :  { %8052 = vmatprep.subr.bf16.mxu1 %v8809_v3 }
 0x6dc   :  { %8030 = vmatpush3.bf16.msra.mxu0 %v9375_v31 }
 0x6dd   :  { %8055 = vmatprep.subr.bf16.mxu0 %v8809_v3 }
 0x6de   :  { %8054 = vmatpush3.bf16.msra.mxu1 %v9568_v62  ;;  %v2432_v62 = vld [vmem:[%s10727_s1 + $0x38] sm:$0xff] }
 0x6df   :  { %6531 = vmatmul.mubr.f32.vlgmr.msra.gmra.mrb[24].mxu0 %v8719_v51  ;;  %v9791_v15 = vpack.c.bf16 %v2432_v62, %v2431_v60  ;;  %6603 = vmatprep.subr.bf16.mxu1 %v8670_v63  ;;  %v9897_v51 = vpack.c.bf16 %v2520_v48, %v2519_v45  ;;  %v2530_v60 = vld [vmem:[%s10729_s3 + $0x8] sm:$0xff] }
 0x6e0   :  { %8057 = vmatpush3.bf16.msra.mxu0 %v9397_v40  ;;  %6600 = vmatprep.mubr.msk.f32.mxu0 %vm8810_vm0, %v8811_v6  ;;  %v2303_v40 = vld [vmem:[#allocation2 + $0x10] sm:$0xff]  ;;  %v9950_v62 = vpack.c.bf16 %v2530_v60, %v2529_v49  ;;  %v2542_v45 = vld [vmem:[%s10729_s3 + $0x68] sm:$0xff] }
 0x6e1   :  { %8058 = vmatprep.subr.bf16.mxu0 %v8809_v3 }
 0x6e4   :  { %8060 = vmatpush3.bf16.msra.mxu0 %v9410_v46  ;;  %v4854_v46 = vld [vmem:[%s10726_s0 + $0x38] sm:$0xff] }
 0x6e5   :  { %8061 = vmatprep.subr.bf16.mxu0 %v8809_v3 }
 0x6e8   :  { %8063 = vmatpush3.bf16.msra.mxu0 %v9426_v56 }
 0x6e9   :  { %8064 = vmatprep.subr.bf16.mxu0 %v8809_v3 }
 0x6ec   :  { %8066 = vmatpush3.bf16.msra.mxu0 %v9435_v59 }
 0x6ed   :  { %8067 = vmatprep.subr.bf16.mxu0 %v8809_v3 }
 0x6f0   :  { %8069 = vmatpush3.bf16.msra.mxu0 %v9447_v7 }
 0x6f1   :  { %8070 = vmatprep.subr.bf16.mxu0 %v8809_v3 }
 0x6f4   :  { %8072 = vmatpush3.bf16.msra.mxu0 %v9457_v18  ;;  %v2425_v18 = vld [vmem:[%s10727_s1] sm:$0xff] }
 0x6f5   :  { %8073 = vmatprep.subr.bf16.mxu0 %v8809_v3 }
 0x6f8   :  { %8075 = vmatpush3.bf16.msra.mxu0 %v9467_v29  ;;  %v2426_v29 = vld [vmem:[%s10727_s1 + $0x8] sm:$0xff] }
 0x6f9   :  { %8076 = vmatprep.subr.bf16.mxu0 %v8809_v3 }
 0x6fc   :  { %8078 = vmatpush3.bf16.msra.mxu0 %v9477_v38  ;;  %v9760_v38 = vpack.c.bf16 %v2426_v29, %v2425_v18 }
 0x6fd   :  { %8079 = vmatprep.subr.bf16.mxu0 %v8809_v3 }
 0x792   :  { %v1956_v27 = vpop.f32.mrb[22].mxu0 }
 0x793   :  { %v2026_v53 = vpop.f32.mrb[20].mxu1  ;;  %v6462_v2 = vpop.f32.mrb[23].mxu0 }
 0x794   :  { %v2027_v9 = vadd.f32 %v2026_v53, %v1956_v27  ;;  %v6497_v13 = vpop.f32.mrb[21].mxu1  ;;  %v9909_v27 = vpack.c.bf16 %v2522_v4, %v2521_v52  ;;  %v2523_v53 = vld [vmem:[%s10728_s2 + $0x50] sm:$0xff]  ;;  %v2524_v2 = vld [vmem:[%s10728_s2 + $0x58] sm:$0xff] }
 0x795   :  { %v2525_v13 = vld [vmem:[%s10728_s2 + $0x60] sm:$0xff]  ;;  %v2543_v52 = vld [vmem:[%s10729_s3 + $0x70] sm:$0xff]  ;;  %v2544_v4 = vld [vmem:[%s10729_s3 + $0x78] sm:$0xff] }
 0x796   :  { %v2030_v22 = vadd.f32 %v9748_v17, %v2027_v9  ;;  %v9919_v9 = vpack.c.bf16 %v2524_v2, %v2523_v53  ;;  %v10030_v53 = vpack.c.bf16 %v2544_v4, %v2543_v52  ;;  %v3622_v52 = vld [vmem:[%s10727_s1 + $0x38] sm:$0xff] }
 0x798   :  { %8720 = vtanh.f32 %v2030_v22  ;;  %v2526_v22 = vld [vmem:[%s10728_s2 + $0x68] sm:$0xff] }
 0x7a2   :  { %v8721_v26 = vpop.eup %8720 }
 0x7a3   :  { %v2032_v31 = vpack.c.bf16 %v8721_v26, %v8721_v26  ;;  %6566 = vmatmul.mubr.f32.vlgmr.msra.gmra.mrb[22].mxu1 %v8721_v26  ;;  %v9929_v26 = vpack.c.bf16 %v2526_v22, %v2525_v13 }
 0x7a4   :  { %6619 = vmatprep.mubr.bf16.mxu1 %v2303_v40  ;;  %6604 = vmatpush3.bf16.msra.mxu1 %v8670_v63  ;;  %v2528_v40 = vld [vmem:[%s10728_s2 + $0x78] sm:$0xff] }
 0x7a5   :  { %2033 = vst [vmem:[#allocation2 + $0x18] sm:$0xf] %v2032_v31  ;;  %6605 = vmatprep.subr.bf16.mxu1 %v8671_v0  ;;  %v2527_v31 = vld [vmem:[%s10728_s2 + $0x70] sm:$0xff] }
 0x7a8   :  { %6606 = vmatpush3.bf16.msra.mxu1 %v8671_v0 }
 0x7a9   :  { %6607 = vmatprep.subr.bf16.mxu1 %v8672_v1 }
 0x7ac   :  { %6608 = vmatpush3.bf16.msra.mxu1 %v8672_v1  ;;  %v9974_v1 = vpack.c.bf16 %v2534_v55, %v2533_v50 }
 0x7ad   :  { %6609 = vmatprep.subr.bf16.mxu1 %v8673_v8 }
 0x7b0   :  { %6610 = vmatpush3.bf16.msra.mxu1 %v8673_v8  ;;  %v2535_v8 = vld [vmem:[%s10729_s3 + $0x30] sm:$0xff] }
 0x7b1   :  { %6611 = vmatprep.subr.bf16.mxu1 %v8674_v10 }
 0x7b2   :  { %v2118_v56 = vpop.f32.mrb[24].mxu0 }
 0x7b3   :  { %v2122_v59 = vadd.f32 %v4854_v46, %v2118_v56  ;;  %v6532_v7 = vpop.f32.mrb[25].mxu0  ;;  %v9939_v46 = vpack.c.bf16 %v2528_v40, %v2527_v31 }
 0x7b4   :  { %6612 = vmatpush3.bf16.msra.mxu1 %v8674_v10  ;;  %v2536_v10 = vld [vmem:[%s10729_s3 + $0x38] sm:$0xff] }
 0x7b5   :  { %8722 = vtanh.f32 %v2122_v59  ;;  %6613 = vmatprep.subr.bf16.mxu1 %v8675_v20  ;;  %v9984_v11 = vpack.c.bf16 %v2536_v10, %v2535_v8 }
 0x7b8   :  { %6614 = vmatpush3.bf16.msra.mxu1 %v8675_v20  ;;  %v2538_v20 = vld [vmem:[%s10729_s3 + $0x48] sm:$0xff] }
 0x7b9   :  { %6615 = vmatprep.subr.bf16.mxu1 %v8676_v33  ;;  %v9994_v23 = vpack.c.bf16 %v2538_v20, %v2537_v16 }
 0x7bc   :  { %6616 = vmatpush3.bf16.msra.mxu1 %v8676_v33  ;;  %v2540_v33 = vld [vmem:[%s10729_s3 + $0x58] sm:$0xff] }
 0x7bd   :  { %6617 = vmatprep.subr.bf16.mxu1 %v8677_v39  ;;  %v10004_v37 = vpack.c.bf16 %v2540_v33, %v2539_v25 }
 0x7bf   :  { %v8723_v30 = vpop.eup %8722 }
 0x7c0   :  { %6601 = vmatmul.mubr.f32.vlgmr.msra.gmra.mrb[26].mxu0 %v8723_v30  ;;  %6618 = vmatpush3.bf16.msra.mxu1 %v8677_v39  ;;  %v2541_v39 = vld [vmem:[%s10729_s3 + $0x60] sm:$0xff] }
 0x7c1   :  { %8081 = vmatpush3.bf16.msra.mxu0 %v9760_v38  ;;  %6655 = vmatprep.mubr.msk.f32.mxu0 %vm8810_vm0, %v8811_v6  ;;  %v10018_v48 = vpack.c.bf16 %v2542_v45, %v2541_v39 }
 0x7c2   :  { %8082 = vmatprep.subr.bf16.mxu0 %v8809_v3  ;;  %8103 = vmatprep.subr.bf16.mxu1 %v8809_v3 }
 0x7c5   :  { %8084 = vmatpush3.bf16.msra.mxu0 %v9769_v36 }
 0x7c6   :  { %8085 = vmatprep.subr.bf16.mxu0 %v8809_v3 }
 0x7c9   :  { %8087 = vmatpush3.bf16.msra.mxu0 %v9781_v57 }
 0x7ca   :  { %8088 = vmatprep.subr.bf16.mxu0 %v8809_v3 }
 0x7cd   :  { %8090 = vmatpush3.bf16.msra.mxu0 %v9791_v15 }
 0x7ce   :  { %8091 = vmatprep.subr.bf16.mxu0 %v8809_v3 }
 0x7d1   :  { %8093 = vmatpush3.bf16.msra.mxu0 %v9801_v32 }
 0x7d2   :  { %8094 = vmatprep.subr.bf16.mxu0 %v8809_v3 }
 0x7d5   :  { %8096 = vmatpush3.bf16.msra.mxu0 %v9811_v44 }
 0x7d6   :  { %8097 = vmatprep.subr.bf16.mxu0 %v8809_v3 }
 0x7d9   :  { %8099 = vmatpush3.bf16.msra.mxu0 %v9821_v54 }
 0x7da   :  { %8100 = vmatprep.subr.bf16.mxu0 %v8809_v3 }
 0x7dd   :  { %8102 = vmatpush3.bf16.msra.mxu0 %v9831_v61 }
 0x7de   :  { %8127 = vmatprep.subr.bf16.mxu0 %v8809_v3 }
 0x7e0   :  { %6656 = vmatmul.mubr.f32.vlgmr.msra.gmra.mrb[28].mxu0 %v8723_v30 }
 0x7e1   :  { %6725 = vmatprep.mubr.msk.f32.mxu0 %vm8810_vm0, %v8811_v6  ;;  %8129 = vmatpush3.bf16.msra.mxu0 %v9859_v19 }
 0x7e2   :  { %8130 = vmatprep.subr.bf16.mxu0 %v8809_v3 }
 0x7e5   :  { %8132 = vmatpush3.bf16.msra.mxu0 %v9872_v28 }
 0x7e6   :  { %8133 = vmatprep.subr.bf16.mxu0 %v8809_v3 }
 0x7e9   :  { %8135 = vmatpush3.bf16.msra.mxu0 %v9888_v43 }
 0x7ea   :  { %8136 = vmatprep.subr.bf16.mxu0 %v8809_v3 }
 0x7ed   :  { %8138 = vmatpush3.bf16.msra.mxu0 %v9897_v51 }
 0x7ee   :  { %8139 = vmatprep.subr.bf16.mxu0 %v8809_v3 }
 0x7f1   :  { %8141 = vmatpush3.bf16.msra.mxu0 %v9909_v27 }
 0x7f2   :  { %8142 = vmatprep.subr.bf16.mxu0 %v8809_v3 }
 0x7f5   :  { %8144 = vmatpush3.bf16.msra.mxu0 %v9919_v9 }
 0x7f6   :  { %8145 = vmatprep.subr.bf16.mxu0 %v8809_v3 }
 0x7f9   :  { %8147 = vmatpush3.bf16.msra.mxu0 %v9929_v26 }
 0x7fa   :  { %8148 = vmatprep.subr.bf16.mxu0 %v8809_v3 }
 0x7fd   :  { %8150 = vmatpush3.bf16.msra.mxu0 %v9939_v46 }
 0x7fe   :  { %8175 = vmatprep.subr.bf16.mxu0 %v8809_v3 }
 0x876   :  { %v2222_v56 = vpop.f32.mrb[22].mxu1 }
 0x877   :  { %v6567_v59 = vpop.f32.mrb[23].mxu1 }
 0x893   :  { %v2292_v7 = vpop.f32.mrb[26].mxu0 }
 0x894   :  { %v2293_v18 = vadd.f32 %v2292_v7, %v2222_v56  ;;  %v6602_v29 = vpop.f32.mrb[27].mxu0 }
 0x896   :  { %v2296_v5 = vadd.f32 %v9748_v17, %v2293_v18 }
 0x898   :  { %8724 = vtanh.f32 %v2296_v5 }
 0x8a2   :  { %v8725_v14 = vpop.eup %8724 }
 0x8a3   :  { %v2298_v30 = vpack.c.bf16 %v8725_v14, %v8725_v14 }
 0x8a5   :  { %v2300_v42 = vrot.slane %v2298_v30, 4 }
 0x8a7   :  { %2302 = vst [vmem:[#allocation2 + $0x18] sm:$0xf0] %v2300_v42 }
 0x8ae   :  { %v2304_v35 = vld [vmem:[#allocation2 + $0x18] sm:$0xff] }
 0x8af   :  { %6620 = vmatmul.mubr.bf16.vlgmr.msra.gmra.mrb[24].mxu1 %v2304_v35 }
 0x8b0   :  { %8105 = vmatpush3.bf16.msra.mxu1 %v9950_v62  ;;  %6690 = vmatprep.mubr.msk.f32.mxu1 %vm8810_vm0, %v8811_v6 }
 0x8b1   :  { %8106 = vmatprep.subr.bf16.mxu1 %v8809_v3 }
 0x8b3   :  { %v2507_v58 = vpop.f32.mrb[28].mxu0 }
 0x8b4   :  { %v2511_v63 = vadd.f32 %v4863_v47, %v2507_v58  ;;  %v6657_v0 = vpop.f32.mrb[29].mxu0  ;;  %8108 = vmatpush3.bf16.msra.mxu1 %v9959_v41 }
 0x8b5   :  { %8109 = vmatprep.subr.bf16.mxu1 %v8809_v3 }
 0x8b6   :  { %8726 = vtanh.f32 %v2511_v63  ;;  %v4865_v63 = vld [vmem:[%s10726_s0 + $0x50] sm:$0xff] }
 0x8b8   :  { %8111 = vmatpush3.bf16.msra.mxu1 %v9974_v1 }
 0x8b9   :  { %8112 = vmatprep.subr.bf16.mxu1 %v8809_v3 }
 0x8bc   :  { %8114 = vmatpush3.bf16.msra.mxu1 %v9984_v11 }
 0x8bd   :  { %8115 = vmatprep.subr.bf16.mxu1 %v8809_v3 }
 0x8c0   :  { %v8727_v34 = vpop.eup %8726  ;;  %8117 = vmatpush3.bf16.msra.mxu1 %v9994_v23 }
 0x8c1   :  { %6726 = vmatmul.mubr.f32.vlgmr.msra.gmra.mrb[30].mxu0 %v8727_v34  ;;  %8118 = vmatprep.subr.bf16.mxu1 %v8809_v3 }
 0x8c2   :  { %8177 = vmatpush3.bf16.msra.mxu0 %v9950_v62  ;;  %6795 = vmatprep.mubr.msk.f32.mxu0 %vm8810_vm0, %v8811_v6 }
 0x8c3   :  { %8178 = vmatprep.subr.bf16.mxu0 %v8809_v3 }
 0x8c4   :  { %8120 = vmatpush3.bf16.msra.mxu1 %v10004_v37 }
 0x8c5   :  { %8121 = vmatprep.subr.bf16.mxu1 %v8809_v3 }
 0x8c6   :  { %8180 = vmatpush3.bf16.msra.mxu0 %v9959_v41 }
 0x8c7   :  { %8181 = vmatprep.subr.bf16.mxu0 %v8809_v3 }
 0x8c8   :  { %8123 = vmatpush3.bf16.msra.mxu1 %v10018_v48 }
 0x8c9   :  { %8124 = vmatprep.subr.bf16.mxu1 %v8809_v3 }
 0x8ca   :  { %8183 = vmatpush3.bf16.msra.mxu0 %v9974_v1 }
 0x8cb   :  { %8184 = vmatprep.subr.bf16.mxu0 %v8809_v3 }
 0x8cc   :  { %8126 = vmatpush3.bf16.msra.mxu1 %v10030_v53 }
 0x8cd   :  { %8151 = vmatprep.subr.bf16.mxu1 %v8809_v3 }
 0x8ce   :  { %8186 = vmatpush3.bf16.msra.mxu0 %v9984_v11 }
 0x8cf   :  { %6691 = vmatmul.mubr.f32.vlgmr.msra.gmra.mrb[28].mxu1 %v8725_v14  ;;  %8187 = vmatprep.subr.bf16.mxu0 %v8809_v3 }
 0x8d0   :  { %8153 = vmatpush3.bf16.msra.mxu1 %v9760_v38  ;;  %6760 = vmatprep.mubr.msk.f32.mxu1 %vm8810_vm0, %v8811_v6 }
 0x8d1   :  { %8154 = vmatprep.subr.bf16.mxu1 %v8809_v3 }
 0x8d2   :  { %8189 = vmatpush3.bf16.msra.mxu0 %v9994_v23 }
 0x8d3   :  { %8190 = vmatprep.subr.bf16.mxu0 %v8809_v3 }
 0x8d4   :  { %8156 = vmatpush3.bf16.msra.mxu1 %v9769_v36 }
 0x8d5   :  { %8157 = vmatprep.subr.bf16.mxu1 %v8809_v3 }
 0x8d6   :  { %8192 = vmatpush3.bf16.msra.mxu0 %v10004_v37 }
 0x8d7   :  { %8193 = vmatprep.subr.bf16.mxu0 %v8809_v3 }
 0x8d8   :  { %8159 = vmatpush3.bf16.msra.mxu1 %v9781_v57 }
 0x8d9   :  { %8160 = vmatprep.subr.bf16.mxu1 %v8809_v3 }
 0x8da   :  { %8195 = vmatpush3.bf16.msra.mxu0 %v10018_v48 }
 0x8db   :  { %8196 = vmatprep.subr.bf16.mxu0 %v8809_v3 }
 0x8dc   :  { %8162 = vmatpush3.bf16.msra.mxu1 %v9791_v15 }
 0x8dd   :  { %8163 = vmatprep.subr.bf16.mxu1 %v8809_v3 }
 0x8de   :  { %8198 = vmatpush3.bf16.msra.mxu0 %v10030_v53 }
 0x8df   :  { %8223 = vmatprep.subr.bf16.mxu0 %v8809_v3 }
 0x8e0   :  { %8165 = vmatpush3.bf16.msra.mxu1 %v9801_v32 }
 0x8e1   :  { %8166 = vmatprep.subr.bf16.mxu1 %v8809_v3 }
 0x8e4   :  { %8168 = vmatpush3.bf16.msra.mxu1 %v9811_v44 }
 0x8e5   :  { %8169 = vmatprep.subr.bf16.mxu1 %v8809_v3 }
 0x8e8   :  { %8171 = vmatpush3.bf16.msra.mxu1 %v9821_v54 }
 0x8e9   :  { %8172 = vmatprep.subr.bf16.mxu1 %v8809_v3 }
 0x8ec   :  { %8174 = vmatpush3.bf16.msra.mxu1 %v9831_v61 }
 0x8ed   :  { %8199 = vmatprep.subr.bf16.mxu1 %v8809_v3 }
 0x8ef   :  { %6761 = vmatmul.mubr.f32.vlgmr.msra.gmra.mrb[30].mxu1 %v8727_v34 }
 0x8f0   :  { %8201 = vmatpush3.bf16.msra.mxu1 %v9859_v19  ;;  %6830 = vmatprep.mubr.msk.f32.mxu1 %vm8810_vm0, %v8811_v6 }
 0x8f1   :  { %8202 = vmatprep.subr.bf16.mxu1 %v8809_v3 }
 0x8f4   :  { %8204 = vmatpush3.bf16.msra.mxu1 %v9872_v28 }
 0x8f5   :  { %8205 = vmatprep.subr.bf16.mxu1 %v8809_v3 }
 0x8f8   :  { %8207 = vmatpush3.bf16.msra.mxu1 %v9888_v43 }
 0x8f9   :  { %8208 = vmatprep.subr.bf16.mxu1 %v8809_v3 }
 0x8fc   :  { %8210 = vmatpush3.bf16.msra.mxu1 %v9897_v51 }
 0x8fd   :  { %8211 = vmatprep.subr.bf16.mxu1 %v8809_v3 }
 0x900   :  { %8213 = vmatpush3.bf16.msra.mxu1 %v9909_v27 }
 0x901   :  { %8214 = vmatprep.subr.bf16.mxu1 %v8809_v3 }
 0x904   :  { %8216 = vmatpush3.bf16.msra.mxu1 %v9919_v9 }
 0x905   :  { %8217 = vmatprep.subr.bf16.mxu1 %v8809_v3 }
 0x908   :  { %8219 = vmatpush3.bf16.msra.mxu1 %v9929_v26 }
 0x909   :  { %8220 = vmatprep.subr.bf16.mxu1 %v8809_v3 }
 0x90c   :  { %8222 = vmatpush3.bf16.msra.mxu1 %v9939_v46 }
 0x90d   :  { %8247 = vmatprep.subr.bf16.mxu1 %v8809_v3 }
 0x982   :  { %v6621_v2 = vpop.f32.mrb[24].mxu1 }
 0x983   :  { %v2412_v13 = vadd.f32 %v6621_v2, %v9624_v12  ;;  %v2403_v22 = vpop.f32.mrb[25].mxu1  ;;  %v3624_v2 = vld [vmem:[%s10727_s1 + $0x48] sm:$0xff] }
 0x984   :  { %v2404_v31 = vadd.f32 %v9624_v12, %v2403_v22  ;;  %v6622_v40 = vpop.f32.mrb[26].mxu1  ;;  %v3625_v22 = vld [vmem:[%s10727_s1 + $0x50] sm:$0xff] }
 0x985   :  { %2421 = vst [vmem:[#allocation3 + $0x30] sm:$0xff] %v2412_v13  ;;  %v2415_v56 = vadd.f32 %v6622_v40, %v9624_v12  ;;  %v2406_v59 = vpop.f32.mrb[27].mxu1 }
 0x986   :  { %2419 = vst [vmem:[#allocation3 + $0x20] sm:$0xff] %v2404_v31  ;;  %v2407_v7 = vadd.f32 %v9624_v12, %v2406_v59  ;;  %v4864_v12 = vld [vmem:[%s10726_s0 + $0x48] sm:$0xff]  ;;  %v3626_v31 = vld [vmem:[%s10727_s1 + $0x58] sm:$0xff] }
 0x987   :  { %2422 = vst [vmem:[#allocation3 + $0x38] sm:$0xff] %v2415_v56  ;;  %v10263_v40 = vpack.c.bf16 %v3626_v31, %v3625_v22  ;;  %v3627_v56 = vld [vmem:[%s10727_s1 + $0x60] sm:$0xff]  ;;  %v3628_v59 = vld [vmem:[%s10727_s1 + $0x68] sm:$0xff] }
 0x988   :  { %2420 = vst [vmem:[#allocation3 + $0x28] sm:$0xff] %v2407_v7  ;;  %v10273_v7 = vpack.c.bf16 %v3628_v59, %v3627_v56  ;;  %v4875_v31 = vld [vmem:[%s10726_s0 + $0x60] sm:$0xff]  ;;  %v3724_v59 = vld [vmem:[%s10729_s3 + $0x28] sm:$0xff] }
 0x989   :  { %v3723_v56 = vld [vmem:[%s10729_s3 + $0x20] sm:$0xff] }
 0x994   :  { %v2681_v18 = vpop.f32.mrb[30].mxu0 }
 0x995   :  { %v6727_v29 = vpop.f32.mrb[31].mxu0 }
 0x996   :  { %v3630_v29 = vld [vmem:[%s10727_s1 + $0x78] sm:$0xff] }
 0x9a2   :  { %v2611_v5 = vpop.f32.mrb[28].mxu1 }
 0x9a3   :  { %v2682_v14 = vadd.f32 %v2681_v18, %v2611_v5  ;;  %v6692_v30 = vpop.f32.mrb[29].mxu1  ;;  %v3629_v18 = vld [vmem:[%s10727_s1 + $0x70] sm:$0xff] }
 0x9a4   :  { %v10283_v5 = vpack.c.bf16 %v3630_v29, %v3629_v18  ;;  %v8679_v30 = vld [vmem:[%s10731_s5 + $0x8] sm:$0xff]  }
 0x9a5   :  { %v2685_v42 = vadd.f32 %v9748_v17, %v2682_v14  ;;  %v8678_v14 = vld [vmem:[%s10731_s5] sm:$0xff]  }
 0x9a7   :  { %8728 = vtanh.f32 %v2685_v42  ;;  %v8680_v42 = vld [vmem:[%s10731_s5 + $0x10] sm:$0xff]  }
 0x9b1   :  { %v8729_v49 = vpop.eup %8728 }
 0x9b2   :  { %v2687_v60 = vpack.c.bf16 %v8729_v49, %v8729_v49  ;;  %6796 = vmatmul.mubr.f32.vlgmr.msra.gmra.mrb[32].mxu0 %v8729_v49  ;;  %v8681_v49 = vld [vmem:[%s10731_s5 + $0x18] sm:$0xff]  }
 0x9b3   :  { %8225 = vmatpush3.bf16.msra.mxu0 %v9760_v38  ;;  %6865 = vmatprep.mubr.msk.f32.mxu0 %vm8810_vm0, %v8811_v6 }
 0x9b4   :  { %2688 = vst [vmem:[#allocation2 + $0x20] sm:$0xf] %v2687_v60  ;;  %8226 = vmatprep.subr.bf16.mxu0 %v8809_v3  ;;  %v8682_v60 = vld [vmem:[%s10731_s5 + $0x20] sm:$0xff]  }
 0x9b7   :  { %8228 = vmatpush3.bf16.msra.mxu0 %v9769_v36 }
 0x9b8   :  { %8229 = vmatprep.subr.bf16.mxu0 %v8809_v3 }
 0x9bb   :  { %8231 = vmatpush3.bf16.msra.mxu0 %v9781_v57 }
 0x9bc   :  { %8232 = vmatprep.subr.bf16.mxu0 %v8809_v3 }
 0x9bf   :  { %8234 = vmatpush3.bf16.msra.mxu0 %v9791_v15 }
 0x9c0   :  { %8235 = vmatprep.subr.bf16.mxu0 %v8809_v3 }
 0x9c2   :  { %v2773_v21 = vpop.f32.mrb[30].mxu1 }
 0x9c3   :  { %v2777_v24 = vadd.f32 %v4864_v12, %v2773_v21  ;;  %8237 = vmatpush3.bf16.msra.mxu0 %v9801_v32  ;;  %v6762_v35 = vpop.f32.mrb[31].mxu1  ;;  %v3703_v12 = vld [vmem:[%s10728_s2] sm:$0xff]  ;;  %v3704_v21 = vld [vmem:[%s10728_s2 + $0x8] sm:$0xff] }
 0x9c4   :  { %8238 = vmatprep.subr.bf16.mxu0 %v8809_v3  ;;  %v8683_v35 = vld [vmem:[%s10731_s5 + $0x28] sm:$0xff]  }
 0x9c5   :  { %8730 = vtanh.f32 %v2777_v24  ;;  %v10311_v24 = vpack.c.bf16 %v3704_v21, %v3703_v12  ;;  %v3727_v12 = vld [vmem:[%s10729_s3 + $0x40] sm:$0xff]  ;;  %v3728_v21 = vld [vmem:[%s10729_s3 + $0x48] sm:$0xff] }
 0x9c7   :  { %8240 = vmatpush3.bf16.msra.mxu0 %v9811_v44 }
 0x9c8   :  { %8241 = vmatprep.subr.bf16.mxu0 %v8809_v3 }
 0x9cb   :  { %8243 = vmatpush3.bf16.msra.mxu0 %v9821_v54 }
 0x9cc   :  { %8244 = vmatprep.subr.bf16.mxu0 %v8809_v3 }
 0x9cf   :  { %v8731_v47 = vpop.eup %8730  ;;  %8246 = vmatpush3.bf16.msra.mxu0 %v9831_v61 }
 0x9d0   :  { %6831 = vmatmul.mubr.f32.vlgmr.msra.gmra.mrb[32].mxu1 %v8731_v47  ;;  %8271 = vmatprep.subr.bf16.mxu0 %v8809_v3 }
 0x9d1   :  { %8249 = vmatpush3.bf16.msra.mxu1 %v9950_v62  ;;  %6900 = vmatprep.mubr.msk.f32.mxu1 %vm8810_vm0, %v8811_v6 }
 0x9d2   :  { %6866 = vmatmul.mubr.f32.vlgmr.msra.gmra.mrb[34].mxu0 %v8731_v47  ;;  %8250 = vmatprep.subr.bf16.mxu1 %v8809_v3  ;;  %v3705_v47 = vld [vmem:[%s10728_s2 + $0x10] sm:$0xff] }
 0x9d3   :  { %8273 = vmatpush3.bf16.msra.mxu0 %v9859_v19  ;;  %6935 = vmatprep.mubr.msk.f32.mxu0 %vm8810_vm0, %v8811_v6 }
 0x9d4   :  { %8274 = vmatprep.subr.bf16.mxu0 %v8809_v3 }
 0x9d5   :  { %8252 = vmatpush3.bf16.msra.mxu1 %v9959_v41 }
 0x9d6   :  { %8253 = vmatprep.subr.bf16.mxu1 %v8809_v3 }
 0x9d7   :  { %8276 = vmatpush3.bf16.msra.mxu0 %v9872_v28 }
 0x9d8   :  { %8277 = vmatprep.subr.bf16.mxu0 %v8809_v3 }
 0x9d9   :  { %8255 = vmatpush3.bf16.msra.mxu1 %v9974_v1 }
 0x9da   :  { %8256 = vmatprep.subr.bf16.mxu1 %v8809_v3 }
 0x9db   :  { %8279 = vmatpush3.bf16.msra.mxu0 %v9888_v43 }
 0x9dc   :  { %8280 = vmatprep.subr.bf16.mxu0 %v8809_v3 }
 0x9dd   :  { %8258 = vmatpush3.bf16.msra.mxu1 %v9984_v11 }
 0x9de   :  { %8259 = vmatprep.subr.bf16.mxu1 %v8809_v3 }
 0x9df   :  { %8282 = vmatpush3.bf16.msra.mxu0 %v9897_v51 }
 0x9e0   :  { %8283 = vmatprep.subr.bf16.mxu0 %v8809_v3 }
 0x9e1   :  { %8261 = vmatpush3.bf16.msra.mxu1 %v9994_v23 }
 0x9e2   :  { %8262 = vmatprep.subr.bf16.mxu1 %v8809_v3 }
 0x9e3   :  { %8285 = vmatpush3.bf16.msra.mxu0 %v9909_v27 }
 0x9e4   :  { %8286 = vmatprep.subr.bf16.mxu0 %v8809_v3 }
 0x9e5   :  { %8264 = vmatpush3.bf16.msra.mxu1 %v10004_v37 }
 0x9e6   :  { %8265 = vmatprep.subr.bf16.mxu1 %v8809_v3 }
 0x9e7   :  { %8288 = vmatpush3.bf16.msra.mxu0 %v9919_v9 }
 0x9e8   :  { %8289 = vmatprep.subr.bf16.mxu0 %v8809_v3 }
 0x9e9   :  { %8267 = vmatpush3.bf16.msra.mxu1 %v10018_v48 }
 0x9ea   :  { %8268 = vmatprep.subr.bf16.mxu1 %v8809_v3 }
 0x9eb   :  { %8291 = vmatpush3.bf16.msra.mxu0 %v9929_v26 }
 0x9ec   :  { %8292 = vmatprep.subr.bf16.mxu0 %v8809_v3 }
 0x9ed   :  { %8270 = vmatpush3.bf16.msra.mxu1 %v10030_v53 }
 0x9ee   :  { %8295 = vmatprep.subr.bf16.mxu1 %v8809_v3 }
 0x9ef   :  { %8294 = vmatpush3.bf16.msra.mxu0 %v9939_v46 }
 0x9f0   :  { %8319 = vmatprep.subr.bf16.mxu0 %v8809_v3 }
 0xa85   :  { %v2877_v50 = vpop.f32.mrb[32].mxu0 }
 0xa86   :  { %v6797_v55 = vpop.f32.mrb[33].mxu0 }
 0xaa3   :  { %v2947_v58 = vpop.f32.mrb[32].mxu1 }
 0xaa4   :  { %v2948_v0 = vadd.f32 %v2947_v58, %v2877_v50  ;;  %v6832_v8 = vpop.f32.mrb[33].mxu1  ;;  %v3706_v50 = vld [vmem:[%s10728_s2 + $0x18] sm:$0xff]  ;;  %v8684_v58 = vld [vmem:[%s10731_s5 + $0x30] sm:$0xff]  }
 0xaa5   :  { %v3042_v10 = vpop.f32.mrb[34].mxu0  ;;  %v10324_v55 = vpack.c.bf16 %v3706_v50, %v3705_v47  ;;  %v8685_v8 = vld [vmem:[%s10731_s5 + $0x38] sm:$0xff]   ;;  %v3729_v47 = vld [vmem:[%s10729_s3 + $0x50] sm:$0xff] }
 0xaa6   :  { %v2951_v16 = vadd.f32 %v9748_v17, %v2948_v0  ;;  %v3046_v20 = vadd.f32 %v4865_v63, %v3042_v10  ;;  %v6867_v25 = vpop.f32.mrb[35].mxu0  ;;  %v3707_v63 = vld [vmem:[%s10728_s2 + $0x20] sm:$0xff]  ;;  %v3708_v0 = vld [vmem:[%s10728_s2 + $0x28] sm:$0xff]  ;;  %v3730_v50 = vld [vmem:[%s10729_s3 + $0x58] sm:$0xff] }
 0xaa7   :  { %v10340_v10 = vpack.c.bf16 %v3708_v0, %v3707_v63  ;;  %v10461_v63 = vpack.c.bf16 %v3730_v50, %v3729_v47  ;;  %v3731_v0 = vld [vmem:[%s10729_s3 + $0x60] sm:$0xff] }
 0xaa8   :  { %8732 = vtanh.f32 %v2951_v16  ;;  %v3709_v16 = vld [vmem:[%s10728_s2 + $0x30] sm:$0xff] }
 0xaa9   :  { %8734 = vtanh.f32 %v3046_v20  ;;  %v3710_v20 = vld [vmem:[%s10728_s2 + $0x38] sm:$0xff] }
 0xaaa   :  { %v10349_v25 = vpack.c.bf16 %v3710_v20, %v3709_v16  ;;  %v3733_v20 = vld [vmem:[%s10729_s3 + $0x70] sm:$0xff] }
 0xab2   :  { %v8733_v33 = vpop.eup %8732 }
 0xab3   :  { %v8735_v34 = vpop.eup %8734  ;;  %v2953_v39 = vpack.c.bf16 %v8733_v33, %v8733_v33  ;;  %6901 = vmatmul.mubr.f32.vlgmr.msra.gmra.mrb[34].mxu1 %v8733_v33  ;;  %v3711_v33 = vld [vmem:[%s10728_s2 + $0x40] sm:$0xff] }
 0xab4   :  { %6936 = vmatmul.mubr.f32.vlgmr.msra.gmra.mrb[36].mxu0 %v8735_v34  ;;  %8297 = vmatpush3.bf16.msra.mxu1 %v9760_v38 }
 0xab5   :  { %v2955_v45 = vrot.slane %v2953_v39, 4  ;;  %8298 = vmatprep.subr.bf16.mxu1 %v8809_v3  ;;  %6970 = vmatprep.mubr.msk.f32.mxu1 %vm8810_vm0, %v8811_v6 }
 0xab6   :  { %8321 = vmatpush3.bf16.msra.mxu0 %v9950_v62  ;;  %7005 = vmatprep.mubr.msk.f32.mxu0 %vm8810_vm0, %v8811_v6  ;;  %v3618_v62 = vld [vmem:[%s10727_s1 + $0x18] sm:$0xff] }
 0xab7   :  { %2957 = vst [vmem:[#allocation2 + $0x20] sm:$0xf0] %v2955_v45  ;;  %8322 = vmatprep.subr.bf16.mxu0 %v8809_v3  ;;  %v3713_v45 = vld [vmem:[%s10728_s2 + $0x50] sm:$0xff] }
 0xab8   :  { %8300 = vmatpush3.bf16.msra.mxu1 %v9769_v36 }
 0xab9   :  { %8301 = vmatprep.subr.bf16.mxu1 %v8809_v3 }
 0xaba   :  { %8324 = vmatpush3.bf16.msra.mxu0 %v9959_v41 }
 0xabb   :  { %8325 = vmatprep.subr.bf16.mxu0 %v8809_v3 }
 0xabc   :  { %8303 = vmatpush3.bf16.msra.mxu1 %v9781_v57 }
 0xabd   :  { %8304 = vmatprep.subr.bf16.mxu1 %v8809_v3 }
 0xabe   :  { %8327 = vmatpush3.bf16.msra.mxu0 %v9974_v1 }
 0xabf   :  { %8328 = vmatprep.subr.bf16.mxu0 %v8809_v3 }
 0xac0   :  { %8306 = vmatpush3.bf16.msra.mxu1 %v9791_v15 }
 0xac1   :  { %8307 = vmatprep.subr.bf16.mxu1 %v8809_v3 }
 0xac2   :  { %8330 = vmatpush3.bf16.msra.mxu0 %v9984_v11  ;;  %v3619_v11 = vld [vmem:[%s10727_s1 + $0x20] sm:$0xff] }
 0xac3   :  { %8331 = vmatprep.subr.bf16.mxu0 %v8809_v3 }
 0xac4   :  { %8309 = vmatpush3.bf16.msra.mxu1 %v9801_v32 }
 0xac5   :  { %8310 = vmatprep.subr.bf16.mxu1 %v8809_v3 }
 0xac6   :  { %8333 = vmatpush3.bf16.msra.mxu0 %v9994_v23  ;;  %v3620_v23 = vld [vmem:[%s10727_s1 + $0x28] sm:$0xff] }
 0xac7   :  { %8334 = vmatprep.subr.bf16.mxu0 %v8809_v3 }
 0xac8   :  { %8312 = vmatpush3.bf16.msra.mxu1 %v9811_v44 }
 0xac9   :  { %8313 = vmatprep.subr.bf16.mxu1 %v8809_v3 }
 0xaca   :  { %8336 = vmatpush3.bf16.msra.mxu0 %v10004_v37  ;;  %v10233_v37 = vpack.c.bf16 %v3620_v23, %v3619_v11  ;;  %v3719_v11 = vld [vmem:[%s10729_s3] sm:$0xff]  ;;  %v3720_v23 = vld [vmem:[%s10729_s3 + $0x8] sm:$0xff] }
 0xacb   :  { %8337 = vmatprep.subr.bf16.mxu0 %v8809_v3 }
 0xacc   :  { %8315 = vmatpush3.bf16.msra.mxu1 %v9821_v54 }
 0xacd   :  { %8316 = vmatprep.subr.bf16.mxu1 %v8809_v3 }
 0xace   :  { %8339 = vmatpush3.bf16.msra.mxu0 %v10018_v48  ;;  %v3621_v48 = vld [vmem:[%s10727_s1 + $0x30] sm:$0xff] }
 0xacf   :  { %8340 = vmatprep.subr.bf16.mxu0 %v8809_v3  ;;  %v10243_v4 = vpack.c.bf16 %v3622_v52, %v3621_v48  ;;  %v10407_v48 = vpack.c.bf16 %v3720_v23, %v3719_v11  ;;  %v3721_v52 = vld [vmem:[%s10729_s3 + $0x10] sm:$0xff] }
 0xad0   :  { %8318 = vmatpush3.bf16.msra.mxu1 %v9831_v61 }
 0xad1   :  { %8343 = vmatprep.subr.bf16.mxu1 %v8809_v3 }
 0xad2   :  { %8342 = vmatpush3.bf16.msra.mxu0 %v10030_v53  ;;  %v3623_v53 = vld [vmem:[%s10727_s1 + $0x40] sm:$0xff] }
 0xad3   :  { %6971 = vmatmul.mubr.f32.vlgmr.msra.gmra.mrb[36].mxu1 %v8735_v34  ;;  %v10253_v13 = vpack.c.bf16 %v3624_v2, %v3623_v53  ;;  %7043 = vmatprep.subr.bf16.mxu0 %v8678_v14  ;;  %v3712_v34 = vld [vmem:[%s10728_s2 + $0x48] sm:$0xff]  ;;  %v3722_v53 = vld [vmem:[%s10729_s3 + $0x18] sm:$0xff] }
 0xad4   :  { %8345 = vmatpush3.bf16.msra.mxu1 %v9859_v19  ;;  %7040 = vmatprep.mubr.msk.f32.mxu1 %vm8810_vm0, %v8811_v6  ;;  %v3493_v19 = vld [vmem:[#allocation2 + $0x20] sm:$0xff]  ;;  %v10361_v39 = vpack.c.bf16 %v3712_v34, %v3711_v33  ;;  %v10416_v22 = vpack.c.bf16 %v3722_v53, %v3721_v52  ;;  %v3734_v33 = vld [vmem:[%s10729_s3 + $0x78] sm:$0xff]  ;;  %v4876_v52 = vld [vmem:[%s10726_s0 + $0x68] sm:$0xff] }
 0xad5   :  { %8346 = vmatprep.subr.bf16.mxu1 %v8809_v3  ;;  %v10487_v34 = vpack.c.bf16 %v3734_v33, %v3733_v20 }
 0xad8   :  { %8348 = vmatpush3.bf16.msra.mxu1 %v9872_v28  ;;  %v4866_v28 = vld [vmem:[%s10726_s0 + $0x58] sm:$0xff] }
 0xad9   :  { %8349 = vmatprep.subr.bf16.mxu1 %v8809_v3 }
 0xadc   :  { %8351 = vmatpush3.bf16.msra.mxu1 %v9888_v43 }
 0xadd   :  { %8352 = vmatprep.subr.bf16.mxu1 %v8809_v3 }
 0xae0   :  { %8354 = vmatpush3.bf16.msra.mxu1 %v9897_v51 }
 0xae1   :  { %8355 = vmatprep.subr.bf16.mxu1 %v8809_v3 }
 0xae4   :  { %8357 = vmatpush3.bf16.msra.mxu1 %v9909_v27 }
 0xae5   :  { %8358 = vmatprep.subr.bf16.mxu1 %v8809_v3 }
 0xae8   :  { %8360 = vmatpush3.bf16.msra.mxu1 %v9919_v9  ;;  %v3615_v9 = vld [vmem:[%s10727_s1] sm:$0xff] }
 0xae9   :  { %8361 = vmatprep.subr.bf16.mxu1 %v8809_v3 }
 0xaec   :  { %8363 = vmatpush3.bf16.msra.mxu1 %v9929_v26 }
 0xaed   :  { %8364 = vmatprep.subr.bf16.mxu1 %v8809_v3 }
 0xaf0   :  { %8366 = vmatpush3.bf16.msra.mxu1 %v9939_v46  ;;  %v3617_v46 = vld [vmem:[%s10727_s1 + $0x10] sm:$0xff] }
 0xaf1   :  { %8367 = vmatprep.subr.bf16.mxu1 %v8809_v3  ;;  %v10221_v1 = vpack.c.bf16 %v3618_v62, %v3617_v46 }
 0xb86   :  { %v3146_v38 = vpop.f32.mrb[34].mxu1 }
 0xb87   :  { %v3216_v36 = vpop.f32.mrb[36].mxu0  ;;  %v6902_v57 = vpop.f32.mrb[35].mxu1 }
 0xb88   :  { %v3217_v15 = vadd.f32 %v3216_v36, %v3146_v38  ;;  %v6937_v32 = vpop.f32.mrb[37].mxu0  ;;  %v3714_v38 = vld [vmem:[%s10728_s2 + $0x58] sm:$0xff]  ;;  %v3715_v57 = vld [vmem:[%s10728_s2 + $0x60] sm:$0xff] }
 0xb89   :  { %v10371_v36 = vpack.c.bf16 %v3714_v38, %v3713_v45  ;;  %v10543_v38 = vld [vmem:[%s10732_s6] ss:$0 sm:$0xff] }
 0xb8a   :  { %v3220_v44 = vadd.f32 %v9748_v17, %v3217_v15  ;;  %v3616_v17 = vld [vmem:[%s10727_s1 + $0x8] sm:$0xff] }
 0xb8b   :  { %v10212_v26 = vpack.c.bf16 %v3616_v17, %v3615_v9  ;;  %v3716_v15 = vld [vmem:[%s10728_s2 + $0x68] sm:$0xff]  ;;  %v10398_v9 = vld [vmem:[%s10730_s4] ss:$0 sm:$0xff] }
 0xb8c   :  { %8736 = vtanh.f32 %v3220_v44  ;;  %v10381_v32 = vpack.c.bf16 %v3716_v15, %v3715_v57  ;;  %v3717_v44 = vld [vmem:[%s10728_s2 + $0x70] sm:$0xff] }
 0xb96   :  { %v8737_v54 = vpop.eup %8736 }
 0xb97   :  { %v3222_v61 = vpack.c.bf16 %v8737_v54, %v8737_v54  ;;  %7006 = vmatmul.mubr.f32.vlgmr.msra.gmra.mrb[38].mxu0 %v8737_v54  ;;  %v3718_v54 = vld [vmem:[%s10728_s2 + $0x78] sm:$0xff] }
 0xb98   :  { %7059 = vmatprep.mubr.bf16.mxu0 %v3493_v19  ;;  %7044 = vmatpush3.bf16.msra.mxu0 %v8678_v14 }
 0xb99   :  { %3223 = vst [vmem:[#allocation2 + $0x28] sm:$0xf] %v3222_v61  ;;  %7045 = vmatprep.subr.bf16.mxu0 %v8679_v30  ;;  %v10391_v61 = vpack.c.bf16 %v3718_v54, %v3717_v44 }
 0xb9c   :  { %7046 = vmatpush3.bf16.msra.mxu0 %v8679_v30  ;;  %v10431_v30 = vpack.c.bf16 %v3724_v59, %v3723_v56 }
 0xb9d   :  { %7047 = vmatprep.subr.bf16.mxu0 %v8680_v42 }
 0xba0   :  { %7048 = vmatpush3.bf16.msra.mxu0 %v8680_v42  ;;  %v3725_v42 = vld [vmem:[%s10729_s3 + $0x30] sm:$0xff] }
 0xba1   :  { %7049 = vmatprep.subr.bf16.mxu0 %v8681_v49 }
 0xba4   :  { %7050 = vmatpush3.bf16.msra.mxu0 %v8681_v49  ;;  %v3726_v49 = vld [vmem:[%s10729_s3 + $0x38] sm:$0xff] }
 0xba5   :  { %7051 = vmatprep.subr.bf16.mxu0 %v8682_v60 }
 0xba6   :  { %v3308_v43 = vpop.f32.mrb[36].mxu1 }
 0xba7   :  { %v3312_v51 = vadd.f32 %v4866_v28, %v3308_v43  ;;  %v6972_v27 = vpop.f32.mrb[37].mxu1 }
 0xba8   :  { %7052 = vmatpush3.bf16.msra.mxu0 %v8682_v60  ;;  %v10441_v60 = vpack.c.bf16 %v3726_v49, %v3725_v42 }
 0xba9   :  { %8738 = vtanh.f32 %v3312_v51  ;;  %7053 = vmatprep.subr.bf16.mxu0 %v8683_v35 }
 0xbac   :  { %7054 = vmatpush3.bf16.msra.mxu0 %v8683_v35  ;;  %v10451_v35 = vpack.c.bf16 %v3728_v21, %v3727_v12 }
 0xbad   :  { %7055 = vmatprep.subr.bf16.mxu0 %v8684_v58 }
 0xbb0   :  { %7056 = vmatpush3.bf16.msra.mxu0 %v8684_v58 }
 0xbb1   :  { %7057 = vmatprep.subr.bf16.mxu0 %v8685_v8 }
 0xbb3   :  { %v8739_v41 = vpop.eup %8738 }
 0xbb4   :  { %7041 = vmatmul.mubr.f32.vlgmr.msra.gmra.mrb[38].mxu1 %v8739_v41  ;;  %7058 = vmatpush3.bf16.msra.mxu0 %v8685_v8  ;;  %v3732_v8 = vld [vmem:[%s10729_s3 + $0x68] sm:$0xff] }
 0xbb5   :  { %8369 = vmatpush3.bf16.msra.mxu1 %v10212_v26  ;;  %7095 = vmatprep.mubr.msk.f32.mxu1 %vm8810_vm0, %v8811_v6  ;;  %v10475_v16 = vpack.c.bf16 %v3732_v8, %v3731_v0 }
 0xbb6   :  { %8370 = vmatprep.subr.bf16.mxu1 %v8809_v3  ;;  %8391 = vmatprep.subr.bf16.mxu0 %v8809_v3 }
 0xbb9   :  { %8372 = vmatpush3.bf16.msra.mxu1 %v10221_v1 }
 0xbba   :  { %8373 = vmatprep.subr.bf16.mxu1 %v8809_v3 }
 0xbbd   :  { %8375 = vmatpush3.bf16.msra.mxu1 %v10233_v37 }
 0xbbe   :  { %8376 = vmatprep.subr.bf16.mxu1 %v8809_v3 }
 0xbc1   :  { %8378 = vmatpush3.bf16.msra.mxu1 %v10243_v4 }
 0xbc2   :  { %8379 = vmatprep.subr.bf16.mxu1 %v8809_v3 }
 0xbc5   :  { %8381 = vmatpush3.bf16.msra.mxu1 %v10253_v13 }
 0xbc6   :  { %8382 = vmatprep.subr.bf16.mxu1 %v8809_v3 }
 0xbc9   :  { %8384 = vmatpush3.bf16.msra.mxu1 %v10263_v40 }
 0xbca   :  { %8385 = vmatprep.subr.bf16.mxu1 %v8809_v3 }
 0xbcd   :  { %8387 = vmatpush3.bf16.msra.mxu1 %v10273_v7 }
 0xbce   :  { %8388 = vmatprep.subr.bf16.mxu1 %v8809_v3 }
 0xbd1   :  { %8390 = vmatpush3.bf16.msra.mxu1 %v10283_v5 }
 0xbd2   :  { %8415 = vmatprep.subr.bf16.mxu1 %v8809_v3 }
 0xbd4   :  { %7096 = vmatmul.mubr.f32.vlgmr.msra.gmra.mrb[40].mxu1 %v8739_v41 }
 0xbd5   :  { %7165 = vmatprep.mubr.msk.f32.mxu1 %vm8810_vm0, %v8811_v6  ;;  %8417 = vmatpush3.bf16.msra.mxu1 %v10311_v24 }
 0xbd6   :  { %8418 = vmatprep.subr.bf16.mxu1 %v8809_v3 }
 0xbd9   :  { %8420 = vmatpush3.bf16.msra.mxu1 %v10324_v55 }
 0xbda   :  { %8421 = vmatprep.subr.bf16.mxu1 %v8809_v3 }
 0xbdd   :  { %8423 = vmatpush3.bf16.msra.mxu1 %v10340_v10 }
 0xbde   :  { %8424 = vmatprep.subr.bf16.mxu1 %v8809_v3 }
 0xbe1   :  { %8426 = vmatpush3.bf16.msra.mxu1 %v10349_v25 }
 0xbe2   :  { %8427 = vmatprep.subr.bf16.mxu1 %v8809_v3 }
 0xbe5   :  { %8429 = vmatpush3.bf16.msra.mxu1 %v10361_v39 }
 0xbe6   :  { %8430 = vmatprep.subr.bf16.mxu1 %v8809_v3 }
 0xbe9   :  { %8432 = vmatpush3.bf16.msra.mxu1 %v10371_v36 }
 0xbea   :  { %8433 = vmatprep.subr.bf16.mxu1 %v8809_v3 }
 0xbed   :  { %8435 = vmatpush3.bf16.msra.mxu1 %v10381_v32 }
 0xbee   :  { %8436 = vmatprep.subr.bf16.mxu1 %v8809_v3 }
 0xbf1   :  { %8438 = vmatpush3.bf16.msra.mxu1 %v10391_v61 }
 0xbf2   :  { %8463 = vmatprep.subr.bf16.mxu1 %v8809_v3 }
 0xc6a   :  { %v3412_v19 = vpop.f32.mrb[38].mxu0 }
 0xc6b   :  { %v7007_v28 = vpop.f32.mrb[39].mxu0 }
 0xc87   :  { %v3482_v43 = vpop.f32.mrb[38].mxu1 }
 0xc88   :  { %v3483_v51 = vadd.f32 %v3482_v43, %v3412_v19  ;;  %v7042_v27 = vpop.f32.mrb[39].mxu1 }
 0xc8a   :  { %v3486_v17 = vadd.f32 %v10398_v9, %v3483_v51 }
 0xc8c   :  { %8740 = vtanh.f32 %v3486_v17 }
 0xc96   :  { %v8741_v46 = vpop.eup %8740 }
 0xc97   :  { %v3488_v62 = vpack.c.bf16 %v8741_v46, %v8741_v46 }
 0xc99   :  { %v3490_v41 = vrot.slane %v3488_v62, 4 }
 0xc9b   :  { %3492 = vst [vmem:[#allocation2 + $0x28] sm:$0xf0] %v3490_v41 }
 0xca2   :  { %v3494_v2 = vld [vmem:[#allocation2 + $0x28] sm:$0xff] }
 0xca3   :  { %7060 = vmatmul.mubr.bf16.vlgmr.msra.gmra.mrb[40].mxu0 %v3494_v2 }
 0xca4   :  { %8393 = vmatpush3.bf16.msra.mxu0 %v10407_v48  ;;  %7130 = vmatprep.mubr.msk.f32.mxu0 %vm8810_vm0, %v8811_v6 }
 0xca5   :  { %8394 = vmatprep.subr.bf16.mxu0 %v8809_v3 }
 0xca7   :  { %v3697_v18 = vpop.f32.mrb[40].mxu1 }
 0xca8   :  { %v3701_v29 = vadd.f32 %v4875_v31, %v3697_v18  ;;  %v7097_v14 = vpop.f32.mrb[41].mxu1  ;;  %8396 = vmatpush3.bf16.msra.mxu0 %v10416_v22 }
 0xca9   :  { %8397 = vmatprep.subr.bf16.mxu0 %v8809_v3  ;;  %v4877_v14 = vld [vmem:[%s10726_s0 + $0x70] sm:$0xff] }
 0xcaa   :  { %8742 = vtanh.f32 %v3701_v29 }
 0xcac   :  { %8399 = vmatpush3.bf16.msra.mxu0 %v10431_v30 }
 0xcad   :  { %8400 = vmatprep.subr.bf16.mxu0 %v8809_v3 }
 0xcb0   :  { %8402 = vmatpush3.bf16.msra.mxu0 %v10441_v60 }
 0xcb1   :  { %8403 = vmatprep.subr.bf16.mxu0 %v8809_v3 }
 0xcb4   :  { %v8743_v58 = vpop.eup %8742  ;;  %8405 = vmatpush3.bf16.msra.mxu0 %v10451_v35 }
 0xcb5   :  { %7166 = vmatmul.mubr.f32.vlgmr.msra.gmra.mrb[42].mxu1 %v8743_v58  ;;  %8406 = vmatprep.subr.bf16.mxu0 %v8809_v3 }
 0xcb6   :  { %8465 = vmatpush3.bf16.msra.mxu1 %v10407_v48  ;;  %7235 = vmatprep.mubr.msk.f32.mxu1 %vm8810_vm0, %v8811_v6 }
 0xcb7   :  { %8466 = vmatprep.subr.bf16.mxu1 %v8809_v3 }
 0xcb8   :  { %8408 = vmatpush3.bf16.msra.mxu0 %v10461_v63 }
 0xcb9   :  { %8409 = vmatprep.subr.bf16.mxu0 %v8809_v3 }
 0xcba   :  { %8468 = vmatpush3.bf16.msra.mxu1 %v10416_v22 }
 0xcbb   :  { %8469 = vmatprep.subr.bf16.mxu1 %v8809_v3 }
 0xcbc   :  { %8411 = vmatpush3.bf16.msra.mxu0 %v10475_v16 }
 0xcbd   :  { %8412 = vmatprep.subr.bf16.mxu0 %v8809_v3 }
 0xcbe   :  { %8471 = vmatpush3.bf16.msra.mxu1 %v10431_v30 }
 0xcbf   :  { %8472 = vmatprep.subr.bf16.mxu1 %v8809_v3 }
 0xcc0   :  { %8414 = vmatpush3.bf16.msra.mxu0 %v10487_v34 }
 0xcc1   :  { %8439 = vmatprep.subr.bf16.mxu0 %v8809_v3 }
 0xcc2   :  { %8474 = vmatpush3.bf16.msra.mxu1 %v10441_v60 }
 0xcc3   :  { %7131 = vmatmul.mubr.f32.vlgmr.msra.gmra.mrb[44].mxu0 %v8741_v46  ;;  %8475 = vmatprep.subr.bf16.mxu1 %v8809_v3 }
 0xcc4   :  { %8441 = vmatpush3.bf16.msra.mxu0 %v10212_v26  ;;  %7200 = vmatprep.mubr.msk.f32.mxu0 %vm8810_vm0, %v8811_v6 }
 0xcc5   :  { %8442 = vmatprep.subr.bf16.mxu0 %v8809_v3 }
 0xcc6   :  { %8477 = vmatpush3.bf16.msra.mxu1 %v10451_v35 }
 0xcc7   :  { %8478 = vmatprep.subr.bf16.mxu1 %v8809_v3 }
 0xcc8   :  { %8444 = vmatpush3.bf16.msra.mxu0 %v10221_v1 }
 0xcc9   :  { %8445 = vmatprep.subr.bf16.mxu0 %v8809_v3 }
 0xcca   :  { %8480 = vmatpush3.bf16.msra.mxu1 %v10461_v63 }
 0xccb   :  { %8481 = vmatprep.subr.bf16.mxu1 %v8809_v3 }
 0xccc   :  { %8447 = vmatpush3.bf16.msra.mxu0 %v10233_v37 }
 0xccd   :  { %8448 = vmatprep.subr.bf16.mxu0 %v8809_v3 }
 0xcce   :  { %8483 = vmatpush3.bf16.msra.mxu1 %v10475_v16 }
 0xccf   :  { %8484 = vmatprep.subr.bf16.mxu1 %v8809_v3 }
 0xcd0   :  { %8450 = vmatpush3.bf16.msra.mxu0 %v10243_v4 }
 0xcd1   :  { %8451 = vmatprep.subr.bf16.mxu0 %v8809_v3 }
 0xcd2   :  { %8486 = vmatpush3.bf16.msra.mxu1 %v10487_v34 }
 0xcd3   :  { %8511 = vmatprep.subr.bf16.mxu1 %v8809_v3 }
 0xcd4   :  { %8453 = vmatpush3.bf16.msra.mxu0 %v10253_v13 }
 0xcd5   :  { %8454 = vmatprep.subr.bf16.mxu0 %v8809_v3 }
 0xcd8   :  { %8456 = vmatpush3.bf16.msra.mxu0 %v10263_v40 }
 0xcd9   :  { %8457 = vmatprep.subr.bf16.mxu0 %v8809_v3 }
 0xcdc   :  { %8459 = vmatpush3.bf16.msra.mxu0 %v10273_v7 }
 0xcdd   :  { %8460 = vmatprep.subr.bf16.mxu0 %v8809_v3 }
 0xce0   :  { %8462 = vmatpush3.bf16.msra.mxu0 %v10283_v5 }
 0xce1   :  { %8487 = vmatprep.subr.bf16.mxu0 %v8809_v3 }
 0xce3   :  { %7201 = vmatmul.mubr.f32.vlgmr.msra.gmra.mrb[46].mxu0 %v8743_v58 }
 0xce4   :  { %8489 = vmatpush3.bf16.msra.mxu0 %v10311_v24  ;;  %7270 = vmatprep.mubr.msk.f32.mxu0 %vm8810_vm0, %v8811_v6 }
 0xce5   :  { %8490 = vmatprep.subr.bf16.mxu0 %v8809_v3 }
 0xce8   :  { %8492 = vmatpush3.bf16.msra.mxu0 %v10324_v55 }
 0xce9   :  { %8493 = vmatprep.subr.bf16.mxu0 %v8809_v3 }
 0xcec   :  { %8495 = vmatpush3.bf16.msra.mxu0 %v10340_v10 }
 0xced   :  { %8496 = vmatprep.subr.bf16.mxu0 %v8809_v3 }
 0xcf0   :  { %8498 = vmatpush3.bf16.msra.mxu0 %v10349_v25 }
 0xcf1   :  { %8499 = vmatprep.subr.bf16.mxu0 %v8809_v3 }
 0xcf4   :  { %8501 = vmatpush3.bf16.msra.mxu0 %v10361_v39 }
 0xcf5   :  { %8502 = vmatprep.subr.bf16.mxu0 %v8809_v3 }
 0xcf8   :  { %8504 = vmatpush3.bf16.msra.mxu0 %v10371_v36 }
 0xcf9   :  { %8505 = vmatprep.subr.bf16.mxu0 %v8809_v3 }
 0xcfc   :  { %8507 = vmatpush3.bf16.msra.mxu0 %v10381_v32 }
 0xcfd   :  { %8508 = vmatprep.subr.bf16.mxu0 %v8809_v3 }
 0xd00   :  { %8510 = vmatpush3.bf16.msra.mxu0 %v10391_v61 }
 0xd01   :  { %8535 = vmatprep.subr.bf16.mxu0 %v8809_v3 }
 0xd76   :  { %v7061_v45 = vpop.f32.mrb[40].mxu0 }
 0xd77   :  { %v3602_v57 = vadd.f32 %v10543_v38, %v7061_v45  ;;  %v3593_v15 = vpop.f32.mrb[41].mxu0 }
 0xd78   :  { %v3594_v44 = vadd.f32 %v10543_v38, %v3593_v15  ;;  %v7062_v54 = vpop.f32.mrb[42].mxu0 }
 0xd79   :  { %3611 = vst [vmem:[#allocation3 + $0x50] sm:$0xff] %v3602_v57  ;;  %v3605_v19 = vadd.f32 %v10543_v38, %v7062_v54  ;;  %v3596_v28 = vpop.f32.mrb[43].mxu0 }
 0xd7a   :  { %3609 = vst [vmem:[#allocation3 + $0x40] sm:$0xff] %v3594_v44  ;;  %v3597_v43 = vadd.f32 %v10543_v38, %v3596_v28 }
 0xd7b   :  { %3612 = vst [vmem:[#allocation3 + $0x58] sm:$0xff] %v3605_v19 }
 0xd7c   :  { %3610 = vst [vmem:[#allocation3 + $0x48] sm:$0xff] %v3597_v43 }
 0xd88   :  { %v3871_v51 = vpop.f32.mrb[42].mxu1 }
 0xd89   :  { %v7167_v27 = vpop.f32.mrb[43].mxu1 }
 0xd96   :  { %v3801_v17 = vpop.f32.mrb[44].mxu0 }
 0xd97   :  { %v3872_v46 = vadd.f32 %v3871_v51, %v3801_v17  ;;  %v7132_v62 = vpop.f32.mrb[45].mxu0 }
 0xd99   :  { %v3875_v41 = vadd.f32 %v10398_v9, %v3872_v46 }
 0xd9b   :  { %8744 = vtanh.f32 %v3875_v41 }
 0xda5   :  { %v8745_v11 = vpop.eup %8744 }
 0xda6   :  { %v3877_v23 = vpack.c.bf16 %v8745_v11, %v8745_v11  ;;  %7236 = vmatmul.mubr.f32.vlgmr.msra.gmra.mrb[44].mxu1 %v8745_v11 }
 0xda7   :  { %8513 = vmatpush3.bf16.msra.mxu1 %v10212_v26  ;;  %7305 = vmatprep.mubr.msk.f32.mxu1 %vm8810_vm0, %v8811_v6 }
 0xda8   :  { %3878 = vst [vmem:[#allocation2 + $0x30] sm:$0xf] %v3877_v23  ;;  %8514 = vmatprep.subr.bf16.mxu1 %v8809_v3 }
 0xdab   :  { %8516 = vmatpush3.bf16.msra.mxu1 %v10221_v1 }
 0xdac   :  { %8517 = vmatprep.subr.bf16.mxu1 %v8809_v3 }
 0xdaf   :  { %8519 = vmatpush3.bf16.msra.mxu1 %v10233_v37 }
 0xdb0   :  { %8520 = vmatprep.subr.bf16.mxu1 %v8809_v3 }
 0xdb3   :  { %8522 = vmatpush3.bf16.msra.mxu1 %v10243_v4 }
 0xdb4   :  { %8523 = vmatprep.subr.bf16.mxu1 %v8809_v3 }
 0xdb6   :  { %v3963_v53 = vpop.f32.mrb[46].mxu0 }
 0xdb7   :  { %v3967_v2 = vadd.f32 %v4876_v52, %v3963_v53  ;;  %8525 = vmatpush3.bf16.msra.mxu1 %v10253_v13  ;;  %v7202_v31 = vpop.f32.mrb[47].mxu0 }
 0xdb8   :  { %8526 = vmatprep.subr.bf16.mxu1 %v8809_v3 }
 0xdb9   :  { %8746 = vtanh.f32 %v3967_v2 }
 0xdbb   :  { %8528 = vmatpush3.bf16.msra.mxu1 %v10263_v40 }
 0xdbc   :  { %8529 = vmatprep.subr.bf16.mxu1 %v8809_v3 }
 0xdbf   :  { %8531 = vmatpush3.bf16.msra.mxu1 %v10273_v7 }
 0xdc0   :  { %8532 = vmatprep.subr.bf16.mxu1 %v8809_v3 }
 0xdc3   :  { %v8747_v56 = vpop.eup %8746  ;;  %8534 = vmatpush3.bf16.msra.mxu1 %v10283_v5 }
 0xdc4   :  { %7271 = vmatmul.mubr.f32.vlgmr.msra.gmra.mrb[48].mxu0 %v8747_v56  ;;  %8559 = vmatprep.subr.bf16.mxu1 %v8809_v3 }
 0xdc5   :  { %8537 = vmatpush3.bf16.msra.mxu0 %v10407_v48  ;;  %7340 = vmatprep.mubr.msk.f32.mxu0 %vm8810_vm0, %v8811_v6 }
 0xdc6   :  { %7306 = vmatmul.mubr.f32.vlgmr.msra.gmra.mrb[46].mxu1 %v8747_v56  ;;  %8538 = vmatprep.subr.bf16.mxu0 %v8809_v3 }
 0xdc7   :  { %8561 = vmatpush3.bf16.msra.mxu1 %v10311_v24  ;;  %7375 = vmatprep.mubr.msk.f32.mxu1 %vm8810_vm0, %v8811_v6 }
 0xdc8   :  { %8562 = vmatprep.subr.bf16.mxu1 %v8809_v3 }
 0xdc9   :  { %8540 = vmatpush3.bf16.msra.mxu0 %v10416_v22 }
 0xdca   :  { %8541 = vmatprep.subr.bf16.mxu0 %v8809_v3 }
 0xdcb   :  { %8564 = vmatpush3.bf16.msra.mxu1 %v10324_v55 }
 0xdcc   :  { %8565 = vmatprep.subr.bf16.mxu1 %v8809_v3 }
 0xdcd   :  { %8543 = vmatpush3.bf16.msra.mxu0 %v10431_v30 }
 0xdce   :  { %8544 = vmatprep.subr.bf16.mxu0 %v8809_v3 }
 0xdcf   :  { %8567 = vmatpush3.bf16.msra.mxu1 %v10340_v10 }
 0xdd0   :  { %8568 = vmatprep.subr.bf16.mxu1 %v8809_v3 }
 0xdd1   :  { %8546 = vmatpush3.bf16.msra.mxu0 %v10441_v60 }
 0xdd2   :  { %8547 = vmatprep.subr.bf16.mxu0 %v8809_v3 }
 0xdd3   :  { %8570 = vmatpush3.bf16.msra.mxu1 %v10349_v25 }
 0xdd4   :  { %8571 = vmatprep.subr.bf16.mxu1 %v8809_v3 }
 0xdd5   :  { %8549 = vmatpush3.bf16.msra.mxu0 %v10451_v35 }
 0xdd6   :  { %8550 = vmatprep.subr.bf16.mxu0 %v8809_v3 }
 0xdd7   :  { %8573 = vmatpush3.bf16.msra.mxu1 %v10361_v39 }
 0xdd8   :  { %8574 = vmatprep.subr.bf16.mxu1 %v8809_v3 }
 0xdd9   :  { %8552 = vmatpush3.bf16.msra.mxu0 %v10461_v63 }
 0xdda   :  { %8553 = vmatprep.subr.bf16.mxu0 %v8809_v3 }
 0xddb   :  { %8576 = vmatpush3.bf16.msra.mxu1 %v10371_v36 }
 0xddc   :  { %8577 = vmatprep.subr.bf16.mxu1 %v8809_v3 }
 0xddd   :  { %8555 = vmatpush3.bf16.msra.mxu0 %v10475_v16 }
 0xdde   :  { %8556 = vmatprep.subr.bf16.mxu0 %v8809_v3 }
 0xddf   :  { %8579 = vmatpush3.bf16.msra.mxu1 %v10381_v32 }
 0xde0   :  { %8580 = vmatprep.subr.bf16.mxu1 %v8809_v3 }
 0xde1   :  { %8558 = vmatpush3.bf16.msra.mxu0 %v10487_v34 }
 0xde2   :  { %8583 = vmatprep.subr.bf16.mxu0 %v8809_v3 }
 0xde3   :  { %8582 = vmatpush3.bf16.msra.mxu1 %v10391_v61 }
 0xde4   :  { %8607 = vmatprep.subr.bf16.mxu1 %v8809_v3 }
 0xe79   :  { %v4067_v59 = vpop.f32.mrb[44].mxu1 }
 0xe7a   :  { %v7237_v18 = vpop.f32.mrb[45].mxu1 }
 0xe97   :  { %v4137_v29 = vpop.f32.mrb[48].mxu0 }
 0xe98   :  { %v4138_v42 = vadd.f32 %v4137_v29, %v4067_v59  ;;  %v7272_v49 = vpop.f32.mrb[49].mxu0 }
 0xe99   :  { %v4232_v12 = vpop.f32.mrb[46].mxu1 }
 0xe9a   :  { %v4141_v21 = vadd.f32 %v10398_v9, %v4138_v42  ;;  %v4236_v47 = vadd.f32 %v4877_v14, %v4232_v12  ;;  %v7307_v50 = vpop.f32.mrb[47].mxu1 }
 0xe9c   :  { %8748 = vtanh.f32 %v4141_v21 }
 0xe9d   :  { %8750 = vtanh.f32 %v4236_v47 }
 0xea6   :  { %v8749_v58 = vpop.eup %8748 }
 0xea7   :  { %v8751_v0 = vpop.eup %8750  ;;  %v4143_v8 = vpack.c.bf16 %v8749_v58, %v8749_v58  ;;  %7341 = vmatmul.mubr.f32.vlgmr.msra.gmra.mrb[50].mxu0 %v8749_v58 }
 0xea8   :  { %7376 = vmatmul.mubr.f32.vlgmr.msra.gmra.mrb[48].mxu1 %v8751_v0  ;;  %8585 = vmatpush3.bf16.msra.mxu0 %v10212_v26 }
 0xea9   :  { %v4145_v20 = vrot.slane %v4143_v8, 4  ;;  %8586 = vmatprep.subr.bf16.mxu0 %v8809_v3  ;;  %7410 = vmatprep.mubr.msk.f32.mxu0 %vm8810_vm0, %v8811_v6 }
 0xeaa   :  { %8609 = vmatpush3.bf16.msra.mxu1 %v10407_v48  ;;  %7445 = vmatprep.mubr.msk.f32.mxu1 %vm8810_vm0, %v8811_v6  ;;  %v8690_v48 = vld [vmem:[%s10731_s5 + $0x20] sm:$0xff]  }
 0xeab   :  { %4147 = vst [vmem:[#allocation2 + $0x30] sm:$0xf0] %v4145_v20  ;;  %8610 = vmatprep.subr.bf16.mxu1 %v8809_v3 }
 0xeac   :  { %8588 = vmatpush3.bf16.msra.mxu0 %v10221_v1 }
 0xead   :  { %8589 = vmatprep.subr.bf16.mxu0 %v8809_v3 }
 0xeae   :  { %8612 = vmatpush3.bf16.msra.mxu1 %v10416_v22  ;;  %v8691_v22 = vld [vmem:[%s10731_s5 + $0x28] sm:$0xff]  }
 0xeaf   :  { %8613 = vmatprep.subr.bf16.mxu1 %v8809_v3 }
 0xeb0   :  { %8591 = vmatpush3.bf16.msra.mxu0 %v10233_v37 }
 0xeb1   :  { %8592 = vmatprep.subr.bf16.mxu0 %v8809_v3 }
 0xeb2   :  { %8615 = vmatpush3.bf16.msra.mxu1 %v10431_v30  ;;  %v8692_v30 = vld [vmem:[%s10731_s5 + $0x30] sm:$0xff]  }
 0xeb3   :  { %8616 = vmatprep.subr.bf16.mxu1 %v8809_v3 }
 0xeb4   :  { %8594 = vmatpush3.bf16.msra.mxu0 %v10243_v4 }
 0xeb5   :  { %8595 = vmatprep.subr.bf16.mxu0 %v8809_v3 }
 0xeb6   :  { %8618 = vmatpush3.bf16.msra.mxu1 %v10441_v60  ;;  %v8693_v60 = vld [vmem:[%s10731_s5 + $0x38] sm:$0xff]  }
 0xeb7   :  { %8619 = vmatprep.subr.bf16.mxu1 %v8809_v3 }
 0xeb8   :  { %8597 = vmatpush3.bf16.msra.mxu0 %v10253_v13 }
 0xeb9   :  { %8598 = vmatprep.subr.bf16.mxu0 %v8809_v3 }
 0xeba   :  { %8621 = vmatpush3.bf16.msra.mxu1 %v10451_v35 }
 0xebb   :  { %8622 = vmatprep.subr.bf16.mxu1 %v8809_v3 }
 0xebc   :  { %8600 = vmatpush3.bf16.msra.mxu0 %v10263_v40 }
 0xebd   :  { %8601 = vmatprep.subr.bf16.mxu0 %v8809_v3 }
 0xebe   :  { %8624 = vmatpush3.bf16.msra.mxu1 %v10461_v63 }
 0xebf   :  { %8625 = vmatprep.subr.bf16.mxu1 %v8809_v3 }
 0xec0   :  { %8603 = vmatpush3.bf16.msra.mxu0 %v10273_v7 }
 0xec1   :  { %8604 = vmatprep.subr.bf16.mxu0 %v8809_v3 }
 0xec2   :  { %8627 = vmatpush3.bf16.msra.mxu1 %v10475_v16 }
 0xec3   :  { %8628 = vmatprep.subr.bf16.mxu1 %v8809_v3 }
 0xec4   :  { %8606 = vmatpush3.bf16.msra.mxu0 %v10283_v5  ;;  %v4683_v5 = vld [vmem:[#allocation2 + $0x30] sm:$0xff] }
 0xec5   :  { %8631 = vmatprep.subr.bf16.mxu0 %v8809_v3 }
 0xec6   :  { %8630 = vmatpush3.bf16.msra.mxu1 %v10487_v34 }
 0xec7   :  { %7411 = vmatmul.mubr.f32.vlgmr.msra.gmra.mrb[52].mxu0 %v8751_v0 }
 0xec8   :  { %8633 = vmatpush3.bf16.msra.mxu0 %v10311_v24  ;;  %7480 = vmatprep.mubr.msk.f32.mxu0 %vm8810_vm0, %v8811_v6 }
 0xec9   :  { %8634 = vmatprep.subr.bf16.mxu0 %v8809_v3 }
 0xecc   :  { %8636 = vmatpush3.bf16.msra.mxu0 %v10324_v55 }
 0xecd   :  { %8637 = vmatprep.subr.bf16.mxu0 %v8809_v3 }
 0xed0   :  { %8639 = vmatpush3.bf16.msra.mxu0 %v10340_v10 }
 0xed1   :  { %8640 = vmatprep.subr.bf16.mxu0 %v8809_v3 }
 0xed4   :  { %8642 = vmatpush3.bf16.msra.mxu0 %v10349_v25 }
 0xed5   :  { %8643 = vmatprep.subr.bf16.mxu0 %v8809_v3 }
 0xed8   :  { %8645 = vmatpush3.bf16.msra.mxu0 %v10361_v39  ;;  %v8686_v39 = vld [vmem:[%s10731_s5] sm:$0xff]  }
 0xed9   :  { %8646 = vmatprep.subr.bf16.mxu0 %v8809_v3  ;;  %7483 = vmatprep.subr.bf16.mxu1 %v8686_v39 }
 0xedc   :  { %8648 = vmatpush3.bf16.msra.mxu0 %v10371_v36  ;;  %v8687_v36 = vld [vmem:[%s10731_s5 + $0x8] sm:$0xff]  }
 0xedd   :  { %8649 = vmatprep.subr.bf16.mxu0 %v8809_v3 }
 0xee0   :  { %8651 = vmatpush3.bf16.msra.mxu0 %v10381_v32  ;;  %v8688_v32 = vld [vmem:[%s10731_s5 + $0x10] sm:$0xff]  }
 0xee1   :  { %8652 = vmatprep.subr.bf16.mxu0 %v8809_v3  ;;  %v4878_v3 = vld [vmem:[%s10726_s0 + $0x78] sm:$0xff] }
 0xee4   :  { %8654 = vmatpush3.bf16.msra.mxu0 %v10391_v61  ;;  %v8689_v61 = vld [vmem:[%s10731_s5 + $0x18] sm:$0xff]   ;;  %s8812_s5 = smov [#allocation5]  }
 0xee5   :  { %s4823_s4 = sshll.u32 %s8812_s5, 4  ;;  %s4824_s4 = int_to_ptr.vmem [resolvable:$true] %s4823_s4 }
 0xee6   :  { %s8761_s20 = scalar_lea.vmem %s4824_s4, 256  ;;  %p8766_p1 = scmp.lt.s32.totalorder %s4824_s4, %s4824_s4 }
 0xee7   :  { %p8762_p0 = scmp.ne.s32.totalorder %s4824_s4, %s8761_s20  ;;  %p8767_p2 = scmp.lt.s32.totalorder %s8761_s20, %s8761_s20 }
 0xee9   :  { %p8768_p3 = por %p8767_p2, %p8766_p1 }
 0xeeb   :  { %p8769_p4 = pnand %p8768_p3, %p8762_p0 }
 0xf7a   :  { %v4336_v6 = vpop.f32.mrb[50].mxu0 }
 0xf7b   :  { %v4406_v26 = vpop.f32.mrb[48].mxu1  ;;  %v7342_v1 = vpop.f32.mrb[51].mxu0 }
 0xf7c   :  { %v4407_v37 = vadd.f32 %v4406_v26, %v4336_v6  ;;  %v7377_v4 = vpop.f32.mrb[49].mxu1 }
 0xf7e   :  { %v4410_v13 = vadd.f32 %v10398_v9, %v4407_v37 }
 0xf80   :  { %8752 = vtanh.f32 %v4410_v13 }
 0xf8a   :  { %v8753_v40 = vpop.eup %8752 }
 0xf8b   :  { %v4412_v7 = vpack.c.bf16 %v8753_v40, %v8753_v40  ;;  %7446 = vmatmul.mubr.f32.vlgmr.msra.gmra.mrb[50].mxu1 %v8753_v40 }
 0xf8c   :  { %7499 = vmatprep.mubr.bf16.mxu1 %v4683_v5  ;;  %7484 = vmatpush3.bf16.msra.mxu1 %v8686_v39 }
 0xf8d   :  { %4413 = vst [vmem:[#allocation2 + $0x38] sm:$0xf] %v4412_v7  ;;  %7485 = vmatprep.subr.bf16.mxu1 %v8687_v36 }
 0xf90   :  { %7486 = vmatpush3.bf16.msra.mxu1 %v8687_v36 }
 0xf91   :  { %7487 = vmatprep.subr.bf16.mxu1 %v8688_v32 }
 0xf94   :  { %7488 = vmatpush3.bf16.msra.mxu1 %v8688_v32 }
 0xf95   :  { %7489 = vmatprep.subr.bf16.mxu1 %v8689_v61 }
 0xf98   :  { %7490 = vmatpush3.bf16.msra.mxu1 %v8689_v61 }
 0xf99   :  { %7491 = vmatprep.subr.bf16.mxu1 %v8690_v48 }
 0xf9a   :  { %v4498_v24 = vpop.f32.mrb[52].mxu0 }
 0xf9b   :  { %v4502_v55 = vadd.f32 %v4878_v3, %v4498_v24  ;;  %v7412_v10 = vpop.f32.mrb[53].mxu0 }
 0xf9c   :  { %7492 = vmatpush3.bf16.msra.mxu1 %v8690_v48 }
 0xf9d   :  { %8754 = vtanh.f32 %v4502_v55  ;;  %7493 = vmatprep.subr.bf16.mxu1 %v8691_v22 }
 0xfa0   :  { %7494 = vmatpush3.bf16.msra.mxu1 %v8691_v22 }
 0xfa1   :  { %7495 = vmatprep.subr.bf16.mxu1 %v8692_v30 }
 0xfa4   :  { %7496 = vmatpush3.bf16.msra.mxu1 %v8692_v30 }
 0xfa5   :  { %7497 = vmatprep.subr.bf16.mxu1 %v8693_v60 }
 0xfa7   :  { %v8755_v25 = vpop.eup %8754 }
 0xfa8   :  { %4803 = vst [vmem:[#allocation5] sm:$0xff] %v8755_v25  ;;  %7481 = vmatmul.mubr.f32.vlgmr.msra.gmra.mrb[54].mxu0 %v8755_v25  ;;  %7498 = vmatpush3.bf16.msra.mxu1 %v8693_v60 }
0x105e   :  { %v4602_v35 = vpop.f32.mrb[50].mxu1 }
0x105f   :  { %v7447_v63 = vpop.f32.mrb[51].mxu1 }
0x107b   :  { %v4672_v16 = vpop.f32.mrb[54].mxu0 }
0x107c   :  { %v4673_v33 = vadd.f32 %v4672_v16, %v4602_v35  ;;  %v7482_v34 = vpop.f32.mrb[55].mxu0 }
0x107e   :  { %v4676_v45 = vadd.f32 %v10398_v9, %v4673_v33 }
0x1080   :  { %8756 = vtanh.f32 %v4676_v45 }
0x108a   :  { %v8757_v57 = vpop.eup %8756 }
0x108b   :  { %v4678_v15 = vpack.c.bf16 %v8757_v57, %v8757_v57  ;;  %4805 = vst [vmem:[#allocation5 + $0x8] sm:$0xff] %v8757_v57 }
0x108d   :  { %v4680_v44 = vrot.slane %v4678_v15, 4 }
0x108f   :  { %4682 = vst [vmem:[#allocation2 + $0x38] sm:$0xf0] %v4680_v44 }
0x1096   :  { %v4684_v54 = vld [vmem:[#allocation2 + $0x38] sm:$0xff] }
0x1097   :  { %7500 = vmatmul.mubr.bf16.vlgmr.msra.gmra.mrb[52].mxu1 %v4684_v54 }
0x1098   :  { %8772 = shalt.err (!%p8769_p4)
}
0x1099   :  { %s8773_s3 = scalar_lea.hbm %s10734_s8, 256 }
0x109a   :  { %p8774_p5 = scmp.ne.s32.totalorder %s10734_s8, %s8773_s3  ;;  %p8777_p6 = scmp.lt.u32.totalorder %s8773_s3, %s10734_s8 }
0x109c   :  { %p8779_p7 = pnand %p8777_p6, %p8774_p5 }
0x109e   :  { %8782 = shalt.err (!%p8779_p7)
}
0x109f   :  { %s8813_s26 = smov 128   ;;  %s8814_s27 = smov 8  }
0x10a0   :  { %4829 = dma.vmem_to_hbm [thread:$0]  %s4824_s4, 256, %s10734_s8, [#allocation6], %s8813_s26, %s8813_s26, %s8814_s27  }
0x10a1   :  { %s8815_s30 = smov [#allocation3]  }
0x10a2   :  { %s4811_s9 = sshll.u32 %s8815_s30, 4  ;;  %s4812_s9 = int_to_ptr.vmem [resolvable:$true] %s4811_s9 }
0x10a3   :  { %s8783_s8 = scalar_lea.vmem %s4812_s9, 2048  ;;  %p8788_p9 = scmp.lt.s32.totalorder %s4812_s9, %s4812_s9 }
0x10a4   :  { %p8784_p8 = scmp.ne.s32.totalorder %s4812_s9, %s8783_s8  ;;  %p8789_p10 = scmp.lt.s32.totalorder %s8783_s8, %s8783_s8 }
0x10a6   :  { %p8790_p11 = por %p8789_p10, %p8788_p9 }
0x10a8   :  { %p8791_p12 = pnand %p8790_p11, %p8784_p8 }
0x116a   :  { %v7501_v9 = vpop.f32.mrb[52].mxu1 }
0x116b   :  { %v4792_v19 = vadd.f32 %v10543_v38, %v7501_v9  ;;  %v4783_v28 = vpop.f32.mrb[53].mxu1 }
0x116c   :  { %v4784_v43 = vadd.f32 %v10543_v38, %v4783_v28  ;;  %v7502_v51 = vpop.f32.mrb[54].mxu1 }
0x116d   :  { %4801 = vst [vmem:[#allocation3 + $0x70] sm:$0xff] %v4792_v19  ;;  %v4795_v27 = vadd.f32 %v10543_v38, %v7502_v51  ;;  %v4786_v17 = vpop.f32.mrb[55].mxu1 }
0x116e   :  { %4799 = vst [vmem:[#allocation3 + $0x60] sm:$0xff] %v4784_v43  ;;  %v4787_v46 = vadd.f32 %v10543_v38, %v4786_v17 }
0x116f   :  { %4802 = vst [vmem:[#allocation3 + $0x78] sm:$0xff] %v4795_v27 }
0x1170   :  { %4800 = vst [vmem:[#allocation3 + $0x68] sm:$0xff] %v4787_v46 }
0x1171   :  { %8794 = shalt.err (!%p8791_p12)
}
0x1172   :  { %s8795_s11 = scalar_lea.hbm %s10733_s7, 2048 }
0x1173   :  { %p8796_p13 = scmp.ne.s32.totalorder %s10733_s7, %s8795_s11  ;;  %p8799_p0 = scmp.lt.u32.totalorder %s8795_s11, %s10733_s7 }
0x1175   :  { %p8801_p1 = pnand %p8799_p0, %p8796_p13 }
0x1177   :  { %8804 = shalt.err (!%p8801_p1)
}
0x1178   :  { %4817 = dma.vmem_to_hbm [thread:$0]  %s4812_s9, 2048, %s10733_s7, [#allocation4], %s8813_s26, %s8813_s26, %s8814_s27  }
0x1179   :  { %8805 = dma.done.wait [#allocation4], 2048  }
0x117a   :  { %8806 = vsyncadd [#allocation4], 4294965248 }
0x117b   :  { %8807 = dma.done.wait [#allocation6], 256  }
0x117c   :  { %8808 = vsyncadd [#allocation6], 4294967040 }
0x117d   :  { %4836 = vsyncpa [#allocation4], 1 }
0x117e   :  { %4837 = vsyncpa [#allocation6], 1 }

</bundles_post_ra>
